<compile_context>
chip_gen: v6e
topology: v6e:2x2x1
jax: 0.10.0
libtpu: 0.0.40
codegen_flags: <defaults>
</compile_context>

<pallas_src>
import functools

import numpy as np

import jax
import jax.numpy as jnp
from jax.experimental import pallas as pl
from jax.experimental.pallas import tpu as pltpu


# ------------------------------ fused kernel ------------------------------- #

def fused_cnn_kernel(x_ref, m1_ref, b1_ref, m2_ref, b2_ref,
                     f1_ref, b3_ref, f2_ref, b4_ref,
                     o_ref, p1_ref, *, bb):
    """One grid step = bb images.  Row layout everywhere: row = h_index*bb + image."""
    f32 = jnp.float32

    # ---- conv1 (1->10, k=5) with the W max-pool folded into even/odd output-column
    # weight sets: 2 x 5 banded matmuls; every LHS slice is contiguous & 8-aligned.
    c1e = jnp.zeros((24 * bb, 120), f32)
    c1o = jnp.zeros((24 * bb, 120), f32)
    for kh in range(5):
        xs = x_ref[kh * bb:(kh + 24) * bb, :]                   # (24*bb, 28)
        c1e = c1e + jnp.dot(xs, m1_ref[kh], preferred_element_type=f32)
        c1o = c1o + jnp.dot(xs, m1_ref[5 + kh], preferred_element_type=f32)
    a1 = jnp.maximum(c1e, c1o) + b1_ref[...]                    # (24*bb, 120)

    # ---- H max-pool + ReLU (pool1): rows (2i, 2i+1) -> i; all slices 8-aligned.
    for i in range(12):
        p1_ref[i * bb:(i + 1) * bb, :] = jnp.maximum(
            jnp.maximum(a1[(2 * i) * bb:(2 * i + 1) * bb, :],
                        a1[(2 * i + 1) * bb:(2 * i + 2) * bb, :]), 0.0)

    # ---- conv2 (10->20, k=5), same even/odd W-pool folding; Dropout2d = identity.
    c2e = jnp.zeros((8 * bb, 80), f32)
    c2o = jnp.zeros((8 * bb, 80), f32)
    for kh in range(5):
        ps = p1_ref[kh * bb:(kh + 8) * bb, :]                   # (8*bb, 120)
        c2e = c2e + jnp.dot(ps, m2_ref[kh], preferred_element_type=f32)
        c2o = c2o + jnp.dot(ps, m2_ref[5 + kh], preferred_element_type=f32)
    c2 = jnp.maximum(c2e, c2o) + b2_ref[...]                    # (8*bb, 80)

    # ---- H max-pool + ReLU (pool2) fused straight into fc1 (no p2 scratch):
    # fc1 = sum over the 4 pooled rows of (bb, 80) @ (80, 50).
    h1 = jnp.zeros((bb, 50), f32)
    for hh in range(4):
        piece = jnp.maximum(
            jnp.maximum(c2[(2 * hh) * bb:(2 * hh + 1) * bb, :],
                        c2[(2 * hh + 1) * bb:(2 * hh + 2) * bb, :]), 0.0)
        h1 = h1 + jnp.dot(piece, f1_ref[hh], preferred_element_type=f32)
    h1 = jnp.maximum(h1 + b3_ref[...], 0.0)                     # fc1 + ReLU; F.dropout = id

    # ---- fc2 + numerically stable log_softmax over 128 padded lanes
    # (pad columns carry bias -1e9 -> exp underflows to 0; sliced off in wrapper).
    logits = jnp.dot(h1, f2_ref[...], preferred_element_type=f32) + b4_ref[...]
    m = jnp.max(logits, axis=-1, keepdims=True)
    s = logits - m
    lse = jnp.log(jnp.sum(jnp.exp(s), axis=-1, keepdims=True))
    o_ref[...] = (s - lse).astype(o_ref.dtype)                  # (bb, 128) lane-dense


# --------------------------- parameter preparation -------------------------- #

def prepare_params(params):
    """One-time conversion of PyTorch-layout weights into kernel-ready operands."""
    w1 = np.asarray(params["conv1_w"], np.float32)     # (10, 1, 5, 5)
    w2 = np.asarray(params["conv2_w"], np.float32)     # (20, 10, 5, 5)
    nc = params["fc2_w"].shape[0]
    assert nc <= 128

    # conv1 even/odd banded weights (2x2 W-pool absorbed by splitting output
    # columns): m1[e*5+kh][w, j*10+c] = w1[c, 0, kh, w - (2j+e)] for 0<=w-(2j+e)<=4.
    bands1 = np.zeros((2, 5, 28, 12), np.float32)
    bands2 = np.zeros((2, 5, 12, 4), np.float32)
    for e in range(2):
        for kw in range(5):
            for j in range(12):
                bands1[e, kw, 2 * j + e + kw, j] = 1.0
            for j in range(4):
                bands2[e, kw, 2 * j + e + kw, j] = 1.0
    m1 = np.einsum("evwj,cKv->eKwjc", bands1, w1[:, 0]).reshape(10, 28, 120)
    # m2[e*5+kh][jj*10+ci, j2*20+co] = w2[co, ci, kh, jj - (2*j2+e)]
    m2 = np.einsum("evJj,ocKv->eKJcjo", bands2, w2).reshape(10, 120, 80)

    # fc1: PyTorch flatten order is (c, h, w); our pooled2 layout is rows=(h, image),
    # lanes=(w, c) -> pre-permute once so the kernel never transposes.
    f1 = (np.asarray(params["fc1_w"], np.float32)
          .reshape(50, 20, 4, 4).transpose(2, 3, 1, 0).reshape(4, 80, 50))

    # fc2 padded to 128 lanes for a lane-dense output block; padded logits get a
    # large negative bias so they vanish from the log-softmax.
    f2 = np.zeros((50, 128), np.float32)
    f2[:, :nc] = np.asarray(params["fc2_w"], np.float32).T
    b4 = np.full((1, 128), -1e9, np.float32)
    b4[0, :nc] = np.asarray(params["fc2_b"], np.float32)

    return {
        "m1": jnp.asarray(m1),
        "b1": jnp.asarray(np.tile(np.asarray(params["conv1_b"], np.float32), 12)
                          .reshape(1, 120)),
        "m2": jnp.asarray(m2),
        "b2": jnp.asarray(np.tile(np.asarray(params["conv2_b"], np.float32), 4)
                          .reshape(1, 80)),
        "f1": jnp.asarray(f1),
        "b3": jnp.asarray(np.asarray(params["fc1_b"], np.float32).reshape(1, 50)),
        "f2": jnp.asarray(f2),
        "b4": jnp.asarray(b4),
    }


# -------------------------------- forward ----------------------------------- #

def _round_up(v, m):
    return ((v + m - 1) // m) * m


def cnn_mnist_forward(x_nchw, prep, *, num_classes=10, block_batch=16):
    B = x_nchw.shape[0]
    bb = _round_up(min(block_batch, _round_up(B, 8)), 8)   # images per grid step
    Bp = _round_up(B, bb)
    nb = Bp // bb

    x = x_nchw.reshape(B, 28, 28).astype(jnp.float32)
    if Bp != B:
        x = jnp.pad(x, ((0, Bp - B), (0, 0), (0, 0)))
    # Per block, rows are (h-major, image-minor): row = h*bb + b_local.  Pure
    # wrapper-side layout plumbing; keeps every in-kernel slice contiguous/aligned.
    x2d = (x.reshape(nb, bb, 28, 28).transpose(0, 2, 1, 3)
            .reshape(nb * 28 * bb, 28))

    kernel = functools.partial(fused_cnn_kernel, bb=bb)
    out = pl.pallas_call(
        kernel,
        out_shape=jax.ShapeDtypeStruct((Bp, 128), jnp.float32),
        grid=(nb,),
        in_specs=[
            pl.BlockSpec((28 * bb, 28), lambda i: (i, 0)),       # images of this block
            pl.BlockSpec((10, 28, 120), lambda i: (0, 0, 0)),    # conv1 even/odd bands
            pl.BlockSpec((1, 120), lambda i: (0, 0)),            # conv1 bias row
            pl.BlockSpec((10, 120, 80), lambda i: (0, 0, 0)),    # conv2 even/odd bands
            pl.BlockSpec((1, 80), lambda i: (0, 0)),             # conv2 bias row
            pl.BlockSpec((4, 80, 50), lambda i: (0, 0, 0)),      # fc1 weights (permuted)
            pl.BlockSpec((1, 50), lambda i: (0, 0)),             # fc1 bias
            pl.BlockSpec((50, 128), lambda i: (0, 0)),           # fc2 weights (128-pad)
            pl.BlockSpec((1, 128), lambda i: (0, 0)),            # fc2 bias (pad = -1e9)
        ],
        out_specs=pl.BlockSpec((bb, 128), lambda i: (i, 0)),     # lane-dense logits
        scratch_shapes=[pltpu.VMEM((12 * bb, 120), jnp.float32)],  # pooled1
        compiler_params=pltpu.CompilerParams(
            dimension_semantics=("parallel",)),
        cost_estimate=pl.CostEstimate(
            flops=3_300_000 * Bp,
            transcendentals=130 * Bp,
            bytes_accessed=Bp * (28 * 28 * 4 + 128 * 4) + 650_000),
    )(x2d, prep["m1"], prep["b1"], prep["m2"], prep["b2"],
      prep["f1"], prep["b3"], prep["f2"], prep["b4"])
    return out[:B, :num_classes]


# --------------------------- reference (pure JAX) ---------------------------- #

def reference_forward(x, params):
    def conv(x, w, b):
        y = jax.lax.conv_general_dilated(
            x, w, window_strides=(1, 1), padding="VALID",
            dimension_numbers=("NCHW", "OIHW", "NCHW"))
        return y + b[None, :, None, None]

    def pool(x):
        return jax.lax.reduce_window(x, -jnp.inf, jax.lax.max,
                                     (1, 1, 2, 2), (1, 1, 2, 2), "VALID")

    x = jax.nn.relu(pool(conv(x, params["conv1_w"], params["conv1_b"])))
    x = jax.nn.relu(pool(conv(x, params["conv2_w"], params["conv2_b"])))
    x = x.reshape(x.shape[0], -1)
    x = jax.nn.relu(x @ params["fc1_w"].T + params["fc1_b"])
    x = x @ params["fc2_w"].T + params["fc2_b"]
    return jax.nn.log_softmax(x, axis=1)


# ------------------------------ parameter init ------------------------------- #

def init_params(key, num_classes=10):
    ks = jax.random.split(key, 8)

    def u(k, shape, fan_in):
        bound = 1.0 / jnp.sqrt(fan_in)
        return jax.random.uniform(k, shape, jnp.float32, -bound, bound)

    return {
        "conv1_w": u(ks[0], (10, 1, 5, 5), 1 * 5 * 5),
        "conv1_b": u(ks[1], (10,), 1 * 5 * 5),
        "conv2_w": u(ks[2], (20, 10, 5, 5), 10 * 5 * 5),
        "conv2_b": u(ks[3], (20,), 10 * 5 * 5),
        "fc1_w": u(ks[4], (50, 320), 320),
        "fc1_b": u(ks[5], (50,), 320),
        "fc2_w": u(ks[6], (num_classes, 50), 50),
        "fc2_b": u(ks[7], (num_classes,), 50),
    }


if __name__ == "__main__":
    key = jax.random.PRNGKey(0)
    k_params, k_x = jax.random.split(key)
    params = init_params(k_params, num_classes=10)
    prep = prepare_params(params)          # one-time weight layout preparation

    # fc1(320) forces 28x28x1 input; batch 32 -> 2 grid steps of 16 images each
    # (even grid so both v7x TensorCores get work).
    B = 32
    x = jax.random.normal(k_x, (B, 1, 28, 28), jnp.float32)

    fwd = jax.jit(cnn_mnist_forward, static_argnames=("num_classes", "block_batch"))
    out = jax.block_until_ready(fwd(x, prep, num_classes=10, block_batch=16))

    ref = reference_forward(x, params)

    assert out.shape == (B, 10), out.shape
    assert bool(jnp.all(jnp.isfinite(out)))
    assert bool(jnp.allclose(jnp.sum(jnp.exp(out), axis=1), 1.0, atol=1e-4))
    assert bool(jnp.allclose(out, ref, atol=2e-4, rtol=2e-4)), "mismatch vs reference"
    print("KERNEL_OK")
</pallas_src>

<mosaic_0001>
module attributes {stable_mosaic.version = 11 : i64} {
  func.func @fused_cnn_kernel(%arg0: i32, %arg1: memref<448x28xf32, #tpu.memory_space<vmem>>, %arg2: memref<10x28x120xf32, #tpu.memory_space<vmem>>, %arg3: memref<1x120xf32, #tpu.memory_space<vmem>>, %arg4: memref<10x120x80xf32, #tpu.memory_space<vmem>>, %arg5: memref<1x80xf32, #tpu.memory_space<vmem>>, %arg6: memref<4x80x50xf32, #tpu.memory_space<vmem>>, %arg7: memref<1x50xf32, #tpu.memory_space<vmem>>, %arg8: memref<50x128xf32, #tpu.memory_space<vmem>>, %arg9: memref<1x128xf32, #tpu.memory_space<vmem>>, %arg10: memref<16x128xf32, #tpu.memory_space<vmem>>, %arg11: memref<192x120xf32, #tpu.memory_space<vmem>>) attributes {dimension_semantics = [#tpu.dimension_semantics<parallel>], iteration_bounds = array<i64: 2>, scalar_prefetch = 0 : i64, scratch_operands = 1 : i64, tpu.core_type = #tpu.core_type<tc>, window_params = [{transform_indices = @transform_0, window_bounds = array<i64: 448, 28>}, {pipeline_mode = #tpu.pipeline_mode<synchronous>, transform_indices = @transform_1, window_bounds = array<i64: 10, 28, 120>}, {pipeline_mode = #tpu.pipeline_mode<synchronous>, transform_indices = @transform_2, window_bounds = array<i64: 1, 120>}, {pipeline_mode = #tpu.pipeline_mode<synchronous>, transform_indices = @transform_3, window_bounds = array<i64: 10, 120, 80>}, {pipeline_mode = #tpu.pipeline_mode<synchronous>, transform_indices = @transform_4, window_bounds = array<i64: 1, 80>}, {pipeline_mode = #tpu.pipeline_mode<synchronous>, transform_indices = @transform_5, window_bounds = array<i64: 4, 80, 50>}, {pipeline_mode = #tpu.pipeline_mode<synchronous>, transform_indices = @transform_6, window_bounds = array<i64: 1, 50>}, {pipeline_mode = #tpu.pipeline_mode<synchronous>, transform_indices = @transform_7, window_bounds = array<i64: 50, 128>}, {pipeline_mode = #tpu.pipeline_mode<synchronous>, transform_indices = @transform_8, window_bounds = array<i64: 1, 128>}, {transform_indices = @transform_9, window_bounds = array<i64: 16, 128>}]} {
    %cst = arith.constant 0.000000e+00 : f32
    %0 = vector.broadcast %cst : f32 to vector<384x120xf32>
    %cst_0 = arith.constant 0.000000e+00 : f32
    %1 = vector.broadcast %cst_0 : f32 to vector<384x120xf32>
    %c0 = arith.constant 0 : index
    %c0_1 = arith.constant 0 : index
    %2 = vector.load %arg1[%c0, %c0_1] : memref<448x28xf32, #tpu.memory_space<vmem>>, vector<384x28xf32>
    %c0_2 = arith.constant 0 : index
    %c0_3 = arith.constant 0 : index
    %c0_4 = arith.constant 0 : index
    %3 = vector.load %arg2[%c0_2, %c0_3, %c0_4] : memref<10x28x120xf32, #tpu.memory_space<vmem>>, vector<1x28x120xf32>
    %4 = vector.shape_cast %3 : vector<1x28x120xf32> to vector<28x120xf32>
    %cst_5 = arith.constant dense<0.000000e+00> : vector<384x120xf32>
    %5 = tpu.matmul %2, %4, %cst_5 {dimension_numbers = #tpu.dot_dimension_numbers<[1], [0], [0], [1], [0, 0, 1, 1], [], []>} : vector<384x28xf32>, vector<28x120xf32>, vector<384x120xf32> -> vector<384x120xf32>
    %6 = arith.addf %0, %5 : vector<384x120xf32>
    %c5 = arith.constant 5 : index
    %c0_6 = arith.constant 0 : index
    %c0_7 = arith.constant 0 : index
    %7 = vector.load %arg2[%c5, %c0_6, %c0_7] : memref<10x28x120xf32, #tpu.memory_space<vmem>>, vector<1x28x120xf32>
    %8 = vector.shape_cast %7 : vector<1x28x120xf32> to vector<28x120xf32>
    %cst_8 = arith.constant dense<0.000000e+00> : vector<384x120xf32>
    %9 = tpu.matmul %2, %8, %cst_8 {dimension_numbers = #tpu.dot_dimension_numbers<[1], [0], [0], [1], [0, 0, 1, 1], [], []>} : vector<384x28xf32>, vector<28x120xf32>, vector<384x120xf32> -> vector<384x120xf32>
    %10 = arith.addf %1, %9 : vector<384x120xf32>
    %c16 = arith.constant 16 : index
    %c0_9 = arith.constant 0 : index
    %11 = vector.load %arg1[%c16, %c0_9] : memref<448x28xf32, #tpu.memory_space<vmem>>, vector<384x28xf32>
    %c1 = arith.constant 1 : index
    %c0_10 = arith.constant 0 : index
    %c0_11 = arith.constant 0 : index
    %12 = vector.load %arg2[%c1, %c0_10, %c0_11] : memref<10x28x120xf32, #tpu.memory_space<vmem>>, vector<1x28x120xf32>
    %13 = vector.shape_cast %12 : vector<1x28x120xf32> to vector<28x120xf32>
    %cst_12 = arith.constant dense<0.000000e+00> : vector<384x120xf32>
    %14 = tpu.matmul %11, %13, %cst_12 {dimension_numbers = #tpu.dot_dimension_numbers<[1], [0], [0], [1], [0, 0, 1, 1], [], []>} : vector<384x28xf32>, vector<28x120xf32>, vector<384x120xf32> -> vector<384x120xf32>
    %15 = arith.addf %6, %14 : vector<384x120xf32>
    %c6 = arith.constant 6 : index
    %c0_13 = arith.constant 0 : index
    %c0_14 = arith.constant 0 : index
    %16 = vector.load %arg2[%c6, %c0_13, %c0_14] : memref<10x28x120xf32, #tpu.memory_space<vmem>>, vector<1x28x120xf32>
    %17 = vector.shape_cast %16 : vector<1x28x120xf32> to vector<28x120xf32>
    %cst_15 = arith.constant dense<0.000000e+00> : vector<384x120xf32>
    %18 = tpu.matmul %11, %17, %cst_15 {dimension_numbers = #tpu.dot_dimension_numbers<[1], [0], [0], [1], [0, 0, 1, 1], [], []>} : vector<384x28xf32>, vector<28x120xf32>, vector<384x120xf32> -> vector<384x120xf32>
    %19 = arith.addf %10, %18 : vector<384x120xf32>
    %c32 = arith.constant 32 : index
    %c0_16 = arith.constant 0 : index
    %20 = vector.load %arg1[%c32, %c0_16] : memref<448x28xf32, #tpu.memory_space<vmem>>, vector<384x28xf32>
    %c2 = arith.constant 2 : index
    %c0_17 = arith.constant 0 : index
    %c0_18 = arith.constant 0 : index
    %21 = vector.load %arg2[%c2, %c0_17, %c0_18] : memref<10x28x120xf32, #tpu.memory_space<vmem>>, vector<1x28x120xf32>
    %22 = vector.shape_cast %21 : vector<1x28x120xf32> to vector<28x120xf32>
    %cst_19 = arith.constant dense<0.000000e+00> : vector<384x120xf32>
    %23 = tpu.matmul %20, %22, %cst_19 {dimension_numbers = #tpu.dot_dimension_numbers<[1], [0], [0], [1], [0, 0, 1, 1], [], []>} : vector<384x28xf32>, vector<28x120xf32>, vector<384x120xf32> -> vector<384x120xf32>
    %24 = arith.addf %15, %23 : vector<384x120xf32>
    %c7 = arith.constant 7 : index
    %c0_20 = arith.constant 0 : index
    %c0_21 = arith.constant 0 : index
    %25 = vector.load %arg2[%c7, %c0_20, %c0_21] : memref<10x28x120xf32, #tpu.memory_space<vmem>>, vector<1x28x120xf32>
    %26 = vector.shape_cast %25 : vector<1x28x120xf32> to vector<28x120xf32>
    %cst_22 = arith.constant dense<0.000000e+00> : vector<384x120xf32>
    %27 = tpu.matmul %20, %26, %cst_22 {dimension_numbers = #tpu.dot_dimension_numbers<[1], [0], [0], [1], [0, 0, 1, 1], [], []>} : vector<384x28xf32>, vector<28x120xf32>, vector<384x120xf32> -> vector<384x120xf32>
    %28 = arith.addf %19, %27 : vector<384x120xf32>
    %c48 = arith.constant 48 : index
    %c0_23 = arith.constant 0 : index
    %29 = vector.load %arg1[%c48, %c0_23] : memref<448x28xf32, #tpu.memory_space<vmem>>, vector<384x28xf32>
    %c3 = arith.constant 3 : index
    %c0_24 = arith.constant 0 : index
    %c0_25 = arith.constant 0 : index
    %30 = vector.load %arg2[%c3, %c0_24, %c0_25] : memref<10x28x120xf32, #tpu.memory_space<vmem>>, vector<1x28x120xf32>
    %31 = vector.shape_cast %30 : vector<1x28x120xf32> to vector<28x120xf32>
    %cst_26 = arith.constant dense<0.000000e+00> : vector<384x120xf32>
    %32 = tpu.matmul %29, %31, %cst_26 {dimension_numbers = #tpu.dot_dimension_numbers<[1], [0], [0], [1], [0, 0, 1, 1], [], []>} : vector<384x28xf32>, vector<28x120xf32>, vector<384x120xf32> -> vector<384x120xf32>
    %33 = arith.addf %24, %32 : vector<384x120xf32>
    %c8 = arith.constant 8 : index
    %c0_27 = arith.constant 0 : index
    %c0_28 = arith.constant 0 : index
    %34 = vector.load %arg2[%c8, %c0_27, %c0_28] : memref<10x28x120xf32, #tpu.memory_space<vmem>>, vector<1x28x120xf32>
    %35 = vector.shape_cast %34 : vector<1x28x120xf32> to vector<28x120xf32>
    %cst_29 = arith.constant dense<0.000000e+00> : vector<384x120xf32>
    %36 = tpu.matmul %29, %35, %cst_29 {dimension_numbers = #tpu.dot_dimension_numbers<[1], [0], [0], [1], [0, 0, 1, 1], [], []>} : vector<384x28xf32>, vector<28x120xf32>, vector<384x120xf32> -> vector<384x120xf32>
    %37 = arith.addf %28, %36 : vector<384x120xf32>
    %c64 = arith.constant 64 : index
    %c0_30 = arith.constant 0 : index
    %38 = vector.load %arg1[%c64, %c0_30] : memref<448x28xf32, #tpu.memory_space<vmem>>, vector<384x28xf32>
    %c4 = arith.constant 4 : index
    %c0_31 = arith.constant 0 : index
    %c0_32 = arith.constant 0 : index
    %39 = vector.load %arg2[%c4, %c0_31, %c0_32] : memref<10x28x120xf32, #tpu.memory_space<vmem>>, vector<1x28x120xf32>
    %40 = vector.shape_cast %39 : vector<1x28x120xf32> to vector<28x120xf32>
    %cst_33 = arith.constant dense<0.000000e+00> : vector<384x120xf32>
    %41 = tpu.matmul %38, %40, %cst_33 {dimension_numbers = #tpu.dot_dimension_numbers<[1], [0], [0], [1], [0, 0, 1, 1], [], []>} : vector<384x28xf32>, vector<28x120xf32>, vector<384x120xf32> -> vector<384x120xf32>
    %42 = arith.addf %33, %41 : vector<384x120xf32>
    %c9 = arith.constant 9 : index
    %c0_34 = arith.constant 0 : index
    %c0_35 = arith.constant 0 : index
    %43 = vector.load %arg2[%c9, %c0_34, %c0_35] : memref<10x28x120xf32, #tpu.memory_space<vmem>>, vector<1x28x120xf32>
    %44 = vector.shape_cast %43 : vector<1x28x120xf32> to vector<28x120xf32>
    %cst_36 = arith.constant dense<0.000000e+00> : vector<384x120xf32>
    %45 = tpu.matmul %38, %44, %cst_36 {dimension_numbers = #tpu.dot_dimension_numbers<[1], [0], [0], [1], [0, 0, 1, 1], [], []>} : vector<384x28xf32>, vector<28x120xf32>, vector<384x120xf32> -> vector<384x120xf32>
    %46 = arith.addf %37, %45 : vector<384x120xf32>
    %47 = arith.maximumf %42, %46 : vector<384x120xf32>
    %c0_37 = arith.constant 0 : index
    %c0_38 = arith.constant 0 : index
    %48 = vector.load %arg3[%c0_37, %c0_38] : memref<1x120xf32, #tpu.memory_space<vmem>>, vector<1x120xf32>
    %49 = vector.broadcast %48 : vector<1x120xf32> to vector<384x120xf32>
    %50 = arith.addf %47, %49 : vector<384x120xf32>
    %51 = vector.extract_strided_slice %50 {offsets = [0, 0], sizes = [16, 120], strides = [1, 1]} : vector<384x120xf32> to vector<16x120xf32>
    %52 = vector.extract_strided_slice %50 {offsets = [16, 0], sizes = [16, 120], strides = [1, 1]} : vector<384x120xf32> to vector<16x120xf32>
    %53 = arith.maximumf %51, %52 : vector<16x120xf32>
    %cst_39 = arith.constant 0.000000e+00 : f32
    %54 = vector.broadcast %cst_39 : f32 to vector<16x120xf32>
    %55 = arith.maximumf %53, %54 : vector<16x120xf32>
    %c0_40 = arith.constant 0 : index
    %c0_41 = arith.constant 0 : index
    %56 = vector.load %arg11[%c0_40, %c0_41] : memref<192x120xf32, #tpu.memory_space<vmem>>, vector<16x120xf32>
    tpu.vector_store %arg11[%c0_40, %c0_41], %55 {strides = array<i32>} : memref<192x120xf32, #tpu.memory_space<vmem>>, vector<16x120xf32>,
    %57 = vector.extract_strided_slice %50 {offsets = [32, 0], sizes = [16, 120], strides = [1, 1]} : vector<384x120xf32> to vector<16x120xf32>
    %58 = vector.extract_strided_slice %50 {offsets = [48, 0], sizes = [16, 120], strides = [1, 1]} : vector<384x120xf32> to vector<16x120xf32>
    %59 = arith.maximumf %57, %58 : vector<16x120xf32>
    %cst_42 = arith.constant 0.000000e+00 : f32
    %60 = vector.broadcast %cst_42 : f32 to vector<16x120xf32>
    %61 = arith.maximumf %59, %60 : vector<16x120xf32>
    %c16_43 = arith.constant 16 : index
    %c0_44 = arith.constant 0 : index
    %62 = vector.load %arg11[%c16_43, %c0_44] : memref<192x120xf32, #tpu.memory_space<vmem>>, vector<16x120xf32>
    tpu.vector_store %arg11[%c16_43, %c0_44], %61 {strides = array<i32>} : memref<192x120xf32, #tpu.memory_space<vmem>>, vector<16x120xf32>,
    %63 = vector.extract_strided_slice %50 {offsets = [64, 0], sizes = [16, 120], strides = [1, 1]} : vector<384x120xf32> to vector<16x120xf32>
    %64 = vector.extract_strided_slice %50 {offsets = [80, 0], sizes = [16, 120], strides = [1, 1]} : vector<384x120xf32> to vector<16x120xf32>
    %65 = arith.maximumf %63, %64 : vector<16x120xf32>
    %cst_45 = arith.constant 0.000000e+00 : f32
    %66 = vector.broadcast %cst_45 : f32 to vector<16x120xf32>
    %67 = arith.maximumf %65, %66 : vector<16x120xf32>
    %c32_46 = arith.constant 32 : index
    %c0_47 = arith.constant 0 : index
    %68 = vector.load %arg11[%c32_46, %c0_47] : memref<192x120xf32, #tpu.memory_space<vmem>>, vector<16x120xf32>
    tpu.vector_store %arg11[%c32_46, %c0_47], %67 {strides = array<i32>} : memref<192x120xf32, #tpu.memory_space<vmem>>, vector<16x120xf32>,
    %69 = vector.extract_strided_slice %50 {offsets = [96, 0], sizes = [16, 120], strides = [1, 1]} : vector<384x120xf32> to vector<16x120xf32>
    %70 = vector.extract_strided_slice %50 {offsets = [112, 0], sizes = [16, 120], strides = [1, 1]} : vector<384x120xf32> to vector<16x120xf32>
    %71 = arith.maximumf %69, %70 : vector<16x120xf32>
    %cst_48 = arith.constant 0.000000e+00 : f32
    %72 = vector.broadcast %cst_48 : f32 to vector<16x120xf32>
    %73 = arith.maximumf %71, %72 : vector<16x120xf32>
    %c48_49 = arith.constant 48 : index
    %c0_50 = arith.constant 0 : index
    %74 = vector.load %arg11[%c48_49, %c0_50] : memref<192x120xf32, #tpu.memory_space<vmem>>, vector<16x120xf32>
    tpu.vector_store %arg11[%c48_49, %c0_50], %73 {strides = array<i32>} : memref<192x120xf32, #tpu.memory_space<vmem>>, vector<16x120xf32>,
    %75 = vector.extract_strided_slice %50 {offsets = [128, 0], sizes = [16, 120], strides = [1, 1]} : vector<384x120xf32> to vector<16x120xf32>
    %76 = vector.extract_strided_slice %50 {offsets = [144, 0], sizes = [16, 120], strides = [1, 1]} : vector<384x120xf32> to vector<16x120xf32>
    %77 = arith.maximumf %75, %76 : vector<16x120xf32>
    %cst_51 = arith.constant 0.000000e+00 : f32
    %78 = vector.broadcast %cst_51 : f32 to vector<16x120xf32>
    %79 = arith.maximumf %77, %78 : vector<16x120xf32>
    %c64_52 = arith.constant 64 : index
    %c0_53 = arith.constant 0 : index
    %80 = vector.load %arg11[%c64_52, %c0_53] : memref<192x120xf32, #tpu.memory_space<vmem>>, vector<16x120xf32>
    tpu.vector_store %arg11[%c64_52, %c0_53], %79 {strides = array<i32>} : memref<192x120xf32, #tpu.memory_space<vmem>>, vector<16x120xf32>,
    %81 = vector.extract_strided_slice %50 {offsets = [160, 0], sizes = [16, 120], strides = [1, 1]} : vector<384x120xf32> to vector<16x120xf32>
    %82 = vector.extract_strided_slice %50 {offsets = [176, 0], sizes = [16, 120], strides = [1, 1]} : vector<384x120xf32> to vector<16x120xf32>
    %83 = arith.maximumf %81, %82 : vector<16x120xf32>
    %cst_54 = arith.constant 0.000000e+00 : f32
    %84 = vector.broadcast %cst_54 : f32 to vector<16x120xf32>
    %85 = arith.maximumf %83, %84 : vector<16x120xf32>
    %c80 = arith.constant 80 : index
    %c0_55 = arith.constant 0 : index
    %86 = vector.load %arg11[%c80, %c0_55] : memref<192x120xf32, #tpu.memory_space<vmem>>, vector<16x120xf32>
    tpu.vector_store %arg11[%c80, %c0_55], %85 {strides = array<i32>} : memref<192x120xf32, #tpu.memory_space<vmem>>, vector<16x120xf32>,
    %87 = vector.extract_strided_slice %50 {offsets = [192, 0], sizes = [16, 120], strides = [1, 1]} : vector<384x120xf32> to vector<16x120xf32>
    %88 = vector.extract_strided_slice %50 {offsets = [208, 0], sizes = [16, 120], strides = [1, 1]} : vector<384x120xf32> to vector<16x120xf32>
    %89 = arith.maximumf %87, %88 : vector<16x120xf32>
    %cst_56 = arith.constant 0.000000e+00 : f32
    %90 = vector.broadcast %cst_56 : f32 to vector<16x120xf32>
    %91 = arith.maximumf %89, %90 : vector<16x120xf32>
    %c96 = arith.constant 96 : index
    %c0_57 = arith.constant 0 : index
    %92 = vector.load %arg11[%c96, %c0_57] : memref<192x120xf32, #tpu.memory_space<vmem>>, vector<16x120xf32>
    tpu.vector_store %arg11[%c96, %c0_57], %91 {strides = array<i32>} : memref<192x120xf32, #tpu.memory_space<vmem>>, vector<16x120xf32>,
    %93 = vector.extract_strided_slice %50 {offsets = [224, 0], sizes = [16, 120], strides = [1, 1]} : vector<384x120xf32> to vector<16x120xf32>
    %94 = vector.extract_strided_slice %50 {offsets = [240, 0], sizes = [16, 120], strides = [1, 1]} : vector<384x120xf32> to vector<16x120xf32>
    %95 = arith.maximumf %93, %94 : vector<16x120xf32>
    %cst_58 = arith.constant 0.000000e+00 : f32
    %96 = vector.broadcast %cst_58 : f32 to vector<16x120xf32>
    %97 = arith.maximumf %95, %96 : vector<16x120xf32>
    %c112 = arith.constant 112 : index
    %c0_59 = arith.constant 0 : index
    %98 = vector.load %arg11[%c112, %c0_59] : memref<192x120xf32, #tpu.memory_space<vmem>>, vector<16x120xf32>
    tpu.vector_store %arg11[%c112, %c0_59], %97 {strides = array<i32>} : memref<192x120xf32, #tpu.memory_space<vmem>>, vector<16x120xf32>,
    %99 = vector.extract_strided_slice %50 {offsets = [256, 0], sizes = [16, 120], strides = [1, 1]} : vector<384x120xf32> to vector<16x120xf32>
    %100 = vector.extract_strided_slice %50 {offsets = [272, 0], sizes = [16, 120], strides = [1, 1]} : vector<384x120xf32> to vector<16x120xf32>
    %101 = arith.maximumf %99, %100 : vector<16x120xf32>
    %cst_60 = arith.constant 0.000000e+00 : f32
    %102 = vector.broadcast %cst_60 : f32 to vector<16x120xf32>
    %103 = arith.maximumf %101, %102 : vector<16x120xf32>
    %c128 = arith.constant 128 : index
    %c0_61 = arith.constant 0 : index
    %104 = vector.load %arg11[%c128, %c0_61] : memref<192x120xf32, #tpu.memory_space<vmem>>, vector<16x120xf32>
    tpu.vector_store %arg11[%c128, %c0_61], %103 {strides = array<i32>} : memref<192x120xf32, #tpu.memory_space<vmem>>, vector<16x120xf32>,
    %105 = vector.extract_strided_slice %50 {offsets = [288, 0], sizes = [16, 120], strides = [1, 1]} : vector<384x120xf32> to vector<16x120xf32>
    %106 = vector.extract_strided_slice %50 {offsets = [304, 0], sizes = [16, 120], strides = [1, 1]} : vector<384x120xf32> to vector<16x120xf32>
    %107 = arith.maximumf %105, %106 : vector<16x120xf32>
    %cst_62 = arith.constant 0.000000e+00 : f32
    %108 = vector.broadcast %cst_62 : f32 to vector<16x120xf32>
    %109 = arith.maximumf %107, %108 : vector<16x120xf32>
    %c144 = arith.constant 144 : index
    %c0_63 = arith.constant 0 : index
    %110 = vector.load %arg11[%c144, %c0_63] : memref<192x120xf32, #tpu.memory_space<vmem>>, vector<16x120xf32>
    tpu.vector_store %arg11[%c144, %c0_63], %109 {strides = array<i32>} : memref<192x120xf32, #tpu.memory_space<vmem>>, vector<16x120xf32>,
    %111 = vector.extract_strided_slice %50 {offsets = [320, 0], sizes = [16, 120], strides = [1, 1]} : vector<384x120xf32> to vector<16x120xf32>
    %112 = vector.extract_strided_slice %50 {offsets = [336, 0], sizes = [16, 120], strides = [1, 1]} : vector<384x120xf32> to vector<16x120xf32>
    %113 = arith.maximumf %111, %112 : vector<16x120xf32>
    %cst_64 = arith.constant 0.000000e+00 : f32
    %114 = vector.broadcast %cst_64 : f32 to vector<16x120xf32>
    %115 = arith.maximumf %113, %114 : vector<16x120xf32>
    %c160 = arith.constant 160 : index
    %c0_65 = arith.constant 0 : index
    %116 = vector.load %arg11[%c160, %c0_65] : memref<192x120xf32, #tpu.memory_space<vmem>>, vector<16x120xf32>
    tpu.vector_store %arg11[%c160, %c0_65], %115 {strides = array<i32>} : memref<192x120xf32, #tpu.memory_space<vmem>>, vector<16x120xf32>,
    %117 = vector.extract_strided_slice %50 {offsets = [352, 0], sizes = [16, 120], strides = [1, 1]} : vector<384x120xf32> to vector<16x120xf32>
    %118 = vector.extract_strided_slice %50 {offsets = [368, 0], sizes = [16, 120], strides = [1, 1]} : vector<384x120xf32> to vector<16x120xf32>
    %119 = arith.maximumf %117, %118 : vector<16x120xf32>
    %cst_66 = arith.constant 0.000000e+00 : f32
    %120 = vector.broadcast %cst_66 : f32 to vector<16x120xf32>
    %121 = arith.maximumf %119, %120 : vector<16x120xf32>
    %c176 = arith.constant 176 : index
    %c0_67 = arith.constant 0 : index
    %122 = vector.load %arg11[%c176, %c0_67] : memref<192x120xf32, #tpu.memory_space<vmem>>, vector<16x120xf32>
    tpu.vector_store %arg11[%c176, %c0_67], %121 {strides = array<i32>} : memref<192x120xf32, #tpu.memory_space<vmem>>, vector<16x120xf32>,
    %cst_68 = arith.constant 0.000000e+00 : f32
    %123 = vector.broadcast %cst_68 : f32 to vector<128x80xf32>
    %cst_69 = arith.constant 0.000000e+00 : f32
    %124 = vector.broadcast %cst_69 : f32 to vector<128x80xf32>
    %c0_70 = arith.constant 0 : index
    %c0_71 = arith.constant 0 : index
    %125 = vector.load %arg11[%c0_70, %c0_71] : memref<192x120xf32, #tpu.memory_space<vmem>>, vector<128x120xf32>
    %c0_72 = arith.constant 0 : index
    %c0_73 = arith.constant 0 : index
    %c0_74 = arith.constant 0 : index
    %126 = vector.load %arg4[%c0_72, %c0_73, %c0_74] : memref<10x120x80xf32, #tpu.memory_space<vmem>>, vector<1x120x80xf32>
    %127 = vector.shape_cast %126 : vector<1x120x80xf32> to vector<120x80xf32>
    %cst_75 = arith.constant dense<0.000000e+00> : vector<128x80xf32>
    %128 = tpu.matmul %125, %127, %cst_75 {dimension_numbers = #tpu.dot_dimension_numbers<[1], [0], [0], [1], [0, 0, 1, 1], [], []>} : vector<128x120xf32>, vector<120x80xf32>, vector<128x80xf32> -> vector<128x80xf32>
    %129 = arith.addf %123, %128 : vector<128x80xf32>
    %c5_76 = arith.constant 5 : index
    %c0_77 = arith.constant 0 : index
    %c0_78 = arith.constant 0 : index
    %130 = vector.load %arg4[%c5_76, %c0_77, %c0_78] : memref<10x120x80xf32, #tpu.memory_space<vmem>>, vector<1x120x80xf32>
    %131 = vector.shape_cast %130 : vector<1x120x80xf32> to vector<120x80xf32>
    %cst_79 = arith.constant dense<0.000000e+00> : vector<128x80xf32>
    %132 = tpu.matmul %125, %131, %cst_79 {dimension_numbers = #tpu.dot_dimension_numbers<[1], [0], [0], [1], [0, 0, 1, 1], [], []>} : vector<128x120xf32>, vector<120x80xf32>, vector<128x80xf32> -> vector<128x80xf32>
    %133 = arith.addf %124, %132 : vector<128x80xf32>
    %c16_80 = arith.constant 16 : index
    %c0_81 = arith.constant 0 : index
    %134 = vector.load %arg11[%c16_80, %c0_81] : memref<192x120xf32, #tpu.memory_space<vmem>>, vector<128x120xf32>
    %c1_82 = arith.constant 1 : index
    %c0_83 = arith.constant 0 : index
    %c0_84 = arith.constant 0 : index
    %135 = vector.load %arg4[%c1_82, %c0_83, %c0_84] : memref<10x120x80xf32, #tpu.memory_space<vmem>>, vector<1x120x80xf32>
    %136 = vector.shape_cast %135 : vector<1x120x80xf32> to vector<120x80xf32>
    %cst_85 = arith.constant dense<0.000000e+00> : vector<128x80xf32>
    %137 = tpu.matmul %134, %136, %cst_85 {dimension_numbers = #tpu.dot_dimension_numbers<[1], [0], [0], [1], [0, 0, 1, 1], [], []>} : vector<128x120xf32>, vector<120x80xf32>, vector<128x80xf32> -> vector<128x80xf32>
    %138 = arith.addf %129, %137 : vector<128x80xf32>
    %c6_86 = arith.constant 6 : index
    %c0_87 = arith.constant 0 : index
    %c0_88 = arith.constant 0 : index
    %139 = vector.load %arg4[%c6_86, %c0_87, %c0_88] : memref<10x120x80xf32, #tpu.memory_space<vmem>>, vector<1x120x80xf32>
    %140 = vector.shape_cast %139 : vector<1x120x80xf32> to vector<120x80xf32>
    %cst_89 = arith.constant dense<0.000000e+00> : vector<128x80xf32>
    %141 = tpu.matmul %134, %140, %cst_89 {dimension_numbers = #tpu.dot_dimension_numbers<[1], [0], [0], [1], [0, 0, 1, 1], [], []>} : vector<128x120xf32>, vector<120x80xf32>, vector<128x80xf32> -> vector<128x80xf32>
    %142 = arith.addf %133, %141 : vector<128x80xf32>
    %c32_90 = arith.constant 32 : index
    %c0_91 = arith.constant 0 : index
    %143 = vector.load %arg11[%c32_90, %c0_91] : memref<192x120xf32, #tpu.memory_space<vmem>>, vector<128x120xf32>
    %c2_92 = arith.constant 2 : index
    %c0_93 = arith.constant 0 : index
    %c0_94 = arith.constant 0 : index
    %144 = vector.load %arg4[%c2_92, %c0_93, %c0_94] : memref<10x120x80xf32, #tpu.memory_space<vmem>>, vector<1x120x80xf32>
    %145 = vector.shape_cast %144 : vector<1x120x80xf32> to vector<120x80xf32>
    %cst_95 = arith.constant dense<0.000000e+00> : vector<128x80xf32>
    %146 = tpu.matmul %143, %145, %cst_95 {dimension_numbers = #tpu.dot_dimension_numbers<[1], [0], [0], [1], [0, 0, 1, 1], [], []>} : vector<128x120xf32>, vector<120x80xf32>, vector<128x80xf32> -> vector<128x80xf32>
    %147 = arith.addf %138, %146 : vector<128x80xf32>
    %c7_96 = arith.constant 7 : index
    %c0_97 = arith.constant 0 : index
    %c0_98 = arith.constant 0 : index
    %148 = vector.load %arg4[%c7_96, %c0_97, %c0_98] : memref<10x120x80xf32, #tpu.memory_space<vmem>>, vector<1x120x80xf32>
    %149 = vector.shape_cast %148 : vector<1x120x80xf32> to vector<120x80xf32>
    %cst_99 = arith.constant dense<0.000000e+00> : vector<128x80xf32>
    %150 = tpu.matmul %143, %149, %cst_99 {dimension_numbers = #tpu.dot_dimension_numbers<[1], [0], [0], [1], [0, 0, 1, 1], [], []>} : vector<128x120xf32>, vector<120x80xf32>, vector<128x80xf32> -> vector<128x80xf32>
    %151 = arith.addf %142, %150 : vector<128x80xf32>
    %c48_100 = arith.constant 48 : index
    %c0_101 = arith.constant 0 : index
    %152 = vector.load %arg11[%c48_100, %c0_101] : memref<192x120xf32, #tpu.memory_space<vmem>>, vector<128x120xf32>
    %c3_102 = arith.constant 3 : index
    %c0_103 = arith.constant 0 : index
    %c0_104 = arith.constant 0 : index
    %153 = vector.load %arg4[%c3_102, %c0_103, %c0_104] : memref<10x120x80xf32, #tpu.memory_space<vmem>>, vector<1x120x80xf32>
    %154 = vector.shape_cast %153 : vector<1x120x80xf32> to vector<120x80xf32>
    %cst_105 = arith.constant dense<0.000000e+00> : vector<128x80xf32>
    %155 = tpu.matmul %152, %154, %cst_105 {dimension_numbers = #tpu.dot_dimension_numbers<[1], [0], [0], [1], [0, 0, 1, 1], [], []>} : vector<128x120xf32>, vector<120x80xf32>, vector<128x80xf32> -> vector<128x80xf32>
    %156 = arith.addf %147, %155 : vector<128x80xf32>
    %c8_106 = arith.constant 8 : index
    %c0_107 = arith.constant 0 : index
    %c0_108 = arith.constant 0 : index
    %157 = vector.load %arg4[%c8_106, %c0_107, %c0_108] : memref<10x120x80xf32, #tpu.memory_space<vmem>>, vector<1x120x80xf32>
    %158 = vector.shape_cast %157 : vector<1x120x80xf32> to vector<120x80xf32>
    %cst_109 = arith.constant dense<0.000000e+00> : vector<128x80xf32>
    %159 = tpu.matmul %152, %158, %cst_109 {dimension_numbers = #tpu.dot_dimension_numbers<[1], [0], [0], [1], [0, 0, 1, 1], [], []>} : vector<128x120xf32>, vector<120x80xf32>, vector<128x80xf32> -> vector<128x80xf32>
    %160 = arith.addf %151, %159 : vector<128x80xf32>
    %c64_110 = arith.constant 64 : index
    %c0_111 = arith.constant 0 : index
    %161 = vector.load %arg11[%c64_110, %c0_111] : memref<192x120xf32, #tpu.memory_space<vmem>>, vector<128x120xf32>
    %c4_112 = arith.constant 4 : index
    %c0_113 = arith.constant 0 : index
    %c0_114 = arith.constant 0 : index
    %162 = vector.load %arg4[%c4_112, %c0_113, %c0_114] : memref<10x120x80xf32, #tpu.memory_space<vmem>>, vector<1x120x80xf32>
    %163 = vector.shape_cast %162 : vector<1x120x80xf32> to vector<120x80xf32>
    %cst_115 = arith.constant dense<0.000000e+00> : vector<128x80xf32>
    %164 = tpu.matmul %161, %163, %cst_115 {dimension_numbers = #tpu.dot_dimension_numbers<[1], [0], [0], [1], [0, 0, 1, 1], [], []>} : vector<128x120xf32>, vector<120x80xf32>, vector<128x80xf32> -> vector<128x80xf32>
    %165 = arith.addf %156, %164 : vector<128x80xf32>
    %c9_116 = arith.constant 9 : index
    %c0_117 = arith.constant 0 : index
    %c0_118 = arith.constant 0 : index
    %166 = vector.load %arg4[%c9_116, %c0_117, %c0_118] : memref<10x120x80xf32, #tpu.memory_space<vmem>>, vector<1x120x80xf32>
    %167 = vector.shape_cast %166 : vector<1x120x80xf32> to vector<120x80xf32>
    %cst_119 = arith.constant dense<0.000000e+00> : vector<128x80xf32>
    %168 = tpu.matmul %161, %167, %cst_119 {dimension_numbers = #tpu.dot_dimension_numbers<[1], [0], [0], [1], [0, 0, 1, 1], [], []>} : vector<128x120xf32>, vector<120x80xf32>, vector<128x80xf32> -> vector<128x80xf32>
    %169 = arith.addf %160, %168 : vector<128x80xf32>
    %170 = arith.maximumf %165, %169 : vector<128x80xf32>
    %c0_120 = arith.constant 0 : index
    %c0_121 = arith.constant 0 : index
    %171 = vector.load %arg5[%c0_120, %c0_121] : memref<1x80xf32, #tpu.memory_space<vmem>>, vector<1x80xf32>
    %172 = vector.broadcast %171 : vector<1x80xf32> to vector<128x80xf32>
    %173 = arith.addf %170, %172 : vector<128x80xf32>
    %cst_122 = arith.constant 0.000000e+00 : f32
    %174 = vector.broadcast %cst_122 : f32 to vector<16x50xf32>
    %175 = vector.extract_strided_slice %173 {offsets = [0, 0], sizes = [16, 80], strides = [1, 1]} : vector<128x80xf32> to vector<16x80xf32>
    %176 = vector.extract_strided_slice %173 {offsets = [16, 0], sizes = [16, 80], strides = [1, 1]} : vector<128x80xf32> to vector<16x80xf32>
    %177 = arith.maximumf %175, %176 : vector<16x80xf32>
    %cst_123 = arith.constant 0.000000e+00 : f32
    %178 = vector.broadcast %cst_123 : f32 to vector<16x80xf32>
    %179 = arith.maximumf %177, %178 : vector<16x80xf32>
    %c0_124 = arith.constant 0 : index
    %c0_125 = arith.constant 0 : index
    %c0_126 = arith.constant 0 : index
    %180 = vector.load %arg6[%c0_124, %c0_125, %c0_126] : memref<4x80x50xf32, #tpu.memory_space<vmem>>, vector<1x80x50xf32>
    %181 = vector.shape_cast %180 : vector<1x80x50xf32> to vector<80x50xf32>
    %cst_127 = arith.constant dense<0.000000e+00> : vector<16x50xf32>
    %182 = tpu.matmul %179, %181, %cst_127 {dimension_numbers = #tpu.dot_dimension_numbers<[1], [0], [0], [1], [0, 0, 1, 1], [], []>} : vector<16x80xf32>, vector<80x50xf32>, vector<16x50xf32> -> vector<16x50xf32>
    %183 = arith.addf %174, %182 : vector<16x50xf32>
    %184 = vector.extract_strided_slice %173 {offsets = [32, 0], sizes = [16, 80], strides = [1, 1]} : vector<128x80xf32> to vector<16x80xf32>
    %185 = vector.extract_strided_slice %173 {offsets = [48, 0], sizes = [16, 80], strides = [1, 1]} : vector<128x80xf32> to vector<16x80xf32>
    %186 = arith.maximumf %184, %185 : vector<16x80xf32>
    %cst_128 = arith.constant 0.000000e+00 : f32
    %187 = vector.broadcast %cst_128 : f32 to vector<16x80xf32>
    %188 = arith.maximumf %186, %187 : vector<16x80xf32>
    %c1_129 = arith.constant 1 : index
    %c0_130 = arith.constant 0 : index
    %c0_131 = arith.constant 0 : index
    %189 = vector.load %arg6[%c1_129, %c0_130, %c0_131] : memref<4x80x50xf32, #tpu.memory_space<vmem>>, vector<1x80x50xf32>
    %190 = vector.shape_cast %189 : vector<1x80x50xf32> to vector<80x50xf32>
    %cst_132 = arith.constant dense<0.000000e+00> : vector<16x50xf32>
    %191 = tpu.matmul %188, %190, %cst_132 {dimension_numbers = #tpu.dot_dimension_numbers<[1], [0], [0], [1], [0, 0, 1, 1], [], []>} : vector<16x80xf32>, vector<80x50xf32>, vector<16x50xf32> -> vector<16x50xf32>
    %192 = arith.addf %183, %191 : vector<16x50xf32>
    %193 = vector.extract_strided_slice %173 {offsets = [64, 0], sizes = [16, 80], strides = [1, 1]} : vector<128x80xf32> to vector<16x80xf32>
    %194 = vector.extract_strided_slice %173 {offsets = [80, 0], sizes = [16, 80], strides = [1, 1]} : vector<128x80xf32> to vector<16x80xf32>
    %195 = arith.maximumf %193, %194 : vector<16x80xf32>
    %cst_133 = arith.constant 0.000000e+00 : f32
    %196 = vector.broadcast %cst_133 : f32 to vector<16x80xf32>
    %197 = arith.maximumf %195, %196 : vector<16x80xf32>
    %c2_134 = arith.constant 2 : index
    %c0_135 = arith.constant 0 : index
    %c0_136 = arith.constant 0 : index
    %198 = vector.load %arg6[%c2_134, %c0_135, %c0_136] : memref<4x80x50xf32, #tpu.memory_space<vmem>>, vector<1x80x50xf32>
    %199 = vector.shape_cast %198 : vector<1x80x50xf32> to vector<80x50xf32>
    %cst_137 = arith.constant dense<0.000000e+00> : vector<16x50xf32>
    %200 = tpu.matmul %197, %199, %cst_137 {dimension_numbers = #tpu.dot_dimension_numbers<[1], [0], [0], [1], [0, 0, 1, 1], [], []>} : vector<16x80xf32>, vector<80x50xf32>, vector<16x50xf32> -> vector<16x50xf32>
    %201 = arith.addf %192, %200 : vector<16x50xf32>
    %202 = vector.extract_strided_slice %173 {offsets = [96, 0], sizes = [16, 80], strides = [1, 1]} : vector<128x80xf32> to vector<16x80xf32>
    %203 = vector.extract_strided_slice %173 {offsets = [112, 0], sizes = [16, 80], strides = [1, 1]} : vector<128x80xf32> to vector<16x80xf32>
    %204 = arith.maximumf %202, %203 : vector<16x80xf32>
    %cst_138 = arith.constant 0.000000e+00 : f32
    %205 = vector.broadcast %cst_138 : f32 to vector<16x80xf32>
    %206 = arith.maximumf %204, %205 : vector<16x80xf32>
    %c3_139 = arith.constant 3 : index
    %c0_140 = arith.constant 0 : index
    %c0_141 = arith.constant 0 : index
    %207 = vector.load %arg6[%c3_139, %c0_140, %c0_141] : memref<4x80x50xf32, #tpu.memory_space<vmem>>, vector<1x80x50xf32>
    %208 = vector.shape_cast %207 : vector<1x80x50xf32> to vector<80x50xf32>
    %cst_142 = arith.constant dense<0.000000e+00> : vector<16x50xf32>
    %209 = tpu.matmul %206, %208, %cst_142 {dimension_numbers = #tpu.dot_dimension_numbers<[1], [0], [0], [1], [0, 0, 1, 1], [], []>} : vector<16x80xf32>, vector<80x50xf32>, vector<16x50xf32> -> vector<16x50xf32>
    %210 = arith.addf %201, %209 : vector<16x50xf32>
    %c0_143 = arith.constant 0 : index
    %c0_144 = arith.constant 0 : index
    %211 = vector.load %arg7[%c0_143, %c0_144] : memref<1x50xf32, #tpu.memory_space<vmem>>, vector<1x50xf32>
    %212 = vector.broadcast %211 : vector<1x50xf32> to vector<16x50xf32>
    %213 = arith.addf %210, %212 : vector<16x50xf32>
    %cst_145 = arith.constant 0.000000e+00 : f32
    %214 = vector.broadcast %cst_145 : f32 to vector<16x50xf32>
    %215 = arith.maximumf %213, %214 : vector<16x50xf32>
    %c0_146 = arith.constant 0 : index
    %c0_147 = arith.constant 0 : index
    %216 = vector.load %arg8[%c0_146, %c0_147] : memref<50x128xf32, #tpu.memory_space<vmem>>, vector<50x128xf32>
    %cst_148 = arith.constant dense<0.000000e+00> : vector<16x128xf32>
    %217 = tpu.matmul %215, %216, %cst_148 {dimension_numbers = #tpu.dot_dimension_numbers<[1], [0], [0], [1], [0, 0, 1, 1], [], []>} : vector<16x50xf32>, vector<50x128xf32>, vector<16x128xf32> -> vector<16x128xf32>
    %c0_149 = arith.constant 0 : index
    %c0_150 = arith.constant 0 : index
    %218 = vector.load %arg9[%c0_149, %c0_150] : memref<1x128xf32, #tpu.memory_space<vmem>>, vector<1x128xf32>
    %219 = vector.broadcast %218 : vector<1x128xf32> to vector<16x128xf32>
    %220 = arith.addf %217, %219 : vector<16x128xf32>
    %cst_151 = arith.constant dense<0xFF800000> : vector<16xf32>
    %221 = vector.multi_reduction <maximumf>, %220, %cst_151 [1] : vector<16x128xf32> to vector<16xf32>
    %222 = vector.shape_cast %221 : vector<16xf32> to vector<16x1xf32>
    %223 = vector.broadcast %222 : vector<16x1xf32> to vector<16x128xf32>
    %224 = arith.subf %220, %223 : vector<16x128xf32>
    %225 = math.exp %224 : vector<16x128xf32>
    %cst_152 = arith.constant dense<0.000000e+00> : vector<16xf32>
    %226 = vector.multi_reduction <add>, %225, %cst_152 [1] : vector<16x128xf32> to vector<16xf32>
    %227 = vector.shape_cast %226 : vector<16xf32> to vector<16x1xf32>
    %228 = math.log %227 : vector<16x1xf32>
    %229 = vector.broadcast %228 : vector<16x1xf32> to vector<16x128xf32>
    %230 = arith.subf %224, %229 : vector<16x128xf32>
    %c0_153 = arith.constant 0 : index
    %c0_154 = arith.constant 0 : index
    %231 = vector.load %arg10[%c0_153, %c0_154] : memref<16x128xf32, #tpu.memory_space<vmem>>, vector<16x128xf32>
    tpu.vector_store %arg10[%c0_153, %c0_154], %230 {strides = array<i32>} : memref<16x128xf32, #tpu.memory_space<vmem>>, vector<16x128xf32>,
    return
  }
  func.func @transform_0(%arg0: i32) -> (i32, i32) {
    %c0_i32 = arith.constant 0 : i32
    %c0_i32_0 = arith.constant 0 : i32
    return %arg0, %c0_i32 : i32, i32
  }
  func.func @transform_1(%arg0: i32) -> (i32, i32, i32) {
    %c0_i32 = arith.constant 0 : i32
    %c0_i32_0 = arith.constant 0 : i32
    %c0_i32_1 = arith.constant 0 : i32
    %c0_i32_2 = arith.constant 0 : i32
    return %c0_i32, %c0_i32_0, %c0_i32_1 : i32, i32, i32
  }
  func.func @transform_2(%arg0: i32) -> (i32, i32) {
    %c0_i32 = arith.constant 0 : i32
    %c0_i32_0 = arith.constant 0 : i32
    %c0_i32_1 = arith.constant 0 : i32
    return %c0_i32, %c0_i32_0 : i32, i32
  }
  func.func @transform_3(%arg0: i32) -> (i32, i32, i32) {
    %c0_i32 = arith.constant 0 : i32
    %c0_i32_0 = arith.constant 0 : i32
    %c0_i32_1 = arith.constant 0 : i32
    %c0_i32_2 = arith.constant 0 : i32
    return %c0_i32, %c0_i32_0, %c0_i32_1 : i32, i32, i32
  }
  func.func @transform_4(%arg0: i32) -> (i32, i32) {
    %c0_i32 = arith.constant 0 : i32
    %c0_i32_0 = arith.constant 0 : i32
    %c0_i32_1 = arith.constant 0 : i32
    return %c0_i32, %c0_i32_0 : i32, i32
  }
  func.func @transform_5(%arg0: i32) -> (i32, i32, i32) {
    %c0_i32 = arith.constant 0 : i32
    %c0_i32_0 = arith.constant 0 : i32
    %c0_i32_1 = arith.constant 0 : i32
    %c0_i32_2 = arith.constant 0 : i32
    return %c0_i32, %c0_i32_0, %c0_i32_1 : i32, i32, i32
  }
  func.func @transform_6(%arg0: i32) -> (i32, i32) {
    %c0_i32 = arith.constant 0 : i32
    %c0_i32_0 = arith.constant 0 : i32
    %c0_i32_1 = arith.constant 0 : i32
    return %c0_i32, %c0_i32_0 : i32, i32
  }
  func.func @transform_7(%arg0: i32) -> (i32, i32) {
    %c0_i32 = arith.constant 0 : i32
    %c0_i32_0 = arith.constant 0 : i32
    %c0_i32_1 = arith.constant 0 : i32
    return %c0_i32, %c0_i32_0 : i32, i32
  }
  func.func @transform_8(%arg0: i32) -> (i32, i32) {
    %c0_i32 = arith.constant 0 : i32
    %c0_i32_0 = arith.constant 0 : i32
    %c0_i32_1 = arith.constant 0 : i32
    return %c0_i32, %c0_i32_0 : i32, i32
  }
  func.func @transform_9(%arg0: i32) -> (i32, i32) {
    %c0_i32 = arith.constant 0 : i32
    %c0_i32_0 = arith.constant 0 : i32
    return %arg0, %c0_i32 : i32, i32
  }
}

</mosaic_0001>

<bundles_post_ra>
// kernel: cnn_mnist_forward.1
= control target key start
LH: loop header
LB: loop body
LE: loop exit
PB: predicated region body
PF: predicated region fallthrough
CT: control target
= control target key end

     0   :  { %s10579_s30 = smov 0   ;;  %s14210_s0 = inlined_call_operand.vmem [shape: f32[896,28], index: 0, kind: input, shape index: {}]   ;;  %s14211_s1 = inlined_call_operand.vmem [shape: f32[10,28,120], index: 1, kind: input, shape index: {}]   ;;  %s14212_s2 = inlined_call_operand.vmem [shape: f32[1,120], index: 2, kind: input, shape index: {}]   ;;  %s14213_s3 = inlined_call_operand.vmem [shape: f32[10,120,80], index: 3, kind: input, shape index: {}]   ;;  %s14214_s4 = inlined_call_operand.vmem [shape: f32[1,80], index: 4, kind: input, shape index: {}]   ;;  %s14215_s5 = inlined_call_operand.vmem [shape: f32[4,80,50], index: 5, kind: input, shape index: {}]   ;;  %s14216_s6 = inlined_call_operand.vmem [shape: f32[1,50], index: 6, kind: input, shape index: {}]   ;;  %s14217_s7 = inlined_call_operand.vmem [shape: f32[50,128], index: 7, kind: input, shape index: {}]   ;;  %s14218_s8 = inlined_call_operand.vmem [shape: f32[1,128], index: 8, kind: input, shape index: {}]   ;;  %s14219_s9 = inlined_call_operand.vmem [shape: f32[32,128], index: 9, kind: output, shape index: {}]  }
   0x1 LB: > { %s7292_s10 = sadd.s32 4294967295, %s10527_s30   ;;  %p7296_p0 = scmp.ge.s32.totalorder %s10527_s30, 1  ;;  %s10527_s30 = sphi %s10579_s30, %s19_s30  }
   0x2   : > { %p288_p1 = scmp.lt.s32.totalorder %s10527_s30, 3 }
   0x4   : > { %p289_p2 = pnand %p7296_p0, %p288_p1 }
   0x6   : > { %292 = sbr.rel (%p289_p2) target bundleno = 1784 (0x6f8), region = 56 }
   0xb   : > { %v7307_v0 = vld [vmem:[%s14211_s1 + $0x38] sm:$0xf]  ;;  %vm545_vm0 = vcmask 1043456   ;;  %v7306_v2 = vld [vmem:[%s14211_s1 + $0x30] sm:$0xff]  ;;  %s324_s19 = smul.u32 56, %s7292_s10  ;;  %v7305_v4 = vld [vmem:[%s14211_s1 + $0x28] sm:$0xff] }
   0xc   : > { %v387_v1 = vld [vmem:[%s14211_s1 + $0x18] sm:$0xf]  ;;  %9055 = vmatprep.subr.msk.mxu0 %vm545_vm0, %v7307_v0  ;;  %v386_v3 = vld [vmem:[%s14211_s1 + $0x10] sm:$0xff]  ;;  %v385_v5 = vld [vmem:[%s14211_s1 + $0x8] sm:$0xff]  ;;  %vm400_vm1 = vcmask 228352   ;;  %vm4638_vm2 = vcmask 982016  }
   0xd   : > { %9135 = vmatprep.subr.msk.mxu1 %vm545_vm0, %v387_v1  ;;  %9056 = vmatpush3.msk.msra.mxu0 %vm545_vm0, %v7307_v0  ;;  %p325_p3 = scmp.lt.s32.totalorder %s324_s19, 111  ;;  %v7304_v6 = vld [vmem:[%s14211_s1 + $0x20] sm:$0xff]  ;;  %v7409_v8 = vld [vmem:[%s14211_s1 + $0xd8] sm:$0xf]  ;;  %v7408_v15 = vld [vmem:[%s14211_s1 + $0xd0] sm:$0xff]  ;;  %vm6744_vm3 = vcmask 654336  }
   0xe   : > { %9136 = vmatpush3.msk.msra.mxu1 %vm545_vm0, %v387_v1  ;;  %9057 = vmatprep.subr.mxu0 %v7306_v2  ;;  %v384_v7 = vld [vmem:[%s14211_s1] sm:$0xff]  ;;  %v7303_v9 = vld [vmem:[%s14211_s1 + $0xb8] sm:$0xf]  ;;  %v7302_v16 = vld [vmem:[%s14211_s1 + $0xb0] sm:$0xff]  ;;  %vm7135_vm4 = vcmask 1041408   ;;  %vm7128_vm5 = vcmask 408576  }
   0xf   : > { %9137 = vmatprep.subr.mxu1 %v386_v3  ;;  %9058 = vmatpush3.msra.mxu0 %v7306_v2  ;;  %s14695_s19 = smov (!%p325_p3, %s324_s19), 111  ;;  %v7407_v19 = vld [vmem:[%s14211_s1 + $0xc8] sm:$0xff]  ;;  %v7406_v23 = vld [vmem:[%s14211_s1 + $0xc0] sm:$0xff]  ;;  %v10718_v27 = vld [vmem:[%s14211_s1 + $0x58] sm:$0xf]  ;;  %s7298_s11 = sshll.u32 %s7292_s10, 1 }
  0x10   : > { %9138 = vmatpush3.msra.mxu1 %v386_v3  ;;  %9059 = vmatprep.subr.mxu0 %v7305_v4  ;;  %s7297_s13 = sshll.u32 %s14695_s19, 3  ;;  %v7301_v20 = vld [vmem:[%s14211_s1 + $0xa8] sm:$0xff]  ;;  %v7300_v24 = vld [vmem:[%s14211_s1 + $0xa0] sm:$0xff]  ;;  %v10723_v28 = vld [vmem:[%s14211_s1 + $0xf8] sm:$0xf]  ;;  %p331_p4 = scmp.lt.s32.totalorder %s7298_s11, 3 }
  0x11   : > { %9139 = vmatprep.subr.mxu1 %v385_v5  ;;  %9060 = vmatpush3.msra.mxu0 %v7305_v4  ;;  %s10626_s16 = scalar_lea.vmem %s14210_s0, %s7297_s13  ;;  %v7510_v4 = vld [vmem:[%s14211_s1 + $0x50] sm:$0xff] }
  0x12   : > { %9140 = vmatpush3.msra.mxu1 %v385_v5  ;;  %9061 = vmatprep.subr.mxu0 %v7304_v6  ;;  %v10629_v10 = vld [vmem:[%s10626_s16 + $0x10] sm:$0xff]  ;;  %v10632_v11 = vld [vmem:[%s10626_s16] sm:$0xff]  ;;  %v10637_v12 = vld [vmem:[%s10626_s16 + $0x18] sm:$0xff]  ;;  %s14697_s11 = smov (!%p331_p4, %s7298_s11), 3 }
  0x13   : > { %9141 = vmatprep.subr.mxu1 %v384_v7  ;;  %9062 = vmatpush3.msra.mxu0 %v7304_v6  ;;  %v10644_v13 = vld [vmem:[%s10626_s16 + $0x8] sm:$0xff]  ;;  %v10647_v14 = vld [vmem:[%s10626_s16 + $0x20] sm:$0xff]  ;;  %v10669_v18 = vld [vmem:[%s10626_s16 + $0x30] sm:$0xff] }
  0x14   : > { %9142 = vmatpush3.msra.mxu1 %v384_v7  ;;  %9215 = vmatprep.subr.msk.mxu0 %vm545_vm0, %v7409_v8  ;;  %v10662_v17 = vld [vmem:[%s10626_s16 + $0x28] sm:$0xff]  ;;  %v10686_v21 = vld [vmem:[%s10626_s16 + $0x38] sm:$0xff]  ;;  %v10689_v22 = vld [vmem:[%s10626_s16 + $0x40] sm:$0xff] }
  0x15   : > { %9295 = vmatprep.subr.msk.mxu1 %vm545_vm0, %v7303_v9  ;;  %9063 = vmatprep.mubr.msk.f32.mxu0 %vm400_vm1, %v10629_v10  ;;  %v10706_v25 = vld [vmem:[%s10626_s16 + $0x48] sm:$0xff]  ;;  %v10709_v26 = vld [vmem:[%s10626_s16 + $0x50] sm:$0xff]  ;;  %v10730_v29 = vld [vmem:[%s10626_s16 + $0x58] sm:$0xff] }
  0x16   : > { %9143 = vmatprep.mubr.msk.f32.mxu1 %vm400_vm1, %v10632_v11  ;;  %9064 = vmatmul.mubr.msk.f32.vlgmr.msra.gmra.mxu0 %vm400_vm1, %v10637_v12  ;;  %v10733_v30 = vld [vmem:[%s10626_s16 + $0x60] sm:$0xff]  ;;  %v10748_v31 = vld [vmem:[%s10626_s16 + $0x68] sm:$0xff]  ;;  %v10751_v32 = vld [vmem:[%s10626_s16 + $0x70] sm:$0xff] }
  0x17   : > { %9144 = vmatmul.mubr.msk.f32.vlgmr.msra.gmra.mxu1 %vm400_vm1, %v10644_v13  ;;  %9216 = vmatpush3.msk.msra.mxu0 %vm545_vm0, %v7409_v8  ;;  %v10762_v33 = vld [vmem:[%s10626_s16 + $0x78] sm:$0xff]  ;;  %v10765_v34 = vld [vmem:[%s10626_s16 + $0x80] sm:$0xff]  ;;  %v10776_v35 = vld [vmem:[%s10626_s16 + $0x88] sm:$0xff] }
  0x18   : > { %9296 = vmatpush3.msk.msra.mxu1 %vm545_vm0, %v7303_v9  ;;  %9066 = vmatprep.mubr.msk.f32.mxu0 %vm400_vm1, %v10647_v14  ;;  %v10779_v36 = vld [vmem:[%s10626_s16 + $0x90] sm:$0xff]  ;;  %v10790_v37 = vld [vmem:[%s10626_s16 + $0x98] sm:$0xff]  ;;  %v10793_v38 = vld [vmem:[%s10626_s16 + $0xa0] sm:$0xff] }
  0x19   : > { %9146 = vmatprep.mubr.msk.f32.mxu1 %vm400_vm1, %v10629_v10  ;;  %9217 = vmatprep.subr.mxu0 %v7408_v15  ;;  %v10804_v39 = vld [vmem:[%s10626_s16 + $0xa8] sm:$0xff]  ;;  %v10807_v40 = vld [vmem:[%s10626_s16 + $0xb0] sm:$0xff]  ;;  %v10818_v41 = vld [vmem:[%s10626_s16 + $0xb8] sm:$0xff] }
  0x1a   : > { %9297 = vmatprep.subr.mxu1 %v7302_v16  ;;  %9067 = vmatmul.mubr.msk.f32.gmra.mxu0 %vm400_vm1, %v10662_v17  ;;  %v10821_v42 = vld [vmem:[%s10626_s16 + $0xc0] sm:$0xff]  ;;  %v10832_v43 = vld [vmem:[%s10626_s16 + $0xc8] sm:$0xff]  ;;  %v10835_v44 = vld [vmem:[%s10626_s16 + $0xd0] sm:$0xff] }
  0x1b   : > { %9147 = vmatmul.mubr.msk.f32.gmra.mxu1 %vm400_vm1, %v10637_v12  ;;  %9069 = vmatprep.mubr.msk.f32.mxu0 %vm400_vm1, %v10669_v18  ;;  %v10846_v45 = vld [vmem:[%s10626_s16 + $0xd8] sm:$0xff]  ;;  %v10849_v46 = vld [vmem:[%s10626_s16 + $0xe0] sm:$0xff]  ;;  %v10860_v47 = vld [vmem:[%s10626_s16 + $0xe8] sm:$0xff] }
  0x1c   : > { %9149 = vmatprep.mubr.msk.f32.mxu1 %vm400_vm1, %v10647_v14  ;;  %9218 = vmatpush3.msra.mxu0 %v7408_v15  ;;  %v10863_v48 = vld [vmem:[%s10626_s16 + $0xf0] sm:$0xff]  ;;  %v10874_v49 = vld [vmem:[%s10626_s16 + $0xf8] sm:$0xff]  ;;  %v10877_v50 = vld [vmem:[%s10626_s16 + $0x100] sm:$0xff] }
  0x1d   : > { %9298 = vmatpush3.msra.mxu1 %v7302_v16  ;;  %9219 = vmatprep.subr.mxu0 %v7407_v19  ;;  %v10888_v51 = vld [vmem:[%s10626_s16 + $0x108] sm:$0xff]  ;;  %v10891_v52 = vld [vmem:[%s10626_s16 + $0x110] sm:$0xff]  ;;  %v10902_v53 = vld [vmem:[%s10626_s16 + $0x118] sm:$0xff] }
  0x1e   : > { %9299 = vmatprep.subr.mxu1 %v7301_v20  ;;  %9070 = vmatmul.mubr.msk.f32.gmra.mxu0 %vm400_vm1, %v10686_v21  ;;  %v10905_v54 = vld [vmem:[%s10626_s16 + $0x120] sm:$0xff]  ;;  %v10916_v55 = vld [vmem:[%s10626_s16 + $0x128] sm:$0xff]  ;;  %v10919_v56 = vld [vmem:[%s10626_s16 + $0x130] sm:$0xff] }
  0x1f   : > { %9150 = vmatmul.mubr.msk.f32.gmra.mxu1 %vm400_vm1, %v10662_v17  ;;  %9072 = vmatprep.mubr.msk.f32.mxu0 %vm400_vm1, %v10689_v22  ;;  %v10930_v57 = vld [vmem:[%s10626_s16 + $0x138] sm:$0xff]  ;;  %v10933_v58 = vld [vmem:[%s10626_s16 + $0x140] sm:$0xff]  ;;  %v10944_v59 = vld [vmem:[%s10626_s16 + $0x148] sm:$0xff] }
  0x20   : > { %9152 = vmatprep.mubr.msk.f32.mxu1 %vm400_vm1, %v10669_v18  ;;  %9220 = vmatpush3.msra.mxu0 %v7407_v19  ;;  %v10947_v60 = vld [vmem:[%s10626_s16 + $0x150] sm:$0xff]  ;;  %v10958_v61 = vld [vmem:[%s10626_s16 + $0x158] sm:$0xff]  ;;  %v10961_v62 = vld [vmem:[%s10626_s16 + $0x160] sm:$0xff] }
  0x21   : > { %9300 = vmatpush3.msra.mxu1 %v7301_v20  ;;  %9221 = vmatprep.subr.mxu0 %v7406_v23  ;;  %v10972_v63 = vld [vmem:[%s10626_s16 + $0x168] sm:$0xff]  ;;  %v10975_v0 = vld [vmem:[%s10626_s16 + $0x170] sm:$0xff]  ;;  %v10986_v1 = vld [vmem:[%s10626_s16 + $0x178] sm:$0xff] }
  0x22   : > { %9301 = vmatprep.subr.mxu1 %v7300_v24  ;;  %9073 = vmatmul.mubr.msk.f32.gmra.mxu0 %vm400_vm1, %v10706_v25  ;;  %v10989_v2 = vld [vmem:[%s10626_s16 + $0x180] sm:$0xff]  ;;  %v11000_v3 = vld [vmem:[%s10626_s16 + $0x188] sm:$0xff]  ;;  %v7563_v5 = vld [vmem:[%s14211_s1 + $0xf0] sm:$0xff] }
  0x23   : > { %9153 = vmatmul.mubr.msk.f32.gmra.mxu1 %vm400_vm1, %v10686_v21  ;;  %9075 = vmatprep.mubr.msk.f32.mxu0 %vm400_vm1, %v10709_v26  ;;  %v7509_v6 = vld [vmem:[%s14211_s1 + $0x48] sm:$0xff]  ;;  %v7508_v8 = vld [vmem:[%s14211_s1 + $0x40] sm:$0xff]  ;;  %v7616_v15 = vld [vmem:[%s14211_s1 + $0x70] sm:$0xff] }
  0x24   : > { %9155 = vmatprep.mubr.msk.f32.mxu1 %vm400_vm1, %v10689_v22  ;;  %9222 = vmatpush3.msra.mxu0 %v7406_v23  ;;  %v7562_v7 = vld [vmem:[%s14211_s1 + $0xe8] sm:$0xff]  ;;  %v7561_v9 = vld [vmem:[%s14211_s1 + $0xe0] sm:$0xff]  ;;  %v7669_v16 = vld [vmem:[%s14211_s1 + $0x110] sm:$0xff] }
  0x25   : > { %9302 = vmatpush3.msra.mxu1 %v7300_v24  ;;  %9375 = vmatprep.subr.msk.mxu0 %vm545_vm0, %v10718_v27 }
  0x26   : > { %9455 = vmatprep.subr.msk.mxu1 %vm545_vm0, %v10723_v28  ;;  %9076 = vmatmul.mubr.msk.f32.gmra.mxu0 %vm400_vm1, %v10730_v29 }
  0x27   : > { %9156 = vmatmul.mubr.msk.f32.gmra.mxu1 %vm400_vm1, %v10706_v25  ;;  %9078 = vmatprep.mubr.msk.f32.mxu0 %vm400_vm1, %v10733_v30 }
  0x28   : > { %9158 = vmatprep.mubr.msk.f32.mxu1 %vm400_vm1, %v10709_v26 }
  0x2a   : > { %9079 = vmatmul.mubr.msk.f32.gmra.mxu0 %vm400_vm1, %v10748_v31 }
  0x2b   : > { %9159 = vmatmul.mubr.msk.f32.gmra.mxu1 %vm400_vm1, %v10730_v29  ;;  %9081 = vmatprep.mubr.msk.f32.mxu0 %vm400_vm1, %v10751_v32 }
  0x2c   : > { %9161 = vmatprep.mubr.msk.f32.mxu1 %vm400_vm1, %v10733_v30 }
  0x2e   : > { %9082 = vmatmul.mubr.msk.f32.gmra.mxu0 %vm400_vm1, %v10762_v33 }
  0x2f   : > { %9162 = vmatmul.mubr.msk.f32.gmra.mxu1 %vm400_vm1, %v10748_v31  ;;  %9084 = vmatprep.mubr.msk.f32.mxu0 %vm400_vm1, %v10765_v34 }
  0x30   : > { %9164 = vmatprep.mubr.msk.f32.mxu1 %vm400_vm1, %v10751_v32 }
  0x32   : > { %9085 = vmatmul.mubr.msk.f32.gmra.mxu0 %vm400_vm1, %v10776_v35 }
  0x33   : > { %9165 = vmatmul.mubr.msk.f32.gmra.mxu1 %vm400_vm1, %v10762_v33  ;;  %9087 = vmatprep.mubr.msk.f32.mxu0 %vm400_vm1, %v10779_v36 }
  0x34   : > { %9167 = vmatprep.mubr.msk.f32.mxu1 %vm400_vm1, %v10765_v34 }
  0x36   : > { %9088 = vmatmul.mubr.msk.f32.gmra.mxu0 %vm400_vm1, %v10790_v37 }
  0x37   : > { %9168 = vmatmul.mubr.msk.f32.gmra.mxu1 %vm400_vm1, %v10776_v35  ;;  %9090 = vmatprep.mubr.msk.f32.mxu0 %vm400_vm1, %v10793_v38 }
  0x38   : > { %9170 = vmatprep.mubr.msk.f32.mxu1 %vm400_vm1, %v10779_v36 }
  0x3a   : > { %9091 = vmatmul.mubr.msk.f32.gmra.mxu0 %vm400_vm1, %v10804_v39 }
  0x3b   : > { %9171 = vmatmul.mubr.msk.f32.gmra.mxu1 %vm400_vm1, %v10790_v37  ;;  %9093 = vmatprep.mubr.msk.f32.mxu0 %vm400_vm1, %v10807_v40 }
  0x3c   : > { %9173 = vmatprep.mubr.msk.f32.mxu1 %vm400_vm1, %v10793_v38 }
  0x3e   : > { %9094 = vmatmul.mubr.msk.f32.gmra.mxu0 %vm400_vm1, %v10818_v41 }
  0x3f   : > { %9174 = vmatmul.mubr.msk.f32.gmra.mxu1 %vm400_vm1, %v10804_v39  ;;  %9096 = vmatprep.mubr.msk.f32.mxu0 %vm400_vm1, %v10821_v42 }
  0x40   : > { %9176 = vmatprep.mubr.msk.f32.mxu1 %vm400_vm1, %v10807_v40 }
  0x42   : > { %9097 = vmatmul.mubr.msk.f32.gmra.mxu0 %vm400_vm1, %v10832_v43 }
  0x43   : > { %9177 = vmatmul.mubr.msk.f32.gmra.mxu1 %vm400_vm1, %v10818_v41  ;;  %9099 = vmatprep.mubr.msk.f32.mxu0 %vm400_vm1, %v10835_v44 }
  0x44   : > { %9179 = vmatprep.mubr.msk.f32.mxu1 %vm400_vm1, %v10821_v42 }
  0x46   : > { %9100 = vmatmul.mubr.msk.f32.gmra.mxu0 %vm400_vm1, %v10846_v45 }
  0x47   : > { %9180 = vmatmul.mubr.msk.f32.gmra.mxu1 %vm400_vm1, %v10832_v43  ;;  %9102 = vmatprep.mubr.msk.f32.mxu0 %vm400_vm1, %v10849_v46 }
  0x48   : > { %9182 = vmatprep.mubr.msk.f32.mxu1 %vm400_vm1, %v10835_v44 }
  0x4a   : > { %9103 = vmatmul.mubr.msk.f32.gmra.mxu0 %vm400_vm1, %v10860_v47 }
  0x4b   : > { %9183 = vmatmul.mubr.msk.f32.gmra.mxu1 %vm400_vm1, %v10846_v45  ;;  %9105 = vmatprep.mubr.msk.f32.mxu0 %vm400_vm1, %v10863_v48 }
  0x4c   : > { %9185 = vmatprep.mubr.msk.f32.mxu1 %vm400_vm1, %v10849_v46 }
  0x4e   : > { %9106 = vmatmul.mubr.msk.f32.gmra.mxu0 %vm400_vm1, %v10874_v49 }
  0x4f   : > { %9186 = vmatmul.mubr.msk.f32.gmra.mxu1 %vm400_vm1, %v10860_v47  ;;  %9108 = vmatprep.mubr.msk.f32.mxu0 %vm400_vm1, %v10877_v50 }
  0x50   : > { %9188 = vmatprep.mubr.msk.f32.mxu1 %vm400_vm1, %v10863_v48 }
  0x52   : > { %9109 = vmatmul.mubr.msk.f32.gmra.mxu0 %vm400_vm1, %v10888_v51 }
  0x53   : > { %9189 = vmatmul.mubr.msk.f32.gmra.mxu1 %vm400_vm1, %v10874_v49  ;;  %9111 = vmatprep.mubr.msk.f32.mxu0 %vm400_vm1, %v10891_v52 }
  0x54   : > { %9191 = vmatprep.mubr.msk.f32.mxu1 %vm400_vm1, %v10877_v50 }
  0x56   : > { %9112 = vmatmul.mubr.msk.f32.gmra.mxu0 %vm400_vm1, %v10902_v53 }
  0x57   : > { %9192 = vmatmul.mubr.msk.f32.gmra.mxu1 %vm400_vm1, %v10888_v51  ;;  %9114 = vmatprep.mubr.msk.f32.mxu0 %vm400_vm1, %v10905_v54 }
  0x58   : > { %9194 = vmatprep.mubr.msk.f32.mxu1 %vm400_vm1, %v10891_v52 }
  0x5a   : > { %9115 = vmatmul.mubr.msk.f32.gmra.mxu0 %vm400_vm1, %v10916_v55 }
  0x5b   : > { %9195 = vmatmul.mubr.msk.f32.gmra.mxu1 %vm400_vm1, %v10902_v53  ;;  %9117 = vmatprep.mubr.msk.f32.mxu0 %vm400_vm1, %v10919_v56 }
  0x5c   : > { %9197 = vmatprep.mubr.msk.f32.mxu1 %vm400_vm1, %v10905_v54 }
  0x5e   : > { %9118 = vmatmul.mubr.msk.f32.gmra.mxu0 %vm400_vm1, %v10930_v57 }
  0x5f   : > { %9198 = vmatmul.mubr.msk.f32.gmra.mxu1 %vm400_vm1, %v10916_v55  ;;  %9120 = vmatprep.mubr.msk.f32.mxu0 %vm400_vm1, %v10933_v58 }
  0x60   : > { %9200 = vmatprep.mubr.msk.f32.mxu1 %vm400_vm1, %v10919_v56 }
  0x62   : > { %9121 = vmatmul.mubr.msk.f32.gmra.mxu0 %vm400_vm1, %v10944_v59 }
  0x63   : > { %9201 = vmatmul.mubr.msk.f32.gmra.mxu1 %vm400_vm1, %v10930_v57  ;;  %9123 = vmatprep.mubr.msk.f32.mxu0 %vm400_vm1, %v10947_v60 }
  0x64   : > { %9203 = vmatprep.mubr.msk.f32.mxu1 %vm400_vm1, %v10933_v58 }
  0x66   : > { %9124 = vmatmul.mubr.msk.f32.gmra.mxu0 %vm400_vm1, %v10958_v61 }
  0x67   : > { %9204 = vmatmul.mubr.msk.f32.gmra.mxu1 %vm400_vm1, %v10944_v59  ;;  %9126 = vmatprep.mubr.msk.f32.mxu0 %vm400_vm1, %v10961_v62 }
  0x68   : > { %9206 = vmatprep.mubr.msk.f32.mxu1 %vm400_vm1, %v10947_v60 }
  0x6a   : > { %9127 = vmatmul.mubr.msk.f32.gmra.mxu0 %vm400_vm1, %v10972_v63 }
  0x6b   : > { %9207 = vmatmul.mubr.msk.f32.gmra.mxu1 %vm400_vm1, %v10958_v61  ;;  %9129 = vmatprep.mubr.msk.f32.mxu0 %vm400_vm1, %v10975_v0 }
  0x6c   : > { %9209 = vmatprep.mubr.msk.f32.mxu1 %vm400_vm1, %v10961_v62 }
  0x6e   : > { %9130 = vmatmul.mubr.msk.f32.gmra.mxu0 %vm400_vm1, %v10986_v1 }
  0x6f   : > { %9210 = vmatmul.mubr.msk.f32.gmra.mxu1 %vm400_vm1, %v10972_v63  ;;  %9132 = vmatprep.mubr.msk.f32.mxu0 %vm400_vm1, %v10989_v2 }
  0x70   : > { %9212 = vmatprep.mubr.msk.f32.mxu1 %vm400_vm1, %v10975_v0 }
  0x72   : > { %9133 = vmatmul.mubr.msk.f32.gmra.mxu0 %vm400_vm1, %v11000_v3 }
  0x73   : > { %9213 = vmatmul.mubr.msk.f32.gmra.mxu1 %vm400_vm1, %v10986_v1  ;;  %9223 = vmatprep.mubr.msk.f32.mxu0 %vm400_vm1, %v10629_v10 }
  0x74   : > { %9303 = vmatprep.mubr.msk.f32.mxu1 %vm400_vm1, %v10632_v11  ;;  %v11068_v11 = vld [vmem:[%s14211_s1 + $0x118] sm:$0xf] }
  0x76   : > { %9224 = vmatmul.mubr.msk.f32.vlgmr.msra.gmra.mxu0 %vm400_vm1, %v10637_v12 }
  0x77   : > { %9304 = vmatmul.mubr.msk.f32.vlgmr.msra.gmra.mxu1 %vm400_vm1, %v10644_v13  ;;  %9376 = vmatpush3.msk.msra.mxu0 %vm545_vm0, %v10718_v27  ;;  %v7615_v27 = vld [vmem:[%s14211_s1 + $0x68] sm:$0xff] }
  0x78   : > { %9456 = vmatpush3.msk.msra.mxu1 %vm545_vm0, %v10723_v28  ;;  %9226 = vmatprep.mubr.msk.f32.mxu0 %vm400_vm1, %v10647_v14 }
  0x79   : > { %9306 = vmatprep.mubr.msk.f32.mxu1 %vm400_vm1, %v10629_v10  ;;  %9377 = vmatprep.subr.mxu0 %v7510_v4  ;;  %v11063_v10 = vld [vmem:[%s14211_s1 + $0x78] sm:$0xf] }
  0x7a   : > { %9457 = vmatprep.subr.mxu1 %v7563_v5  ;;  %9227 = vmatmul.mubr.msk.f32.gmra.mxu0 %vm400_vm1, %v10662_v17 }
  0x7b   : > { %9307 = vmatmul.mubr.msk.f32.gmra.mxu1 %vm400_vm1, %v10637_v12  ;;  %9229 = vmatprep.mubr.msk.f32.mxu0 %vm400_vm1, %v10669_v18 }
  0x7c   : > { %9309 = vmatprep.mubr.msk.f32.mxu1 %vm400_vm1, %v10647_v14  ;;  %9378 = vmatpush3.msra.mxu0 %v7510_v4 }
  0x7d   : > { %9458 = vmatpush3.msra.mxu1 %v7563_v5  ;;  %9379 = vmatprep.subr.mxu0 %v7509_v6 }
  0x7e   : > { %9459 = vmatprep.subr.mxu1 %v7562_v7  ;;  %9230 = vmatmul.mubr.msk.f32.gmra.mxu0 %vm400_vm1, %v10686_v21 }
  0x7f   : > { %9310 = vmatmul.mubr.msk.f32.gmra.mxu1 %vm400_vm1, %v10662_v17  ;;  %9232 = vmatprep.mubr.msk.f32.mxu0 %vm400_vm1, %v10689_v22 }
  0x80   : > { %9312 = vmatprep.mubr.msk.f32.mxu1 %vm400_vm1, %v10669_v18  ;;  %9380 = vmatpush3.msra.mxu0 %v7509_v6 }
  0x81   : > { %9460 = vmatpush3.msra.mxu1 %v7562_v7  ;;  %9381 = vmatprep.subr.mxu0 %v7508_v8 }
  0x82   : > { %9461 = vmatprep.subr.mxu1 %v7561_v9  ;;  %9233 = vmatmul.mubr.msk.f32.gmra.mxu0 %vm400_vm1, %v10706_v25 }
  0x83   : > { %9313 = vmatmul.mubr.msk.f32.gmra.mxu1 %vm400_vm1, %v10686_v21  ;;  %9235 = vmatprep.mubr.msk.f32.mxu0 %vm400_vm1, %v10709_v26 }
  0x84   : > { %9315 = vmatprep.mubr.msk.f32.mxu1 %vm400_vm1, %v10689_v22  ;;  %9382 = vmatpush3.msra.mxu0 %v7508_v8  ;;  %v7667_v8 = vld [vmem:[%s14211_s1 + $0x100] sm:$0xff] }
  0x85   : > { %9462 = vmatpush3.msra.mxu1 %v7561_v9  ;;  %9535 = vmatprep.subr.msk.mxu0 %vm545_vm0, %v11063_v10 }
  0x86   : > { %9615 = vmatprep.subr.msk.mxu1 %vm545_vm0, %v11068_v11  ;;  %9236 = vmatmul.mubr.msk.f32.gmra.mxu0 %vm400_vm1, %v10730_v29 }
  0x87   : > { %9316 = vmatmul.mubr.msk.f32.gmra.mxu1 %vm400_vm1, %v10706_v25  ;;  %9238 = vmatprep.mubr.msk.f32.mxu0 %vm400_vm1, %v10733_v30 }
  0x88   : > { %9318 = vmatprep.mubr.msk.f32.mxu1 %vm400_vm1, %v10709_v26 }
  0x8a   : > { %9239 = vmatmul.mubr.msk.f32.gmra.mxu0 %vm400_vm1, %v10748_v31 }
  0x8b   : > { %9319 = vmatmul.mubr.msk.f32.gmra.mxu1 %vm400_vm1, %v10730_v29  ;;  %9241 = vmatprep.mubr.msk.f32.mxu0 %vm400_vm1, %v10751_v32 }
  0x8c   : > { %9321 = vmatprep.mubr.msk.f32.mxu1 %vm400_vm1, %v10733_v30 }
  0x8e   : > { %9242 = vmatmul.mubr.msk.f32.gmra.mxu0 %vm400_vm1, %v10762_v33 }
  0x8f   : > { %9322 = vmatmul.mubr.msk.f32.gmra.mxu1 %vm400_vm1, %v10748_v31  ;;  %9244 = vmatprep.mubr.msk.f32.mxu0 %vm400_vm1, %v10765_v34 }
  0x90   : > { %9324 = vmatprep.mubr.msk.f32.mxu1 %vm400_vm1, %v10751_v32 }
  0x92   : > { %9245 = vmatmul.mubr.msk.f32.gmra.mxu0 %vm400_vm1, %v10776_v35 }
  0x93   : > { %9325 = vmatmul.mubr.msk.f32.gmra.mxu1 %vm400_vm1, %v10762_v33  ;;  %9247 = vmatprep.mubr.msk.f32.mxu0 %vm400_vm1, %v10779_v36 }
  0x94   : > { %9327 = vmatprep.mubr.msk.f32.mxu1 %vm400_vm1, %v10765_v34 }
  0x96   : > { %9248 = vmatmul.mubr.msk.f32.gmra.mxu0 %vm400_vm1, %v10790_v37 }
  0x97   : > { %9328 = vmatmul.mubr.msk.f32.gmra.mxu1 %vm400_vm1, %v10776_v35  ;;  %9250 = vmatprep.mubr.msk.f32.mxu0 %vm400_vm1, %v10793_v38 }
  0x98   : > { %9330 = vmatprep.mubr.msk.f32.mxu1 %vm400_vm1, %v10779_v36 }
  0x9a   : > { %9251 = vmatmul.mubr.msk.f32.gmra.mxu0 %vm400_vm1, %v10804_v39 }
  0x9b   : > { %9331 = vmatmul.mubr.msk.f32.gmra.mxu1 %vm400_vm1, %v10790_v37  ;;  %9253 = vmatprep.mubr.msk.f32.mxu0 %vm400_vm1, %v10807_v40 }
  0x9c   : > { %9333 = vmatprep.mubr.msk.f32.mxu1 %vm400_vm1, %v10793_v38 }
  0x9e   : > { %9254 = vmatmul.mubr.msk.f32.gmra.mxu0 %vm400_vm1, %v10818_v41 }
  0x9f   : > { %9334 = vmatmul.mubr.msk.f32.gmra.mxu1 %vm400_vm1, %v10804_v39  ;;  %9256 = vmatprep.mubr.msk.f32.mxu0 %vm400_vm1, %v10821_v42 }
  0xa0   : > { %9336 = vmatprep.mubr.msk.f32.mxu1 %vm400_vm1, %v10807_v40 }
  0xa2   : > { %9257 = vmatmul.mubr.msk.f32.gmra.mxu0 %vm400_vm1, %v10832_v43 }
  0xa3   : > { %9337 = vmatmul.mubr.msk.f32.gmra.mxu1 %vm400_vm1, %v10818_v41  ;;  %9259 = vmatprep.mubr.msk.f32.mxu0 %vm400_vm1, %v10835_v44 }
  0xa4   : > { %9339 = vmatprep.mubr.msk.f32.mxu1 %vm400_vm1, %v10821_v42 }
  0xa6   : > { %9260 = vmatmul.mubr.msk.f32.gmra.mxu0 %vm400_vm1, %v10846_v45 }
  0xa7   : > { %9340 = vmatmul.mubr.msk.f32.gmra.mxu1 %vm400_vm1, %v10832_v43  ;;  %9262 = vmatprep.mubr.msk.f32.mxu0 %vm400_vm1, %v10849_v46 }
  0xa8   : > { %9342 = vmatprep.mubr.msk.f32.mxu1 %vm400_vm1, %v10835_v44 }
  0xaa   : > { %9263 = vmatmul.mubr.msk.f32.gmra.mxu0 %vm400_vm1, %v10860_v47 }
  0xab   : > { %9343 = vmatmul.mubr.msk.f32.gmra.mxu1 %vm400_vm1, %v10846_v45  ;;  %9265 = vmatprep.mubr.msk.f32.mxu0 %vm400_vm1, %v10863_v48 }
  0xac   : > { %9345 = vmatprep.mubr.msk.f32.mxu1 %vm400_vm1, %v10849_v46 }
  0xae   : > { %9266 = vmatmul.mubr.msk.f32.gmra.mxu0 %vm400_vm1, %v10874_v49 }
  0xaf   : > { %9346 = vmatmul.mubr.msk.f32.gmra.mxu1 %vm400_vm1, %v10860_v47  ;;  %9268 = vmatprep.mubr.msk.f32.mxu0 %vm400_vm1, %v10877_v50 }
  0xb0   : > { %9348 = vmatprep.mubr.msk.f32.mxu1 %vm400_vm1, %v10863_v48 }
  0xb2   : > { %9269 = vmatmul.mubr.msk.f32.gmra.mxu0 %vm400_vm1, %v10888_v51 }
  0xb3   : > { %9349 = vmatmul.mubr.msk.f32.gmra.mxu1 %vm400_vm1, %v10874_v49  ;;  %9271 = vmatprep.mubr.msk.f32.mxu0 %vm400_vm1, %v10891_v52 }
  0xb4   : > { %9351 = vmatprep.mubr.msk.f32.mxu1 %vm400_vm1, %v10877_v50 }
  0xb6   : > { %9272 = vmatmul.mubr.msk.f32.gmra.mxu0 %vm400_vm1, %v10902_v53 }
  0xb7   : > { %9352 = vmatmul.mubr.msk.f32.gmra.mxu1 %vm400_vm1, %v10888_v51  ;;  %9274 = vmatprep.mubr.msk.f32.mxu0 %vm400_vm1, %v10905_v54 }
  0xb8   : > { %9354 = vmatprep.mubr.msk.f32.mxu1 %vm400_vm1, %v10891_v52 }
  0xba   : > { %9275 = vmatmul.mubr.msk.f32.gmra.mxu0 %vm400_vm1, %v10916_v55 }
  0xbb   : > { %9355 = vmatmul.mubr.msk.f32.gmra.mxu1 %vm400_vm1, %v10902_v53  ;;  %9277 = vmatprep.mubr.msk.f32.mxu0 %vm400_vm1, %v10919_v56 }
  0xbc   : > { %9357 = vmatprep.mubr.msk.f32.mxu1 %vm400_vm1, %v10905_v54 }
  0xbe   : > { %9278 = vmatmul.mubr.msk.f32.gmra.mxu0 %vm400_vm1, %v10930_v57 }
  0xbf   : > { %9358 = vmatmul.mubr.msk.f32.gmra.mxu1 %vm400_vm1, %v10916_v55  ;;  %9280 = vmatprep.mubr.msk.f32.mxu0 %vm400_vm1, %v10933_v58 }
  0xc0   : > { %9360 = vmatprep.mubr.msk.f32.mxu1 %vm400_vm1, %v10919_v56 }
  0xc2   : > { %9281 = vmatmul.mubr.msk.f32.gmra.mxu0 %vm400_vm1, %v10944_v59 }
  0xc3   : > { %9361 = vmatmul.mubr.msk.f32.gmra.mxu1 %vm400_vm1, %v10930_v57  ;;  %9283 = vmatprep.mubr.msk.f32.mxu0 %vm400_vm1, %v10947_v60 }
  0xc4   : > { %9363 = vmatprep.mubr.msk.f32.mxu1 %vm400_vm1, %v10933_v58 }
  0xc6   : > { %9284 = vmatmul.mubr.msk.f32.gmra.mxu0 %vm400_vm1, %v10958_v61 }
  0xc7   : > { %9364 = vmatmul.mubr.msk.f32.gmra.mxu1 %vm400_vm1, %v10944_v59  ;;  %9286 = vmatprep.mubr.msk.f32.mxu0 %vm400_vm1, %v10961_v62 }
  0xc8   : > { %9366 = vmatprep.mubr.msk.f32.mxu1 %vm400_vm1, %v10947_v60 }
  0xca   : > { %9287 = vmatmul.mubr.msk.f32.gmra.mxu0 %vm400_vm1, %v10972_v63 }
  0xcb   : > { %9367 = vmatmul.mubr.msk.f32.gmra.mxu1 %vm400_vm1, %v10958_v61  ;;  %9289 = vmatprep.mubr.msk.f32.mxu0 %vm400_vm1, %v10975_v0 }
  0xcc   : > { %9369 = vmatprep.mubr.msk.f32.mxu1 %vm400_vm1, %v10961_v62 }
  0xce   : > { %9290 = vmatmul.mubr.msk.f32.gmra.mxu0 %vm400_vm1, %v10986_v1 }
  0xcf   : > { %9370 = vmatmul.mubr.msk.f32.gmra.mxu1 %vm400_vm1, %v10972_v63  ;;  %9292 = vmatprep.mubr.msk.f32.mxu0 %vm400_vm1, %v10989_v2 }
  0xd0   : > { %9372 = vmatprep.mubr.msk.f32.mxu1 %vm400_vm1, %v10975_v0 }
  0xd2   : > { %9293 = vmatmul.mubr.msk.f32.gmra.mxu0 %vm400_vm1, %v11000_v3 }
  0xd3   : > { %9373 = vmatmul.mubr.msk.f32.gmra.mxu1 %vm400_vm1, %v10986_v1  ;;  %9383 = vmatprep.mubr.msk.f32.mxu0 %vm400_vm1, %v10647_v14 }
  0xd4   : > { %9463 = vmatprep.mubr.msk.f32.mxu1 %vm400_vm1, %v10647_v14 }
  0xd6   : > { %v9065_v12 = vpop.f32.mrf.mxu0  ;;  %9384 = vmatmul.mubr.msk.f32.vlgmr.msra.gmra.mxu0 %vm400_vm1, %v10662_v17 }
  0xd7   : > { %v9145_v13 = vpop.f32.mrf.mxu1  ;;  %9464 = vmatmul.mubr.msk.f32.vlgmr.msra.gmra.mxu1 %vm400_vm1, %v10662_v17  ;;  %9536 = vmatpush3.msk.msra.mxu0 %vm545_vm0, %v11063_v10 }
  0xd8   : > { %v11248_v19 = vadd.f32 %v9145_v13, %v9065_v12  ;;  %9616 = vmatpush3.msk.msra.mxu1 %vm545_vm0, %v11068_v11  ;;  %v615_v14 = vpop.f32.mrf.mxu0  ;;  %9386 = vmatprep.mubr.msk.f32.mxu0 %vm400_vm1, %v10669_v18 }
  0xd9   : > { %v929_v20 = vpop.f32.mrf.mxu1  ;;  %9466 = vmatprep.mubr.msk.f32.mxu1 %vm400_vm1, %v10669_v18  ;;  %9537 = vmatprep.subr.mxu0 %v7616_v15  ;;  %v7668_v18 = vld [vmem:[%s14211_s1 + $0x108] sm:$0xff] }
  0xda   : > { %v11258_v17 = vadd.f32 %v929_v20, %v615_v14  ;;  %9617 = vmatprep.subr.mxu1 %v7669_v16  ;;  %v9068_v23 = vpop.f32.mrf.mxu0  ;;  %9387 = vmatmul.mubr.msk.f32.gmra.mxu0 %vm400_vm1, %v10686_v21 }
  0xdb   : > { %v9148_v24 = vpop.f32.mrf.mxu1  ;;  %9467 = vmatmul.mubr.msk.f32.gmra.mxu1 %vm400_vm1, %v10686_v21  ;;  %9389 = vmatprep.mubr.msk.f32.mxu0 %vm400_vm1, %v10689_v22 }
  0xdc   : > { %v11270_v28 = vadd.f32 %v9148_v24, %v9068_v23  ;;  %9469 = vmatprep.mubr.msk.f32.mxu1 %vm400_vm1, %v10689_v22  ;;  %v625_v4 = vpop.f32.mrf.mxu0  ;;  %9538 = vmatpush3.msra.mxu0 %v7616_v15  ;;  %v7614_v22 = vld [vmem:[%s14211_s1 + $0x60] sm:$0xff]  ;;  %v11308_v15 = vld [vmem:[%s14211_s1 + $0x138] sm:$0xf] }
  0xdd   : > { %v939_v5 = vpop.f32.mrf.mxu1  ;;  %9618 = vmatpush3.msra.mxu1 %v7669_v16  ;;  %9539 = vmatprep.subr.mxu0 %v7615_v27 }
  0xde   : > { %v11276_v21 = vadd.f32 %v939_v5, %v625_v4  ;;  %9619 = vmatprep.subr.mxu1 %v7668_v18  ;;  %v9071_v6 = vpop.f32.mrf.mxu0  ;;  %9390 = vmatmul.mubr.msk.f32.gmra.mxu0 %vm400_vm1, %v10706_v25 }
  0xdf   : > { %v9151_v7 = vpop.f32.mrf.mxu1  ;;  %9470 = vmatmul.mubr.msk.f32.gmra.mxu1 %vm400_vm1, %v10706_v25  ;;  %9392 = vmatprep.mubr.msk.f32.mxu0 %vm400_vm1, %v10709_v26 }
  0xe0   : > { %v11288_v9 = vadd.f32 %v9151_v7, %v9071_v6  ;;  %9472 = vmatprep.mubr.msk.f32.mxu1 %vm400_vm1, %v10709_v26  ;;  %v635_v10 = vpop.f32.mrf.mxu0  ;;  %9540 = vmatpush3.msra.mxu0 %v7615_v27  ;;  %v11303_v26 = vld [vmem:[%s14211_s1 + $0x98] sm:$0xf] }
  0xe1   : > { %v949_v11 = vpop.f32.mrf.mxu1  ;;  %9620 = vmatpush3.msra.mxu1 %v7668_v18  ;;  %9541 = vmatprep.subr.mxu0 %v7614_v22 }
  0xe2   : > { %v11294_v25 = vadd.f32 %v949_v11, %v635_v10  ;;  %9621 = vmatprep.subr.mxu1 %v7667_v8  ;;  %v9074_v12 = vpop.f32.mrf.mxu0  ;;  %9393 = vmatmul.mubr.msk.f32.gmra.mxu0 %vm400_vm1, %v10730_v29 }
  0xe3   : > { %v9154_v13 = vpop.f32.mrf.mxu1  ;;  %9473 = vmatmul.mubr.msk.f32.gmra.mxu1 %vm400_vm1, %v10730_v29  ;;  %9395 = vmatprep.mubr.msk.f32.mxu0 %vm400_vm1, %v10733_v30 }
  0xe4   : > { %v11310_v16 = vadd.f32 %v9154_v13, %v9074_v12  ;;  %9475 = vmatprep.mubr.msk.f32.mxu1 %vm400_vm1, %v10733_v30  ;;  %v645_v14 = vpop.f32.mrf.mxu0  ;;  %9542 = vmatpush3.msra.mxu0 %v7614_v22 }
  0xe5   : > { %v959_v29 = vpop.f32.mrf.mxu1  ;;  %9622 = vmatpush3.msra.mxu1 %v7667_v8  ;;  %9695 = vmatprep.subr.msk.mxu0 %vm545_vm0, %v11303_v26 }
  0xe6   : > { %v11316_v20 = vadd.f32 %v959_v29, %v645_v14  ;;  %9775 = vmatprep.subr.msk.mxu1 %vm545_vm0, %v11308_v15  ;;  %v9077_v23 = vpop.f32.mrf.mxu0  ;;  %9396 = vmatmul.mubr.msk.f32.gmra.mxu0 %vm400_vm1, %v10748_v31 }
  0xe7   : > { %v9157_v24 = vpop.f32.mrf.mxu1  ;;  %9476 = vmatmul.mubr.msk.f32.gmra.mxu1 %vm400_vm1, %v10748_v31  ;;  %9398 = vmatprep.mubr.msk.f32.mxu0 %vm400_vm1, %v10751_v32 }
  0xe8   : > { %v11326_v30 = vadd.f32 %v9157_v24, %v9077_v23  ;;  %9478 = vmatprep.mubr.msk.f32.mxu1 %vm400_vm1, %v10751_v32  ;;  %v655_v27 = vpop.f32.mrf.mxu0 }
  0xe9   : > { %v969_v18 = vpop.f32.mrf.mxu1 }
  0xea   : > { %v11332_v4 = vadd.f32 %v969_v18, %v655_v27  ;;  %v9080_v5 = vpop.f32.mrf.mxu0  ;;  %9399 = vmatmul.mubr.msk.f32.gmra.mxu0 %vm400_vm1, %v10762_v33 }
  0xeb   : > { %v9160_v6 = vpop.f32.mrf.mxu1  ;;  %9479 = vmatmul.mubr.msk.f32.gmra.mxu1 %vm400_vm1, %v10762_v33  ;;  %9401 = vmatprep.mubr.msk.f32.mxu0 %vm400_vm1, %v10765_v34 }
  0xec   : > { %v11338_v31 = vadd.f32 %v9160_v6, %v9080_v5  ;;  %9481 = vmatprep.mubr.msk.f32.mxu1 %vm400_vm1, %v10765_v34  ;;  %v665_v32 = vpop.f32.mrf.mxu0 }
  0xed   : > { %v979_v7 = vpop.f32.mrf.mxu1 }
  0xee   : > { %v11344_v22 = vadd.f32 %v979_v7, %v665_v32  ;;  %v9083_v8 = vpop.f32.mrf.mxu0  ;;  %9402 = vmatmul.mubr.msk.f32.gmra.mxu0 %vm400_vm1, %v10776_v35 }
  0xef   : > { %v9163_v10 = vpop.f32.mrf.mxu1  ;;  %9482 = vmatmul.mubr.msk.f32.gmra.mxu1 %vm400_vm1, %v10776_v35  ;;  %9404 = vmatprep.mubr.msk.f32.mxu0 %vm400_vm1, %v10779_v36 }
  0xf0   : > { %v11350_v33 = vadd.f32 %v9163_v10, %v9083_v8  ;;  %9484 = vmatprep.mubr.msk.f32.mxu1 %vm400_vm1, %v10779_v36  ;;  %v675_v34 = vpop.f32.mrf.mxu0 }
  0xf1   : > { %v989_v11 = vpop.f32.mrf.mxu1 }
  0xf2   : > { %v11356_v12 = vadd.f32 %v989_v11, %v675_v34  ;;  %v9086_v13 = vpop.f32.mrf.mxu0  ;;  %9405 = vmatmul.mubr.msk.f32.gmra.mxu0 %vm400_vm1, %v10790_v37 }
  0xf3   : > { %v9166_v14 = vpop.f32.mrf.mxu1  ;;  %9485 = vmatmul.mubr.msk.f32.gmra.mxu1 %vm400_vm1, %v10790_v37  ;;  %9407 = vmatprep.mubr.msk.f32.mxu0 %vm400_vm1, %v10793_v38 }
  0xf4   : > { %v11362_v35 = vadd.f32 %v9166_v14, %v9086_v13  ;;  %9487 = vmatprep.mubr.msk.f32.mxu1 %vm400_vm1, %v10793_v38  ;;  %v685_v36 = vpop.f32.mrf.mxu0 }
  0xf5   : > { %v999_v29 = vpop.f32.mrf.mxu1 }
  0xf6   : > { %v11368_v23 = vadd.f32 %v999_v29, %v685_v36  ;;  %v9089_v24 = vpop.f32.mrf.mxu0  ;;  %9408 = vmatmul.mubr.msk.f32.gmra.mxu0 %vm400_vm1, %v10804_v39 }
  0xf7   : > { %v9169_v27 = vpop.f32.mrf.mxu1  ;;  %9488 = vmatmul.mubr.msk.f32.gmra.mxu1 %vm400_vm1, %v10804_v39  ;;  %9410 = vmatprep.mubr.msk.f32.mxu0 %vm400_vm1, %v10807_v40 }
  0xf8   : > { %v11374_v37 = vadd.f32 %v9169_v27, %v9089_v24  ;;  %9490 = vmatprep.mubr.msk.f32.mxu1 %vm400_vm1, %v10807_v40  ;;  %v695_v38 = vpop.f32.mrf.mxu0 }
  0xf9   : > { %v1009_v18 = vpop.f32.mrf.mxu1 }
  0xfa   : > { %14266 = vst [vmem:[#allocation3_spill] sm:$0xff] %v11374_v37  ;;  %v11380_v5 = vadd.f32 %v1009_v18, %v695_v38  ;;  %v9092_v6 = vpop.f32.mrf.mxu0  ;;  %9411 = vmatmul.mubr.msk.f32.gmra.mxu0 %vm400_vm1, %v10818_v41 }
  0xfb   : > { %v9172_v32 = vpop.f32.mrf.mxu1  ;;  %9491 = vmatmul.mubr.msk.f32.gmra.mxu1 %vm400_vm1, %v10818_v41  ;;  %9413 = vmatprep.mubr.msk.f32.mxu0 %vm400_vm1, %v10821_v42 }
  0xfc   : > { %14267 = vst [vmem:[#allocation4_spill] sm:$0xff] %v11380_v5  ;;  %v11386_v39 = vadd.f32 %v9172_v32, %v9092_v6  ;;  %9493 = vmatprep.mubr.msk.f32.mxu1 %vm400_vm1, %v10821_v42  ;;  %v705_v40 = vpop.f32.mrf.mxu0 }
  0xfd   : > { %v1019_v7 = vpop.f32.mrf.mxu1 }
  0xfe   : > { %14268 = vst [vmem:[#allocation5_spill] sm:$0xff] %v11386_v39  ;;  %v11392_v8 = vadd.f32 %v1019_v7, %v705_v40  ;;  %v9095_v10 = vpop.f32.mrf.mxu0  ;;  %9414 = vmatmul.mubr.msk.f32.gmra.mxu0 %vm400_vm1, %v10832_v43  ;;  %v11767_v39 = vld [vmem:[%s10626_s16 + $0xe0] sm:$0xff] }
  0xff   : > { %v9175_v34 = vpop.f32.mrf.mxu1  ;;  %9494 = vmatmul.mubr.msk.f32.gmra.mxu1 %vm400_vm1, %v10832_v43  ;;  %9416 = vmatprep.mubr.msk.f32.mxu0 %vm400_vm1, %v10835_v44  ;;  %14303 = vst [vmem:[#allocation40_spill] sm:$0xff] %v11767_v39 }
 0x100   : > { %14269 = vst [vmem:[#allocation6_spill] sm:$0xff] %v11392_v8  ;;  %v11398_v41 = vadd.f32 %v9175_v34, %v9095_v10  ;;  %9496 = vmatprep.mubr.msk.f32.mxu1 %vm400_vm1, %v10835_v44  ;;  %v715_v42 = vpop.f32.mrf.mxu0 }
 0x101   : > { %v1029_v11 = vpop.f32.mrf.mxu1 }
 0x102   : > { %14270 = vst [vmem:[#allocation7_spill] sm:$0xff] %v11398_v41  ;;  %v11404_v13 = vadd.f32 %v1029_v11, %v715_v42  ;;  %v9098_v14 = vpop.f32.mrf.mxu0  ;;  %9417 = vmatmul.mubr.msk.f32.gmra.mxu0 %vm400_vm1, %v10846_v45 }
 0x103   : > { %v9178_v36 = vpop.f32.mrf.mxu1  ;;  %9497 = vmatmul.mubr.msk.f32.gmra.mxu1 %vm400_vm1, %v10846_v45  ;;  %9419 = vmatprep.mubr.msk.f32.mxu0 %vm400_vm1, %v10849_v46 }
 0x104   : > { %14271 = vst [vmem:[#allocation8_spill] sm:$0xff] %v11404_v13  ;;  %v11410_v43 = vadd.f32 %v9178_v36, %v9098_v14  ;;  %9499 = vmatprep.mubr.msk.f32.mxu1 %vm400_vm1, %v10849_v46  ;;  %v725_v44 = vpop.f32.mrf.mxu0 }
 0x105   : > { %v1039_v29 = vpop.f32.mrf.mxu1 }
 0x106   : > { %14272 = vst [vmem:[#allocation9_spill] sm:$0xff] %v11410_v43  ;;  %v11416_v24 = vadd.f32 %v1039_v29, %v725_v44  ;;  %v9101_v27 = vpop.f32.mrf.mxu0  ;;  %9420 = vmatmul.mubr.msk.f32.gmra.mxu0 %vm400_vm1, %v10860_v47  ;;  %v11749_v43 = vld [vmem:[%s10626_s16 + $0xd0] sm:$0xff] }
 0x107   : > { %v9181_v38 = vpop.f32.mrf.mxu1  ;;  %9500 = vmatmul.mubr.msk.f32.gmra.mxu1 %vm400_vm1, %v10860_v47  ;;  %9422 = vmatprep.mubr.msk.f32.mxu0 %vm400_vm1, %v10863_v48  ;;  %14299 = vst [vmem:[#allocation36_spill] sm:$0xff] %v11749_v43 }
 0x108   : > { %14273 = vst [vmem:[#allocation10_spill] sm:$0xff] %v11416_v24  ;;  %v11422_v45 = vadd.f32 %v9181_v38, %v9101_v27  ;;  %9502 = vmatprep.mubr.msk.f32.mxu1 %vm400_vm1, %v10863_v48  ;;  %v735_v46 = vpop.f32.mrf.mxu0 }
 0x109   : > { %v1049_v18 = vpop.f32.mrf.mxu1 }
 0x10a   : > { %14274 = vst [vmem:[#allocation11_spill] sm:$0xff] %v11422_v45  ;;  %v11428_v6 = vadd.f32 %v1049_v18, %v735_v46  ;;  %v9104_v32 = vpop.f32.mrf.mxu0  ;;  %9423 = vmatmul.mubr.msk.f32.gmra.mxu0 %vm400_vm1, %v10874_v49 }
 0x10b   : > { %v9184_v40 = vpop.f32.mrf.mxu1  ;;  %9503 = vmatmul.mubr.msk.f32.gmra.mxu1 %vm400_vm1, %v10874_v49  ;;  %9425 = vmatprep.mubr.msk.f32.mxu0 %vm400_vm1, %v10877_v50 }
 0x10c   : > { %14275 = vst [vmem:[#allocation12_spill] sm:$0xff] %v11428_v6  ;;  %v11434_v47 = vadd.f32 %v9184_v40, %v9104_v32  ;;  %9505 = vmatprep.mubr.msk.f32.mxu1 %vm400_vm1, %v10877_v50  ;;  %v745_v48 = vpop.f32.mrf.mxu0 }
 0x10d   : > { %v1059_v7 = vpop.f32.mrf.mxu1 }
 0x10e   : > { %14276 = vst [vmem:[#allocation13_spill] sm:$0xff] %v11434_v47  ;;  %v11440_v10 = vadd.f32 %v1059_v7, %v745_v48  ;;  %v9107_v34 = vpop.f32.mrf.mxu0  ;;  %9426 = vmatmul.mubr.msk.f32.gmra.mxu0 %vm400_vm1, %v10888_v51  ;;  %v11731_v47 = vld [vmem:[%s10626_s16 + $0xc0] sm:$0xff] }
 0x10f   : > { %v9187_v42 = vpop.f32.mrf.mxu1  ;;  %9506 = vmatmul.mubr.msk.f32.gmra.mxu1 %vm400_vm1, %v10888_v51  ;;  %9428 = vmatprep.mubr.msk.f32.mxu0 %vm400_vm1, %v10891_v52 }
 0x110   : > { %14277 = vst [vmem:[#allocation14_spill] sm:$0xff] %v11440_v10  ;;  %v11446_v49 = vadd.f32 %v9187_v42, %v9107_v34  ;;  %9508 = vmatprep.mubr.msk.f32.mxu1 %vm400_vm1, %v10891_v52  ;;  %v755_v50 = vpop.f32.mrf.mxu0 }
 0x111   : > { %v1069_v11 = vpop.f32.mrf.mxu1 }
 0x112   : > { %14278 = vst [vmem:[#allocation15_spill] sm:$0xff] %v11446_v49  ;;  %v11452_v14 = vadd.f32 %v1069_v11, %v755_v50  ;;  %v9110_v36 = vpop.f32.mrf.mxu0  ;;  %9429 = vmatmul.mubr.msk.f32.gmra.mxu0 %vm400_vm1, %v10902_v53 }
 0x113   : > { %v9190_v44 = vpop.f32.mrf.mxu1  ;;  %9509 = vmatmul.mubr.msk.f32.gmra.mxu1 %vm400_vm1, %v10902_v53  ;;  %9431 = vmatprep.mubr.msk.f32.mxu0 %vm400_vm1, %v10905_v54 }
 0x114   : > { %14279 = vst [vmem:[#allocation16_spill] sm:$0xff] %v11452_v14  ;;  %v11458_v51 = vadd.f32 %v9190_v44, %v9110_v36  ;;  %9511 = vmatprep.mubr.msk.f32.mxu1 %vm400_vm1, %v10905_v54  ;;  %v765_v52 = vpop.f32.mrf.mxu0 }
 0x115   : > { %v1079_v29 = vpop.f32.mrf.mxu1 }
 0x116   : > { %14280 = vst [vmem:[#allocation17_spill] sm:$0xff] %v11458_v51  ;;  %v11464_v27 = vadd.f32 %v1079_v29, %v765_v52  ;;  %v9113_v38 = vpop.f32.mrf.mxu0  ;;  %9432 = vmatmul.mubr.msk.f32.gmra.mxu0 %vm400_vm1, %v10916_v55  ;;  %v11713_v51 = vld [vmem:[%s10626_s16 + $0xb0] sm:$0xff] }
 0x117   : > { %v9193_v46 = vpop.f32.mrf.mxu1  ;;  %9512 = vmatmul.mubr.msk.f32.gmra.mxu1 %vm400_vm1, %v10916_v55  ;;  %9434 = vmatprep.mubr.msk.f32.mxu0 %vm400_vm1, %v10919_v56 }
 0x118   : > { %14281 = vst [vmem:[#allocation18_spill] sm:$0xff] %v11464_v27  ;;  %v11470_v53 = vadd.f32 %v9193_v46, %v9113_v38  ;;  %9514 = vmatprep.mubr.msk.f32.mxu1 %vm400_vm1, %v10919_v56  ;;  %v775_v54 = vpop.f32.mrf.mxu0 }
 0x119   : > { %v1089_v18 = vpop.f32.mrf.mxu1 }
 0x11a   : > { %14282 = vst [vmem:[#allocation19_spill] sm:$0xff] %v11470_v53  ;;  %v11476_v32 = vadd.f32 %v1089_v18, %v775_v54  ;;  %v9116_v40 = vpop.f32.mrf.mxu0  ;;  %9435 = vmatmul.mubr.msk.f32.gmra.mxu0 %vm400_vm1, %v10930_v57 }
 0x11b   : > { %v9196_v48 = vpop.f32.mrf.mxu1  ;;  %9515 = vmatmul.mubr.msk.f32.gmra.mxu1 %vm400_vm1, %v10930_v57  ;;  %9437 = vmatprep.mubr.msk.f32.mxu0 %vm400_vm1, %v10933_v58 }
 0x11c   : > { %14283 = vst [vmem:[#allocation20_spill] sm:$0xff] %v11476_v32  ;;  %v11482_v55 = vadd.f32 %v9196_v48, %v9116_v40  ;;  %9517 = vmatprep.mubr.msk.f32.mxu1 %vm400_vm1, %v10933_v58  ;;  %v785_v56 = vpop.f32.mrf.mxu0 }
 0x11d   : > { %v1099_v7 = vpop.f32.mrf.mxu1 }
 0x11e   : > { %14284 = vst [vmem:[#allocation21_spill] sm:$0xff] %v11482_v55  ;;  %v11488_v34 = vadd.f32 %v1099_v7, %v785_v56  ;;  %v9119_v42 = vpop.f32.mrf.mxu0  ;;  %9438 = vmatmul.mubr.msk.f32.gmra.mxu0 %vm400_vm1, %v10944_v59 }
 0x11f   : > { %v9199_v50 = vpop.f32.mrf.mxu1  ;;  %9518 = vmatmul.mubr.msk.f32.gmra.mxu1 %vm400_vm1, %v10944_v59  ;;  %9440 = vmatprep.mubr.msk.f32.mxu0 %vm400_vm1, %v10947_v60 }
 0x120   : > { %14285 = vst [vmem:[#allocation22_spill] sm:$0xff] %v11488_v34  ;;  %v11494_v57 = vadd.f32 %v9199_v50, %v9119_v42  ;;  %9520 = vmatprep.mubr.msk.f32.mxu1 %vm400_vm1, %v10947_v60  ;;  %v795_v58 = vpop.f32.mrf.mxu0  ;;  %v11537_v42 = vld [vmem:[%s10626_s16 + $0x190] sm:$0xff] }
 0x121   : > { %v1109_v11 = vpop.f32.mrf.mxu1 }
 0x122   : > { %14286 = vst [vmem:[#allocation23_spill] sm:$0xff] %v11494_v57  ;;  %v11500_v36 = vadd.f32 %v1109_v11, %v795_v58  ;;  %v9122_v44 = vpop.f32.mrf.mxu0  ;;  %9441 = vmatmul.mubr.msk.f32.gmra.mxu0 %vm400_vm1, %v10958_v61  ;;  %v11695_v57 = vld [vmem:[%s10626_s16 + $0xa0] sm:$0xff] }
 0x123   : > { %v9202_v52 = vpop.f32.mrf.mxu1  ;;  %9521 = vmatmul.mubr.msk.f32.gmra.mxu1 %vm400_vm1, %v10958_v61  ;;  %9443 = vmatprep.mubr.msk.f32.mxu0 %vm400_vm1, %v10961_v62 }
 0x124   : > { %14287 = vst [vmem:[#allocation24_spill] sm:$0xff] %v11500_v36  ;;  %v11506_v59 = vadd.f32 %v9202_v52, %v9122_v44  ;;  %9523 = vmatprep.mubr.msk.f32.mxu1 %vm400_vm1, %v10961_v62  ;;  %v805_v60 = vpop.f32.mrf.mxu0  ;;  %v11641_v36 = vld [vmem:[%s10626_s16 + $0x70] sm:$0xff] }
 0x125   : > { %v1119_v29 = vpop.f32.mrf.mxu1 }
 0x126   : > { %14288 = vst [vmem:[#allocation25_spill] sm:$0xff] %v11506_v59  ;;  %v11512_v38 = vadd.f32 %v1119_v29, %v805_v60  ;;  %v9125_v46 = vpop.f32.mrf.mxu0  ;;  %9444 = vmatmul.mubr.msk.f32.gmra.mxu0 %vm400_vm1, %v10972_v63  ;;  %v2703_v60 = vld [vmem:[%s10626_s16 + $0x30] sm:$0xff] }
 0x127   : > { %v9205_v54 = vpop.f32.mrf.mxu1  ;;  %9524 = vmatmul.mubr.msk.f32.gmra.mxu1 %vm400_vm1, %v10972_v63  ;;  %9446 = vmatprep.mubr.msk.f32.mxu0 %vm400_vm1, %v10975_v0 }
 0x128   : > { %14289 = vst [vmem:[#allocation26_spill] sm:$0xff] %v11512_v38  ;;  %v11518_v61 = vadd.f32 %v9205_v54, %v9125_v46  ;;  %9526 = vmatprep.mubr.msk.f32.mxu1 %vm400_vm1, %v10975_v0  ;;  %v815_v62 = vpop.f32.mrf.mxu0 }
 0x129   : > { %v1129_v18 = vpop.f32.mrf.mxu1 }
 0x12a   : > { %14290 = vst [vmem:[#allocation27_spill] sm:$0xff] %v11518_v61  ;;  %v11524_v40 = vadd.f32 %v1129_v18, %v815_v62  ;;  %v9128_v48 = vpop.f32.mrf.mxu0  ;;  %9447 = vmatmul.mubr.msk.f32.gmra.mxu0 %vm400_vm1, %v10986_v1  ;;  %v2704_v62 = vld [vmem:[%s10626_s16 + $0x38] sm:$0xff] }
 0x12b   : > { %v9208_v56 = vpop.f32.mrf.mxu1  ;;  %9527 = vmatmul.mubr.msk.f32.gmra.mxu1 %vm400_vm1, %v10986_v1  ;;  %9449 = vmatprep.mubr.msk.f32.mxu0 %vm400_vm1, %v10989_v2 }
 0x12c   : > { %14291 = vst [vmem:[#allocation28_spill] sm:$0xff] %v11524_v40  ;;  %v11530_v63 = vadd.f32 %v9208_v56, %v9128_v48  ;;  %9529 = vmatprep.mubr.msk.f32.mxu1 %vm400_vm1, %v10989_v2  ;;  %v825_v0 = vpop.f32.mrf.mxu0  ;;  %v11552_v2 = vld [vmem:[%s10626_s16 + $0x198] sm:$0xff]  ;;  %v7720_v40 = vld [vmem:[%s14211_s1 + $0x80] sm:$0xff] }
 0x12d   : > { %v1139_v7 = vpop.f32.mrf.mxu1 }
 0x12e   : > { %14292 = vst [vmem:[#allocation29_spill] sm:$0xff] %v11530_v63  ;;  %v11539_v50 = vadd.f32 %v1139_v7, %v825_v0  ;;  %v9131_v58 = vpop.f32.mrf.mxu0  ;;  %9450 = vmatmul.mubr.msk.f32.gmra.mxu0 %vm400_vm1, %v11000_v3  ;;  %v11569_v0 = vld [vmem:[%s10626_s16 + $0x40] sm:$0xff] }
 0x12f   : > { %v9211_v11 = vpop.f32.mrf.mxu1  ;;  %9530 = vmatmul.mubr.msk.f32.gmra.mxu1 %vm400_vm1, %v11000_v3  ;;  %9452 = vmatprep.mubr.msk.f32.mxu0 %vm400_vm1, %v11537_v42 }
 0x130   : > { %14293 = vst [vmem:[#allocation30_spill] sm:$0xff] %v11539_v50  ;;  %v11545_v1 = vadd.f32 %v9211_v11, %v9131_v58  ;;  %9532 = vmatprep.mubr.msk.f32.mxu1 %vm400_vm1, %v11537_v42  ;;  %v835_v44 = vpop.f32.mrf.mxu0  ;;  %v7722_v11 = vld [vmem:[%s14211_s1 + $0x90] sm:$0xff] }
 0x131   : > { %v1149_v52 = vpop.f32.mrf.mxu1 }
 0x132   : > { %14294 = vst [vmem:[#allocation31_spill] sm:$0xff] %v11545_v1  ;;  %v11555_v29 = vadd.f32 %v1149_v52, %v835_v44  ;;  %v9134_v46 = vpop.f32.mrf.mxu0  ;;  %9453 = vmatmul.mubr.msk.f32.gmra.mxu0 %vm400_vm1, %v11552_v2  ;;  %v7775_v44 = vld [vmem:[%s14211_s1 + $0x130] sm:$0xff] }
 0x133   : > { %v9214_v54 = vpop.f32.mrf.mxu1  ;;  %9533 = vmatmul.mubr.msk.f32.gmra.mxu1 %vm400_vm1, %v11552_v2  ;;  %9543 = vmatprep.mubr.msk.f32.mxu0 %vm400_vm1, %v2703_v60 }
 0x134   : > { %14295 = vst [vmem:[#allocation32_spill] sm:$0xff] %v11555_v29  ;;  %v11561_v3 = vadd.f32 %v9214_v54, %v9134_v46  ;;  %9623 = vmatprep.mubr.msk.f32.mxu1 %vm400_vm1, %v2703_v60  ;;  %v845_v18 = vpop.f32.mrf.mxu0  ;;  %v11586_v60 = vld [vmem:[%s10626_s16 + $0x48] sm:$0xff]  ;;  %v11617_v29 = vld [vmem:[%s10626_s16 + $0x60] sm:$0xff] }
 0x135   : > { %v1159_v48 = vpop.f32.mrf.mxu1 }
 0x136   : > { %14296 = vst [vmem:[#allocation33_spill] sm:$0xff] %v11561_v3  ;;  %v11566_v56 = vadd.f32 %v1159_v48, %v845_v18  ;;  %v9225_v7 = vpop.f32.mrf.mxu0  ;;  %9544 = vmatmul.mubr.msk.f32.vlgmr.msra.gmra.mxu0 %vm400_vm1, %v2704_v62  ;;  %v7721_v48 = vld [vmem:[%s14211_s1 + $0x88] sm:$0xff] }
 0x137   : > { %v9305_v58 = vpop.f32.mrf.mxu1  ;;  %9624 = vmatmul.mubr.msk.f32.vlgmr.msra.gmra.mxu1 %vm400_vm1, %v2704_v62  ;;  %9696 = vmatpush3.msk.msra.mxu0 %vm545_vm0, %v11303_v26  ;;  %v11593_v62 = vld [vmem:[%s10626_s16 + $0x50] sm:$0xff] }
 0x138   : > { %14297 = vst [vmem:[#allocation34_spill] sm:$0xff] %v11566_v56  ;;  %v11579_v52 = vadd.f32 %v9305_v58, %v9225_v7  ;;  %9776 = vmatpush3.msk.msra.mxu1 %vm545_vm0, %v11308_v15  ;;  %v1242_v46 = vpop.f32.mrf.mxu0  ;;  %9546 = vmatprep.mubr.msk.f32.mxu0 %vm400_vm1, %v11569_v0  ;;  %v7774_v7 = vld [vmem:[%s14211_s1 + $0x128] sm:$0xff] }
 0x139   : > { %v1550_v54 = vpop.f32.mrf.mxu1  ;;  %9626 = vmatprep.mubr.msk.f32.mxu1 %vm400_vm1, %v11569_v0  ;;  %9697 = vmatprep.subr.mxu0 %v7722_v11 }
 0x13a   : > { %v11595_v18 = vadd.f32 %v1550_v54, %v1242_v46  ;;  %9777 = vmatprep.subr.mxu1 %v7775_v44  ;;  %v9228_v26 = vpop.f32.mrf.mxu0  ;;  %9547 = vmatmul.mubr.msk.f32.gmra.mxu0 %vm400_vm1, %v11586_v60  ;;  %v11614_v46 = vld [vmem:[%s10626_s16 + $0x58] sm:$0xff] }
 0x13b   : > { %v9308_v15 = vpop.f32.mrf.mxu1  ;;  %9627 = vmatmul.mubr.msk.f32.gmra.mxu1 %vm400_vm1, %v11586_v60  ;;  %9549 = vmatprep.mubr.msk.f32.mxu0 %vm400_vm1, %v11593_v62 }
 0x13c   : > { %v11607_v58 = vadd.f32 %v9308_v15, %v9228_v26  ;;  %9629 = vmatprep.mubr.msk.f32.mxu1 %vm400_vm1, %v11593_v62  ;;  %v1252_v54 = vpop.f32.mrf.mxu0  ;;  %9698 = vmatpush3.msra.mxu0 %v7722_v11  ;;  %v7773_v11 = vld [vmem:[%s14211_s1 + $0x120] sm:$0xff] }
 0x13d   : > { %v1560_v56 = vpop.f32.mrf.mxu1  ;;  %9778 = vmatpush3.msra.mxu1 %v7775_v44  ;;  %9699 = vmatprep.subr.mxu0 %v7721_v48  ;;  %v11638_v44 = vld [vmem:[%s10626_s16 + $0x68] sm:$0xff] }
 0x13e   : > { %v11619_v50 = vadd.f32 %v1560_v56, %v1252_v54  ;;  %9779 = vmatprep.subr.mxu1 %v7774_v7  ;;  %v9231_v26 = vpop.f32.mrf.mxu0  ;;  %9550 = vmatmul.mubr.msk.f32.gmra.mxu0 %vm400_vm1, %v11614_v46 }
 0x13f   : > { %v9311_v15 = vpop.f32.mrf.mxu1  ;;  %9630 = vmatmul.mubr.msk.f32.gmra.mxu1 %vm400_vm1, %v11614_v46  ;;  %9552 = vmatprep.mubr.msk.f32.mxu0 %vm400_vm1, %v11617_v29 }
 0x140   : > { %v11631_v56 = vadd.f32 %v9311_v15, %v9231_v26  ;;  %9632 = vmatprep.mubr.msk.f32.mxu1 %vm400_vm1, %v11617_v29  ;;  %v1262_v54 = vpop.f32.mrf.mxu0  ;;  %9700 = vmatpush3.msra.mxu0 %v7721_v48 }
 0x141   : > { %v1570_v38 = vpop.f32.mrf.mxu1  ;;  %9780 = vmatpush3.msra.mxu1 %v7774_v7  ;;  %9701 = vmatprep.subr.mxu0 %v7720_v40 }
 0x142   : > { %v11643_v34 = vadd.f32 %v1570_v38, %v1262_v54  ;;  %9781 = vmatprep.subr.mxu1 %v7773_v11  ;;  %v9234_v26 = vpop.f32.mrf.mxu0  ;;  %9553 = vmatmul.mubr.msk.f32.gmra.mxu0 %vm400_vm1, %v11638_v44  ;;  %v11656_v38 = vld [vmem:[%s10626_s16 + $0x78] sm:$0xff]  ;;  %v11659_v54 = vld [vmem:[%s10626_s16 + $0x80] sm:$0xff] }
 0x143   : > { %v9314_v15 = vpop.f32.mrf.mxu1  ;;  %9633 = vmatmul.mubr.msk.f32.gmra.mxu1 %vm400_vm1, %v11638_v44  ;;  %9555 = vmatprep.mubr.msk.f32.mxu0 %vm400_vm1, %v11641_v36 }
 0x144   : > { %v11649_v32 = vadd.f32 %v9314_v15, %v9234_v26  ;;  %9635 = vmatprep.mubr.msk.f32.mxu1 %vm400_vm1, %v11641_v36  ;;  %v1272_v48 = vpop.f32.mrf.mxu0  ;;  %9702 = vmatpush3.msra.mxu0 %v7720_v40  ;;  %v11674_v40 = vld [vmem:[%s10626_s16 + $0x88] sm:$0xff] }
 0x145   : > { %v1580_v7 = vpop.f32.mrf.mxu1  ;;  %9782 = vmatpush3.msra.mxu1 %v7773_v11 }
 0x146   : > { %v11661_v3 = vadd.f32 %v1580_v7, %v1272_v48  ;;  %v9237_v26 = vpop.f32.mrf.mxu0  ;;  %9556 = vmatmul.mubr.msk.f32.gmra.mxu0 %vm400_vm1, %v11656_v38  ;;  %v11677_v7 = vld [vmem:[%s10626_s16 + $0x90] sm:$0xff] }
 0x147   : > { %v9317_v15 = vpop.f32.mrf.mxu1  ;;  %9636 = vmatmul.mubr.msk.f32.gmra.mxu1 %vm400_vm1, %v11656_v38  ;;  %9558 = vmatprep.mubr.msk.f32.mxu0 %vm400_vm1, %v11659_v54 }
 0x148   : > { %v11667_v1 = vadd.f32 %v9317_v15, %v9237_v26  ;;  %9638 = vmatprep.mubr.msk.f32.mxu1 %vm400_vm1, %v11659_v54  ;;  %v1282_v11 = vpop.f32.mrf.mxu0  ;;  %v11692_v15 = vld [vmem:[%s10626_s16 + $0x98] sm:$0xff] }
 0x149   : > { %v1590_v48 = vpop.f32.mrf.mxu1 }
 0x14a   : > { %v11679_v63 = vadd.f32 %v1590_v48, %v1282_v11  ;;  %v9240_v61 = vpop.f32.mrf.mxu0  ;;  %9559 = vmatmul.mubr.msk.f32.gmra.mxu0 %vm400_vm1, %v11674_v40 }
 0x14b   : > { %v9320_v59 = vpop.f32.mrf.mxu1  ;;  %9639 = vmatmul.mubr.msk.f32.gmra.mxu1 %vm400_vm1, %v11674_v40  ;;  %9561 = vmatprep.mubr.msk.f32.mxu0 %vm400_vm1, %v11677_v7 }
 0x14c   : > { %v11685_v26 = vadd.f32 %v9320_v59, %v9240_v61  ;;  %9641 = vmatprep.mubr.msk.f32.mxu1 %vm400_vm1, %v11677_v7  ;;  %v1292_v11 = vpop.f32.mrf.mxu0  ;;  %v11710_v61 = vld [vmem:[%s10626_s16 + $0xa8] sm:$0xff] }
 0x14d   : > { %v1600_v48 = vpop.f32.mrf.mxu1 }
 0x14e   : > { %v11697_v55 = vadd.f32 %v1600_v48, %v1292_v11  ;;  %v9243_v53 = vpop.f32.mrf.mxu0  ;;  %9562 = vmatmul.mubr.msk.f32.gmra.mxu0 %vm400_vm1, %v11692_v15 }
 0x14f   : > { %v9323_v27 = vpop.f32.mrf.mxu1  ;;  %9642 = vmatmul.mubr.msk.f32.gmra.mxu1 %vm400_vm1, %v11692_v15  ;;  %9564 = vmatprep.mubr.msk.f32.mxu0 %vm400_vm1, %v11695_v57 }
 0x150   : > { %v11703_v59 = vadd.f32 %v9323_v27, %v9243_v53  ;;  %9644 = vmatprep.mubr.msk.f32.mxu1 %vm400_vm1, %v11695_v57  ;;  %v1302_v11 = vpop.f32.mrf.mxu0  ;;  %v11728_v53 = vld [vmem:[%s10626_s16 + $0xb8] sm:$0xff] }
 0x151   : > { %v1610_v48 = vpop.f32.mrf.mxu1 }
 0x152   : > { %v11715_v14 = vadd.f32 %v1610_v48, %v1302_v11  ;;  %v9246_v49 = vpop.f32.mrf.mxu0  ;;  %9565 = vmatmul.mubr.msk.f32.gmra.mxu0 %vm400_vm1, %v11710_v61 }
 0x153   : > { %v9326_v10 = vpop.f32.mrf.mxu1  ;;  %9645 = vmatmul.mubr.msk.f32.gmra.mxu1 %vm400_vm1, %v11710_v61  ;;  %9567 = vmatprep.mubr.msk.f32.mxu0 %vm400_vm1, %v11713_v51 }
 0x154   : > { %v11721_v27 = vadd.f32 %v9326_v10, %v9246_v49  ;;  %9647 = vmatprep.mubr.msk.f32.mxu1 %vm400_vm1, %v11713_v51  ;;  %v1312_v11 = vpop.f32.mrf.mxu0  ;;  %v11746_v49 = vld [vmem:[%s10626_s16 + $0xc8] sm:$0xff] }
 0x155   : > { %v1620_v48 = vpop.f32.mrf.mxu1 }
 0x156   : > { %v11733_v6 = vadd.f32 %v1620_v48, %v1312_v11  ;;  %v9249_v45 = vpop.f32.mrf.mxu0  ;;  %9568 = vmatmul.mubr.msk.f32.gmra.mxu0 %vm400_vm1, %v11728_v53 }
 0x157   : > { %v9329_v24 = vpop.f32.mrf.mxu1  ;;  %9648 = vmatmul.mubr.msk.f32.gmra.mxu1 %vm400_vm1, %v11728_v53  ;;  %9570 = vmatprep.mubr.msk.f32.mxu0 %vm400_vm1, %v11731_v47 }
 0x158   : > { %v11739_v10 = vadd.f32 %v9329_v24, %v9249_v45  ;;  %9650 = vmatprep.mubr.msk.f32.mxu1 %vm400_vm1, %v11731_v47  ;;  %v1322_v11 = vpop.f32.mrf.mxu0  ;;  %v11764_v45 = vld [vmem:[%s10626_s16 + $0xd8] sm:$0xff] }
 0x159   : > { %v1630_v48 = vpop.f32.mrf.mxu1  ;;  %14302 = vst [vmem:[#allocation39_spill] sm:$0xff] %v11764_v45 }
 0x15a   : > { %14298 = vst [vmem:[#allocation35_spill] sm:$0xff] %v11739_v10  ;;  %v11751_v13 = vadd.f32 %v1630_v48, %v1322_v11  ;;  %v9252_v41 = vpop.f32.mrf.mxu0  ;;  %9571 = vmatmul.mubr.msk.f32.gmra.mxu0 %vm400_vm1, %v11746_v49 }
 0x15b   : > { %v9332_v8 = vpop.f32.mrf.mxu1  ;;  %9651 = vmatmul.mubr.msk.f32.gmra.mxu1 %vm400_vm1, %v11746_v49  ;;  %9573 = vmatprep.mubr.msk.f32.mxu0 %vm400_vm1, %v11749_v43 }
 0x15c   : > { %14300 = vst [vmem:[#allocation37_spill] sm:$0xff] %v11751_v13  ;;  %v11757_v24 = vadd.f32 %v9332_v8, %v9252_v41  ;;  %9653 = vmatprep.mubr.msk.f32.mxu1 %vm400_vm1, %v11749_v43  ;;  %v1332_v11 = vpop.f32.mrf.mxu0  ;;  %v11782_v41 = vld [vmem:[%s10626_s16 + $0xe8] sm:$0xff] }
 0x15d   : > { %v1640_v48 = vpop.f32.mrf.mxu1  ;;  %14306 = vst [vmem:[#allocation43_spill] sm:$0xff] %v11782_v41 }
 0x15e   : > { %14301 = vst [vmem:[#allocation38_spill] sm:$0xff] %v11757_v24  ;;  %v11769_v13 = vadd.f32 %v1640_v48, %v1332_v11  ;;  %v9255_v5 = vpop.f32.mrf.mxu0  ;;  %9574 = vmatmul.mubr.msk.f32.gmra.mxu0 %vm400_vm1, %v11764_v45 }
 0x15f   : > { %v9335_v10 = vpop.f32.mrf.mxu1  ;;  %9654 = vmatmul.mubr.msk.f32.gmra.mxu1 %vm400_vm1, %v11764_v45  ;;  %9576 = vmatprep.mubr.msk.f32.mxu0 %vm400_vm1, %v11767_v39 }
 0x160   : > { %14304 = vst [vmem:[#allocation41_spill] sm:$0xff] %v11769_v13  ;;  %v11775_v8 = vadd.f32 %v9335_v10, %v9255_v5  ;;  %9656 = vmatprep.mubr.msk.f32.mxu1 %vm400_vm1, %v11767_v39  ;;  %v1342_v11 = vpop.f32.mrf.mxu0  ;;  %v11785_v13 = vld [vmem:[%s10626_s16 + $0xf0] sm:$0xff]  ;;  %v11800_v10 = vld [vmem:[%s10626_s16 + $0xf8] sm:$0xff] }
 0x161   : > { %v1650_v48 = vpop.f32.mrf.mxu1  ;;  %14307 = vst [vmem:[#allocation44_spill] sm:$0xff] %v11785_v13  ;;  %14310 = vst [vmem:[#allocation47_spill] sm:$0xff] %v11800_v10 }
 0x162   : > { %14305 = vst [vmem:[#allocation42_spill] sm:$0xff] %v11775_v8  ;;  %v11787_v24 = vadd.f32 %v1650_v48, %v1342_v11  ;;  %v9258_v43 = vpop.f32.mrf.mxu0  ;;  %9577 = vmatmul.mubr.msk.f32.gmra.mxu0 %vm400_vm1, %v11782_v41 }
 0x163   : > { %v9338_v45 = vpop.f32.mrf.mxu1  ;;  %9657 = vmatmul.mubr.msk.f32.gmra.mxu1 %vm400_vm1, %v11782_v41  ;;  %9579 = vmatprep.mubr.msk.f32.mxu0 %vm400_vm1, %v11785_v13 }
 0x164   : > { %14308 = vst [vmem:[#allocation45_spill] sm:$0xff] %v11787_v24  ;;  %v11793_v5 = vadd.f32 %v9338_v45, %v9258_v43  ;;  %9659 = vmatprep.mubr.msk.f32.mxu1 %vm400_vm1, %v11785_v13  ;;  %v1352_v11 = vpop.f32.mrf.mxu0  ;;  %v11803_v24 = vld [vmem:[%s10626_s16 + $0x100] sm:$0xff]  ;;  %v11818_v45 = vld [vmem:[%s10626_s16 + $0x108] sm:$0xff] }
 0x165   : > { %v1660_v48 = vpop.f32.mrf.mxu1  ;;  %14311 = vst [vmem:[#allocation48_spill] sm:$0xff] %v11803_v24  ;;  %14314 = vst [vmem:[#allocation51_spill] sm:$0xff] %v11818_v45 }
 0x166   : > { %14309 = vst [vmem:[#allocation46_spill] sm:$0xff] %v11793_v5  ;;  %v11805_v8 = vadd.f32 %v1660_v48, %v1352_v11  ;;  %v9261_v39 = vpop.f32.mrf.mxu0  ;;  %9580 = vmatmul.mubr.msk.f32.gmra.mxu0 %vm400_vm1, %v11800_v10 }
 0x167   : > { %v9341_v41 = vpop.f32.mrf.mxu1  ;;  %9660 = vmatmul.mubr.msk.f32.gmra.mxu1 %vm400_vm1, %v11800_v10  ;;  %9582 = vmatprep.mubr.msk.f32.mxu0 %vm400_vm1, %v11803_v24 }
 0x168   : > { %14312 = vst [vmem:[#allocation49_spill] sm:$0xff] %v11805_v8  ;;  %v11811_v43 = vadd.f32 %v9341_v41, %v9261_v39  ;;  %9662 = vmatprep.mubr.msk.f32.mxu1 %vm400_vm1, %v11803_v24  ;;  %v1362_v11 = vpop.f32.mrf.mxu0  ;;  %v11821_v8 = vld [vmem:[%s10626_s16 + $0x110] sm:$0xff]  ;;  %v11836_v41 = vld [vmem:[%s10626_s16 + $0x118] sm:$0xff] }
 0x169   : > { %v1670_v48 = vpop.f32.mrf.mxu1  ;;  %14315 = vst [vmem:[#allocation52_spill] sm:$0xff] %v11821_v8  ;;  %14318 = vst [vmem:[#allocation55_spill] sm:$0xff] %v11836_v41 }
 0x16a   : > { %14313 = vst [vmem:[#allocation50_spill] sm:$0xff] %v11811_v43  ;;  %v11823_v5 = vadd.f32 %v1670_v48, %v1362_v11  ;;  %v9264_v13 = vpop.f32.mrf.mxu0  ;;  %9583 = vmatmul.mubr.msk.f32.gmra.mxu0 %vm400_vm1, %v11818_v45 }
 0x16b   : > { %v9344_v10 = vpop.f32.mrf.mxu1  ;;  %9663 = vmatmul.mubr.msk.f32.gmra.mxu1 %vm400_vm1, %v11818_v45  ;;  %9585 = vmatprep.mubr.msk.f32.mxu0 %vm400_vm1, %v11821_v8 }
 0x16c   : > { %14316 = vst [vmem:[#allocation53_spill] sm:$0xff] %v11823_v5  ;;  %v11829_v39 = vadd.f32 %v9344_v10, %v9264_v13  ;;  %9665 = vmatprep.mubr.msk.f32.mxu1 %vm400_vm1, %v11821_v8  ;;  %v1372_v11 = vpop.f32.mrf.mxu0  ;;  %v11839_v5 = vld [vmem:[%s10626_s16 + $0x120] sm:$0xff]  ;;  %v11854_v10 = vld [vmem:[%s10626_s16 + $0x128] sm:$0xff] }
 0x16d   : > { %v1680_v48 = vpop.f32.mrf.mxu1  ;;  %14319 = vst [vmem:[#allocation56_spill] sm:$0xff] %v11839_v5  ;;  %14322 = vst [vmem:[#allocation59_spill] sm:$0xff] %v11854_v10 }
 0x16e   : > { %14317 = vst [vmem:[#allocation54_spill] sm:$0xff] %v11829_v39  ;;  %v11841_v43 = vadd.f32 %v1680_v48, %v1372_v11  ;;  %v9267_v24 = vpop.f32.mrf.mxu0  ;;  %9586 = vmatmul.mubr.msk.f32.gmra.mxu0 %vm400_vm1, %v11836_v41 }
 0x16f   : > { %v9347_v45 = vpop.f32.mrf.mxu1  ;;  %9666 = vmatmul.mubr.msk.f32.gmra.mxu1 %vm400_vm1, %v11836_v41  ;;  %9588 = vmatprep.mubr.msk.f32.mxu0 %vm400_vm1, %v11839_v5 }
 0x170   : > { %14320 = vst [vmem:[#allocation57_spill] sm:$0xff] %v11841_v43  ;;  %v11847_v13 = vadd.f32 %v9347_v45, %v9267_v24  ;;  %9668 = vmatprep.mubr.msk.f32.mxu1 %vm400_vm1, %v11839_v5  ;;  %v1382_v11 = vpop.f32.mrf.mxu0  ;;  %v11857_v43 = vld [vmem:[%s10626_s16 + $0x130] sm:$0xff]  ;;  %v11872_v45 = vld [vmem:[%s10626_s16 + $0x138] sm:$0xff] }
 0x171   : > { %v1690_v48 = vpop.f32.mrf.mxu1  ;;  %14323 = vst [vmem:[#allocation60_spill] sm:$0xff] %v11857_v43  ;;  %14326 = vst [vmem:[#allocation63_spill] sm:$0xff] %v11872_v45 }
 0x172   : > { %14321 = vst [vmem:[#allocation58_spill] sm:$0xff] %v11847_v13  ;;  %v11859_v39 = vadd.f32 %v1690_v48, %v1382_v11  ;;  %v9270_v8 = vpop.f32.mrf.mxu0  ;;  %9589 = vmatmul.mubr.msk.f32.gmra.mxu0 %vm400_vm1, %v11854_v10 }
 0x173   : > { %v9350_v41 = vpop.f32.mrf.mxu1  ;;  %9669 = vmatmul.mubr.msk.f32.gmra.mxu1 %vm400_vm1, %v11854_v10  ;;  %9591 = vmatprep.mubr.msk.f32.mxu0 %vm400_vm1, %v11857_v43 }
 0x174   : > { %14324 = vst [vmem:[#allocation61_spill] sm:$0xff] %v11859_v39  ;;  %v11865_v24 = vadd.f32 %v9350_v41, %v9270_v8  ;;  %9671 = vmatprep.mubr.msk.f32.mxu1 %vm400_vm1, %v11857_v43  ;;  %v1392_v11 = vpop.f32.mrf.mxu0  ;;  %v11875_v39 = vld [vmem:[%s10626_s16 + $0x140] sm:$0xff]  ;;  %v11890_v41 = vld [vmem:[%s10626_s16 + $0x148] sm:$0xff] }
 0x175   : > { %v1700_v48 = vpop.f32.mrf.mxu1  ;;  %14327 = vst [vmem:[#allocation64_spill] sm:$0xff] %v11875_v39  ;;  %14330 = vst [vmem:[#allocation67_spill] sm:$0xff] %v11890_v41 }
 0x176   : > { %14325 = vst [vmem:[#allocation62_spill] sm:$0xff] %v11865_v24  ;;  %v11877_v13 = vadd.f32 %v1700_v48, %v1392_v11  ;;  %v9273_v5 = vpop.f32.mrf.mxu0  ;;  %9592 = vmatmul.mubr.msk.f32.gmra.mxu0 %vm400_vm1, %v11872_v45 }
 0x177   : > { %v9353_v10 = vpop.f32.mrf.mxu1  ;;  %9672 = vmatmul.mubr.msk.f32.gmra.mxu1 %vm400_vm1, %v11872_v45  ;;  %9594 = vmatprep.mubr.msk.f32.mxu0 %vm400_vm1, %v11875_v39 }
 0x178   : > { %14328 = vst [vmem:[#allocation65_spill] sm:$0xff] %v11877_v13  ;;  %v11883_v8 = vadd.f32 %v9353_v10, %v9273_v5  ;;  %9674 = vmatprep.mubr.msk.f32.mxu1 %vm400_vm1, %v11875_v39  ;;  %v1402_v11 = vpop.f32.mrf.mxu0  ;;  %v11893_v13 = vld [vmem:[%s10626_s16 + $0x150] sm:$0xff]  ;;  %v11908_v10 = vld [vmem:[%s10626_s16 + $0x158] sm:$0xff] }
 0x179   : > { %v1710_v48 = vpop.f32.mrf.mxu1  ;;  %14331 = vst [vmem:[#allocation68_spill] sm:$0xff] %v11893_v13  ;;  %14334 = vst [vmem:[#allocation71_spill] sm:$0xff] %v11908_v10 }
 0x17a   : > { %14329 = vst [vmem:[#allocation66_spill] sm:$0xff] %v11883_v8  ;;  %v11895_v24 = vadd.f32 %v1710_v48, %v1402_v11  ;;  %v9276_v43 = vpop.f32.mrf.mxu0  ;;  %9595 = vmatmul.mubr.msk.f32.gmra.mxu0 %vm400_vm1, %v11890_v41 }
 0x17b   : > { %v9356_v45 = vpop.f32.mrf.mxu1  ;;  %9675 = vmatmul.mubr.msk.f32.gmra.mxu1 %vm400_vm1, %v11890_v41  ;;  %9597 = vmatprep.mubr.msk.f32.mxu0 %vm400_vm1, %v11893_v13 }
 0x17c   : > { %14332 = vst [vmem:[#allocation69_spill] sm:$0xff] %v11895_v24  ;;  %v11901_v5 = vadd.f32 %v9356_v45, %v9276_v43  ;;  %9677 = vmatprep.mubr.msk.f32.mxu1 %vm400_vm1, %v11893_v13  ;;  %v1412_v11 = vpop.f32.mrf.mxu0  ;;  %v11911_v24 = vld [vmem:[%s10626_s16 + $0x160] sm:$0xff]  ;;  %v11926_v45 = vld [vmem:[%s10626_s16 + $0x168] sm:$0xff] }
 0x17d   : > { %v1720_v48 = vpop.f32.mrf.mxu1  ;;  %14335 = vst [vmem:[#allocation72_spill] sm:$0xff] %v11911_v24 }
 0x17e   : > { %14333 = vst [vmem:[#allocation70_spill] sm:$0xff] %v11901_v5  ;;  %v11913_v8 = vadd.f32 %v1720_v48, %v1412_v11  ;;  %v9279_v39 = vpop.f32.mrf.mxu0  ;;  %9598 = vmatmul.mubr.msk.f32.gmra.mxu0 %vm400_vm1, %v11908_v10 }
 0x17f   : > { %v9359_v41 = vpop.f32.mrf.mxu1  ;;  %9678 = vmatmul.mubr.msk.f32.gmra.mxu1 %vm400_vm1, %v11908_v10  ;;  %9600 = vmatprep.mubr.msk.f32.mxu0 %vm400_vm1, %v11911_v24 }
 0x180   : > { %14336 = vst [vmem:[#allocation73_spill] sm:$0xff] %v11913_v8  ;;  %v11919_v43 = vadd.f32 %v9359_v41, %v9279_v39  ;;  %9680 = vmatprep.mubr.msk.f32.mxu1 %vm400_vm1, %v11911_v24  ;;  %v1422_v11 = vpop.f32.mrf.mxu0  ;;  %v11929_v8 = vld [vmem:[%s10626_s16 + $0x170] sm:$0xff]  ;;  %v11944_v41 = vld [vmem:[%s10626_s16 + $0x178] sm:$0xff] }
 0x181   : > { %v1730_v48 = vpop.f32.mrf.mxu1  ;;  %14338 = vst [vmem:[#allocation75_spill] sm:$0xff] %v11929_v8 }
 0x182   : > { %14337 = vst [vmem:[#allocation74_spill] sm:$0xff] %v11919_v43  ;;  %v11931_v5 = vadd.f32 %v1730_v48, %v1422_v11  ;;  %v9282_v13 = vpop.f32.mrf.mxu0  ;;  %9601 = vmatmul.mubr.msk.f32.gmra.mxu0 %vm400_vm1, %v11926_v45 }
 0x183   : > { %v9362_v10 = vpop.f32.mrf.mxu1  ;;  %9681 = vmatmul.mubr.msk.f32.gmra.mxu1 %vm400_vm1, %v11926_v45  ;;  %9603 = vmatprep.mubr.msk.f32.mxu0 %vm400_vm1, %v11929_v8 }
 0x184   : > { %14339 = vst [vmem:[#allocation76_spill] sm:$0xff] %v11931_v5  ;;  %v11937_v39 = vadd.f32 %v9362_v10, %v9282_v13  ;;  %9683 = vmatprep.mubr.msk.f32.mxu1 %vm400_vm1, %v11929_v8  ;;  %v1432_v11 = vpop.f32.mrf.mxu0  ;;  %v11947_v5 = vld [vmem:[%s10626_s16 + $0x180] sm:$0xff]  ;;  %v11962_v10 = vld [vmem:[%s10626_s16 + $0x188] sm:$0xff] }
 0x185   : > { %v1740_v48 = vpop.f32.mrf.mxu1  ;;  %14341 = vst [vmem:[#allocation78_spill] sm:$0xff] %v11947_v5 }
 0x186   : > { %14340 = vst [vmem:[#allocation77_spill] sm:$0xff] %v11937_v39  ;;  %v11949_v43 = vadd.f32 %v1740_v48, %v1432_v11  ;;  %v9285_v24 = vpop.f32.mrf.mxu0  ;;  %9604 = vmatmul.mubr.msk.f32.gmra.mxu0 %vm400_vm1, %v11944_v41 }
 0x187   : > { %v9365_v37 = vpop.f32.mrf.mxu1  ;;  %9684 = vmatmul.mubr.msk.f32.gmra.mxu1 %vm400_vm1, %v11944_v41  ;;  %9606 = vmatprep.mubr.msk.f32.mxu0 %vm400_vm1, %v11947_v5 }
 0x188   : > { %14342 = vst [vmem:[#allocation79_spill] sm:$0xff] %v11949_v43  ;;  %v11955_v13 = vadd.f32 %v9365_v37, %v9285_v24  ;;  %9686 = vmatprep.mubr.msk.f32.mxu1 %vm400_vm1, %v11947_v5  ;;  %v1442_v11 = vpop.f32.mrf.mxu0 }
 0x189   : > { %v1750_v48 = vpop.f32.mrf.mxu1 }
 0x18a   : > { %14343 = vst [vmem:[#allocation80_spill] sm:$0xff] %v11955_v13  ;;  %v11964_v43 = vadd.f32 %v1750_v48, %v1442_v11  ;;  %v9288_v39 = vpop.f32.mrf.mxu0  ;;  %9607 = vmatmul.mubr.msk.f32.gmra.mxu0 %vm400_vm1, %v11962_v10  ;;  %v11977_v48 = vld [vmem:[%s10626_s16 + $0x1a0] sm:$0xff] }
 0x18b   : > { %v9368_v8 = vpop.f32.mrf.mxu1  ;;  %9687 = vmatmul.mubr.msk.f32.gmra.mxu1 %vm400_vm1, %v11962_v10  ;;  %9609 = vmatprep.mubr.msk.f32.mxu0 %vm400_vm1, %v11537_v42 }
 0x18c   : > { %14344 = vst [vmem:[#allocation81_spill] sm:$0xff] %v11964_v43  ;;  %v11970_v37 = vadd.f32 %v9368_v8, %v9288_v39  ;;  %9689 = vmatprep.mubr.msk.f32.mxu1 %vm400_vm1, %v11537_v42  ;;  %v1452_v24 = vpop.f32.mrf.mxu0  ;;  %v11992_v42 = vld [vmem:[%s10626_s16 + $0x1a8] sm:$0xff] }
 0x18d   : > { %v1760_v11 = vpop.f32.mrf.mxu1 }
 0x18e   : > { %14345 = vst [vmem:[#allocation82_spill] sm:$0xff] %v11970_v37  ;;  %v11979_v43 = vadd.f32 %v1760_v11, %v1452_v24  ;;  %v9291_v13 = vpop.f32.mrf.mxu0  ;;  %9610 = vmatmul.mubr.msk.f32.gmra.mxu0 %vm400_vm1, %v11552_v2 }
 0x18f   : > { %v9371_v5 = vpop.f32.mrf.mxu1  ;;  %9690 = vmatmul.mubr.msk.f32.gmra.mxu1 %vm400_vm1, %v11552_v2  ;;  %9612 = vmatprep.mubr.msk.f32.mxu0 %vm400_vm1, %v11977_v48 }
 0x190   : > { %14346 = vst [vmem:[#allocation83_spill] sm:$0xff] %v11979_v43  ;;  %v11985_v8 = vadd.f32 %v9371_v5, %v9291_v13  ;;  %9692 = vmatprep.mubr.msk.f32.mxu1 %vm400_vm1, %v11977_v48  ;;  %v1462_v39 = vpop.f32.mrf.mxu0 }
 0x191   : > { %v1770_v24 = vpop.f32.mrf.mxu1 }
 0x192   : > { %v11994_v11 = vadd.f32 %v1770_v24, %v1462_v39  ;;  %v9294_v43 = vpop.f32.mrf.mxu0  ;;  %9613 = vmatmul.mubr.msk.f32.gmra.mxu0 %vm400_vm1, %v11992_v42 }
 0x193   : > { %v9374_v37 = vpop.f32.mrf.mxu1  ;;  %9693 = vmatmul.mubr.msk.f32.gmra.mxu1 %vm400_vm1, %v11992_v42  ;;  %9703 = vmatprep.mubr.msk.f32.mxu0 %vm400_vm1, %v11569_v0 }
 0x194   : > { %14347 = vst [vmem:[#allocation84_spill] sm:$0xff] %v11994_v11  ;;  %v12000_v2 = vadd.f32 %v9374_v37, %v9294_v43  ;;  %9783 = vmatprep.mubr.msk.f32.mxu1 %vm400_vm1, %v11569_v0  ;;  %v1472_v5 = vpop.f32.mrf.mxu0 }
 0x195   : > { %v1780_v13 = vpop.f32.mrf.mxu1 }
 0x196   : > { %v12006_v39 = vadd.f32 %v1780_v13, %v1472_v5  ;;  %v9385_v24 = vpop.f32.mrf.mxu0  ;;  %9704 = vmatmul.mubr.msk.f32.vlgmr.msra.gmra.mxu0 %vm400_vm1, %v11586_v60 }
 0x197   : > { %v9465_v11 = vpop.f32.mrf.mxu1  ;;  %9784 = vmatmul.mubr.msk.f32.vlgmr.msra.gmra.mxu1 %vm400_vm1, %v11586_v60  ;;  %v12013_v43 = vadd.f32 %v9385_v24, %v11248_v19  ;;  %9706 = vmatprep.mubr.msk.f32.mxu0 %vm400_vm1, %v11593_v62 }
 0x198   : > { %14348 = vst [vmem:[#allocation85_spill] sm:$0xff] %v12006_v39  ;;  %v12016_v37 = vadd.f32 %v9465_v11, %v11579_v52  ;;  %9786 = vmatprep.mubr.msk.f32.mxu1 %vm400_vm1, %v11593_v62  ;;  %v2055_v0 = vpop.f32.mrf.mxu0 }
 0x199   : > { %v2416_v5 = vpop.f32.mrf.mxu1  ;;  %v12023_v13 = vadd.f32 %v2055_v0, %v11258_v17 }
 0x19a   : > { %v12026_v39 = vadd.f32 %v2416_v5, %v11595_v18  ;;  %v9388_v60 = vpop.f32.mrf.mxu0  ;;  %9707 = vmatmul.mubr.msk.f32.gmra.mxu0 %vm400_vm1, %v11614_v46 }
 0x19b   : > { %v9468_v19 = vpop.f32.mrf.mxu1  ;;  %9787 = vmatmul.mubr.msk.f32.gmra.mxu1 %vm400_vm1, %v11614_v46  ;;  %v12033_v52 = vadd.f32 %v9388_v60, %v11270_v28  ;;  %9709 = vmatprep.mubr.msk.f32.mxu0 %vm400_vm1, %v11617_v29 }
 0x19c   : > { %v12036_v62 = vadd.f32 %v9468_v19, %v11607_v58  ;;  %9789 = vmatprep.mubr.msk.f32.mxu1 %vm400_vm1, %v11617_v29  ;;  %v2065_v17 = vpop.f32.mrf.mxu0 }
 0x19d   : > { %v2426_v18 = vpop.f32.mrf.mxu1  ;;  %v12043_v11 = vadd.f32 %v2065_v17, %v11276_v21 }
 0x19e   : > { %v12046_v24 = vadd.f32 %v2426_v18, %v11619_v50  ;;  %v9391_v46 = vpop.f32.mrf.mxu0  ;;  %9710 = vmatmul.mubr.msk.f32.gmra.mxu0 %vm400_vm1, %v11638_v44 }
 0x19f   : > { %14349 = vst [vmem:[#allocation86_spill] sm:$0xff] %v12043_v11  ;;  %v9471_v28 = vpop.f32.mrf.mxu1  ;;  %9790 = vmatmul.mubr.msk.f32.gmra.mxu1 %vm400_vm1, %v11638_v44  ;;  %v12053_v58 = vadd.f32 %v9391_v46, %v11288_v9  ;;  %9712 = vmatprep.mubr.msk.f32.mxu0 %vm400_vm1, %v11641_v36 }
 0x1a0   : > { %14350 = vst [vmem:[#allocation87_spill] sm:$0xff] %v12046_v24  ;;  %v12056_v29 = vadd.f32 %v9471_v28, %v11631_v56  ;;  %9792 = vmatprep.mubr.msk.f32.mxu1 %vm400_vm1, %v11641_v36  ;;  %v2075_v21 = vpop.f32.mrf.mxu0 }
 0x1a1   : > { %v2436_v50 = vpop.f32.mrf.mxu1  ;;  %v12063_v0 = vadd.f32 %v2075_v21, %v11294_v25 }
 0x1a2   : > { %v12066_v5 = vadd.f32 %v2436_v50, %v11643_v34  ;;  %v9394_v44 = vpop.f32.mrf.mxu0  ;;  %9713 = vmatmul.mubr.msk.f32.gmra.mxu0 %vm400_vm1, %v11656_v38 }
 0x1a3   : > { %14351 = vst [vmem:[#allocation88_spill] sm:$0xff] %v12063_v0  ;;  %v9474_v9 = vpop.f32.mrf.mxu1  ;;  %9793 = vmatmul.mubr.msk.f32.gmra.mxu1 %vm400_vm1, %v11656_v38  ;;  %v12073_v56 = vadd.f32 %v9394_v44, %v11310_v16  ;;  %9715 = vmatprep.mubr.msk.f32.mxu0 %vm400_vm1, %v11659_v54 }
 0x1a4   : > { %14352 = vst [vmem:[#allocation89_spill] sm:$0xff] %v12066_v5  ;;  %v12076_v36 = vadd.f32 %v9474_v9, %v11649_v32  ;;  %9795 = vmatprep.mubr.msk.f32.mxu1 %vm400_vm1, %v11659_v54  ;;  %v2085_v25 = vpop.f32.mrf.mxu0 }
 0x1a5   : > { %v2446_v34 = vpop.f32.mrf.mxu1  ;;  %v12083_v60 = vadd.f32 %v2085_v25, %v11316_v20  ;;  %v14363_v25 = vld [vmem:[#allocation3_spill] sm:$0xff] }
 0x1a6   : > { %v12086_v19 = vadd.f32 %v2446_v34, %v11661_v3  ;;  %v9397_v38 = vpop.f32.mrf.mxu0  ;;  %9716 = vmatmul.mubr.msk.f32.gmra.mxu0 %vm400_vm1, %v11674_v40 }
 0x1a7   : > { %14353 = vst [vmem:[#allocation90_spill] sm:$0xff] %v12083_v60  ;;  %v9477_v16 = vpop.f32.mrf.mxu1  ;;  %9796 = vmatmul.mubr.msk.f32.gmra.mxu1 %vm400_vm1, %v11674_v40  ;;  %v12093_v32 = vadd.f32 %v9397_v38, %v11326_v30  ;;  %9718 = vmatprep.mubr.msk.f32.mxu0 %vm400_vm1, %v11677_v7  ;;  %v14364_v38 = vld [vmem:[#allocation35_spill] sm:$0xff]  ;;  %v3663_v60 = vld [vmem:[%s10626_s16 + $0x1b0] sm:$0xff] }
 0x1a8   : > { %14354 = vst [vmem:[#allocation91_spill] sm:$0xff] %v12086_v19  ;;  %v12096_v54 = vadd.f32 %v9477_v16, %v11667_v1  ;;  %9798 = vmatprep.mubr.msk.f32.mxu1 %vm400_vm1, %v11677_v7  ;;  %v2095_v20 = vpop.f32.mrf.mxu0 }
 0x1a9   : > { %v2456_v3 = vpop.f32.mrf.mxu1  ;;  %v12103_v17 = vadd.f32 %v2095_v20, %v11332_v4 }
 0x1aa   : > { %v12106_v18 = vadd.f32 %v2456_v3, %v11679_v63  ;;  %v9400_v40 = vpop.f32.mrf.mxu0  ;;  %9719 = vmatmul.mubr.msk.f32.gmra.mxu0 %vm400_vm1, %v11692_v15  ;;  %v14366_v3 = vld [vmem:[#allocation4_spill] sm:$0xff] }
 0x1ab   : > { %14355 = vst [vmem:[#allocation92_spill] sm:$0xff] %v12103_v17  ;;  %v9480_v30 = vpop.f32.mrf.mxu1  ;;  %9799 = vmatmul.mubr.msk.f32.gmra.mxu1 %vm400_vm1, %v11692_v15  ;;  %v12113_v1 = vadd.f32 %v9400_v40, %v11338_v31  ;;  %9721 = vmatprep.mubr.msk.f32.mxu0 %vm400_vm1, %v11695_v57 }
 0x1ac   : > { %14356 = vst [vmem:[#allocation93_spill] sm:$0xff] %v12106_v18  ;;  %v12116_v7 = vadd.f32 %v9480_v30, %v11685_v26  ;;  %9801 = vmatprep.mubr.msk.f32.mxu1 %vm400_vm1, %v11695_v57  ;;  %v2105_v4 = vpop.f32.mrf.mxu0  ;;  %v14368_v30 = vld [vmem:[#allocation37_spill] sm:$0xff] }
 0x1ad   : > { %v2466_v63 = vpop.f32.mrf.mxu1  ;;  %v12123_v46 = vadd.f32 %v2105_v4, %v11344_v22  ;;  %v3659_v18 = vld [vmem:[%s10626_s16 + $0x190] sm:$0xff] }
 0x1ae   : > { %v12126_v28 = vadd.f32 %v2466_v63, %v11697_v55  ;;  %v9403_v15 = vpop.f32.mrf.mxu0  ;;  %9722 = vmatmul.mubr.msk.f32.gmra.mxu0 %vm400_vm1, %v11710_v61 }
 0x1af   : > { %14357 = vst [vmem:[#allocation94_spill] sm:$0xff] %v12123_v46  ;;  %v9483_v31 = vpop.f32.mrf.mxu1  ;;  %9802 = vmatmul.mubr.msk.f32.gmra.mxu1 %vm400_vm1, %v11710_v61  ;;  %v12133_v26 = vadd.f32 %v9403_v15, %v11350_v33  ;;  %9724 = vmatprep.mubr.msk.f32.mxu0 %vm400_vm1, %v11713_v51  ;;  %v14370_v15 = vld [vmem:[#allocation39_spill] sm:$0xff] }
 0x1b0   : > { %14358 = vst [vmem:[#allocation95_spill] sm:$0xff] %v12126_v28  ;;  %v12136_v57 = vadd.f32 %v9483_v31, %v11703_v59  ;;  %9804 = vmatprep.mubr.msk.f32.mxu1 %vm400_vm1, %v11713_v51  ;;  %v2115_v22 = vpop.f32.mrf.mxu0  ;;  %v14371_v31 = vld [vmem:[#allocation5_spill] sm:$0xff]  ;;  %v14428_v28 = vld [vmem:[#allocation66_spill] sm:$0xff] }
 0x1b1   : > { %v2476_v55 = vpop.f32.mrf.mxu1  ;;  %v12143_v21 = vadd.f32 %v2115_v22, %v11356_v12  ;;  %v7856_v12 = vld [vmem:[%s14213_s3 + $0xe8] sm:$0xff] }
 0x1b2   : > { %v12146_v50 = vadd.f32 %v2476_v55, %v11715_v14  ;;  %v9406_v61 = vpop.f32.mrf.mxu0  ;;  %9725 = vmatmul.mubr.msk.f32.gmra.mxu0 %vm400_vm1, %v11728_v53  ;;  %v4737_v14 = vld [vmem:[%s14213_s3 + $0x70] sm:$0xff]  ;;  %9855 = vmatprep.subr.mxu0 %v7856_v12  ;;  %v14372_v55 = vld [vmem:[#allocation38_spill] sm:$0xff] }
 0x1b3   : > { %14359 = vst [vmem:[#allocation96_spill] sm:$0xff] %v12143_v21  ;;  %v9486_v33 = vpop.f32.mrf.mxu1  ;;  %9805 = vmatmul.mubr.msk.f32.gmra.mxu1 %vm400_vm1, %v11728_v53  ;;  %v12153_v59 = vadd.f32 %v9406_v61, %v11362_v35  ;;  %9727 = vmatprep.mubr.msk.f32.mxu0 %vm400_vm1, %v11731_v47 }
 0x1b4   : > { %14360 = vst [vmem:[#allocation97_spill] sm:$0xff] %v12146_v50  ;;  %v12156_v51 = vadd.f32 %v9486_v33, %v11721_v27  ;;  %9807 = vmatprep.mubr.msk.f32.mxu1 %vm400_vm1, %v11731_v47  ;;  %v2125_v53 = vpop.f32.mrf.mxu0  ;;  %9909 = vmatprep.subr.mxu1 %v4737_v14  ;;  %v14373_v33 = vld [vmem:[#allocation40_spill] sm:$0xff]  ;;  %v14420_v50 = vld [vmem:[#allocation62_spill] sm:$0xff] }
 0x1b5   : > { %v2486_v35 = vpop.f32.mrf.mxu1  ;;  %v12169_v27 = vadd.f32 %v2125_v53, %v11368_v23  ;;  %9856 = vmatpush3.msra.mxu0 %v7856_v12  ;;  %9910 = vmatpush3.msra.mxu1 %v4737_v14  ;;  %v14365_v23 = vld [vmem:[#allocation36_spill] sm:$0xff]  ;;  %v7855_v12 = vld [vmem:[%s14213_s3 + $0xe0] sm:$0xff] }
 0x1b6   : > { %v12172_v44 = vadd.f32 %v2486_v35, %v11733_v6  ;;  %v9409_v47 = vpop.f32.mrf.mxu0  ;;  %9728 = vmatmul.mubr.msk.f32.gmra.mxu0 %vm400_vm1, %v11746_v49  ;;  %v4736_v14 = vld [vmem:[%s14213_s3 + $0x68] sm:$0xff]  ;;  %9857 = vmatprep.subr.mxu0 %v7855_v12 }
 0x1b7   : > { %14361 = vst [vmem:[#allocation98_spill] sm:$0xff] %v12169_v27  ;;  %v9489_v9 = vpop.f32.mrf.mxu1  ;;  %9808 = vmatmul.mubr.msk.f32.gmra.mxu1 %vm400_vm1, %v11746_v49  ;;  %v12179_v34 = vadd.f32 %v9409_v47, %v14363_v25  ;;  %9730 = vmatprep.mubr.msk.f32.mxu0 %vm400_vm1, %v14365_v23  ;;  %v14374_v47 = vld [vmem:[#allocation6_spill] sm:$0xff]  ;;  %v14376_v25 = vld [vmem:[#allocation41_spill] sm:$0xff] }
 0x1b8   : > { %14362 = vst [vmem:[#allocation99_spill] sm:$0xff] %v12172_v44  ;;  %v12182_v16 = vadd.f32 %v9489_v9, %v14364_v38  ;;  %9810 = vmatprep.mubr.msk.f32.mxu1 %vm400_vm1, %v14365_v23  ;;  %v2135_v6 = vpop.f32.mrf.mxu0  ;;  %9911 = vmatprep.subr.mxu1 %v4736_v14 }
 0x1b9   : > { %v2496_v20 = vpop.f32.mrf.mxu1  ;;  %v12189_v40 = vadd.f32 %v2135_v6, %v14366_v3  ;;  %9858 = vmatpush3.msra.mxu0 %v7855_v12  ;;  %9912 = vmatpush3.msra.mxu1 %v4736_v14  ;;  %v14379_v3 = vld [vmem:[#allocation7_spill] sm:$0xff]  ;;  %v14384_v14 = vld [vmem:[#allocation45_spill] sm:$0xff] }
 0x1ba   : > { %v12192_v4 = vadd.f32 %v2496_v20, %v14368_v30  ;;  %v9412_v49 = vpop.f32.mrf.mxu0  ;;  %9731 = vmatmul.mubr.msk.f32.gmra.mxu0 %vm400_vm1, %v14370_v15  ;;  %v14378_v20 = vld [vmem:[#allocation43_spill] sm:$0xff] }
 0x1bb   : > { %14367 = vst [vmem:[#allocation3_spill] sm:$0xff] %v12189_v40  ;;  %v9492_v63 = vpop.f32.mrf.mxu1  ;;  %9811 = vmatmul.mubr.msk.f32.gmra.mxu1 %vm400_vm1, %v14370_v15  ;;  %v12199_v22 = vadd.f32 %v9412_v49, %v14371_v31  ;;  %9733 = vmatprep.mubr.msk.f32.mxu0 %vm400_vm1, %v14373_v33  ;;  %v14380_v49 = vld [vmem:[#allocation42_spill] sm:$0xff]  ;;  %v14381_v15 = vld [vmem:[#allocation44_spill] sm:$0xff] }
 0x1bc   : > { %14369 = vst [vmem:[#allocation35_spill] sm:$0xff] %v12192_v4  ;;  %v12202_v61 = vadd.f32 %v9492_v63, %v14372_v55  ;;  %9813 = vmatprep.mubr.msk.f32.mxu1 %vm400_vm1, %v14373_v33  ;;  %v2145_v53 = vpop.f32.mrf.mxu0  ;;  %v14382_v33 = vld [vmem:[#allocation8_spill] sm:$0xff]  ;;  %v14404_v4 = vld [vmem:[#allocation54_spill] sm:$0xff] }
 0x1bd   : > { %v2506_v35 = vpop.f32.mrf.mxu1  ;;  %v12215_v9 = vadd.f32 %v2145_v53, %v14374_v47  ;;  %v4735_v47 = vld [vmem:[%s14213_s3 + $0x60] sm:$0xff] }
 0x1be   : > { %v12218_v38 = vadd.f32 %v2506_v35, %v14376_v25  ;;  %v9415_v23 = vpop.f32.mrf.mxu0  ;;  %9734 = vmatmul.mubr.msk.f32.gmra.mxu0 %vm400_vm1, %v14378_v20  ;;  %v7854_v35 = vld [vmem:[%s14213_s3 + $0xd8] sm:$0xff]  ;;  %9913 = vmatprep.subr.mxu1 %v4735_v47 }
 0x1bf   : > { %14375 = vst [vmem:[#allocation36_spill] sm:$0xff] %v12215_v9  ;;  %v9495_v6 = vpop.f32.mrf.mxu1  ;;  %9814 = vmatmul.mubr.msk.f32.gmra.mxu1 %vm400_vm1, %v14378_v20  ;;  %v12225_v30 = vadd.f32 %v9415_v23, %v14379_v3  ;;  %9736 = vmatprep.mubr.msk.f32.mxu0 %vm400_vm1, %v14381_v15  ;;  %v14387_v20 = vld [vmem:[#allocation9_spill] sm:$0xff] }
 0x1c0   : > { %14377 = vst [vmem:[#allocation4_spill] sm:$0xff] %v12218_v38  ;;  %v12228_v63 = vadd.f32 %v9495_v6, %v14380_v49  ;;  %9816 = vmatprep.mubr.msk.f32.mxu1 %vm400_vm1, %v14381_v15  ;;  %v2155_v31 = vpop.f32.mrf.mxu0  ;;  %v14386_v6 = vld [vmem:[#allocation47_spill] sm:$0xff]  ;;  %v14388_v49 = vld [vmem:[#allocation46_spill] sm:$0xff]  ;;  %9859 = vmatprep.subr.mxu0 %v7854_v35 }
 0x1c1   : > { %v2516_v55 = vpop.f32.mrf.mxu1  ;;  %v12235_v12 = vadd.f32 %v2155_v31, %v14382_v33  ;;  %v14389_v31 = vld [vmem:[#allocation48_spill] sm:$0xff]  ;;  %9860 = vmatpush3.msra.mxu0 %v7854_v35  ;;  %9914 = vmatpush3.msra.mxu1 %v4735_v47  ;;  %v14396_v38 = vld [vmem:[#allocation50_spill] sm:$0xff]  ;;  %v7853_v35 = vld [vmem:[%s14213_s3 + $0xd0] sm:$0xff] }
 0x1c2   : > { %v12238_v53 = vadd.f32 %v2516_v55, %v14384_v14  ;;  %v9418_v25 = vpop.f32.mrf.mxu0  ;;  %9737 = vmatmul.mubr.msk.f32.gmra.mxu0 %vm400_vm1, %v14386_v6  ;;  %v14390_v14 = vld [vmem:[#allocation10_spill] sm:$0xff]  ;;  %9861 = vmatprep.subr.mxu0 %v7853_v35 }
 0x1c3   : > { %14383 = vst [vmem:[#allocation37_spill] sm:$0xff] %v12235_v12  ;;  %v9498_v23 = vpop.f32.mrf.mxu1  ;;  %9817 = vmatmul.mubr.msk.f32.gmra.mxu1 %vm400_vm1, %v14386_v6  ;;  %v12251_v3 = vadd.f32 %v9418_v25, %v14387_v20  ;;  %9739 = vmatprep.mubr.msk.f32.mxu0 %vm400_vm1, %v14389_v31  ;;  %v14392_v6 = vld [vmem:[#allocation49_spill] sm:$0xff]  ;;  %v14394_v20 = vld [vmem:[#allocation51_spill] sm:$0xff]  ;;  %v4734_v47 = vld [vmem:[%s14213_s3 + $0x58] sm:$0xff] }
 0x1c4   : > { %14385 = vst [vmem:[#allocation39_spill] sm:$0xff] %v12238_v53  ;;  %v12254_v15 = vadd.f32 %v9498_v23, %v14388_v49  ;;  %9819 = vmatprep.mubr.msk.f32.mxu1 %vm400_vm1, %v14389_v31  ;;  %v2165_v55 = vpop.f32.mrf.mxu0  ;;  %v14395_v49 = vld [vmem:[#allocation11_spill] sm:$0xff]  ;;  %9915 = vmatprep.subr.mxu1 %v4734_v47 }
 0x1c5   : > { %v2526_v33 = vpop.f32.mrf.mxu1  ;;  %v12261_v53 = vadd.f32 %v2165_v55, %v14390_v14  ;;  %v14397_v55 = vld [vmem:[#allocation52_spill] sm:$0xff]  ;;  %9862 = vmatpush3.msra.mxu0 %v7853_v35  ;;  %9916 = vmatpush3.msra.mxu1 %v4734_v47 }
 0x1c6   : > { %v12264_v12 = vadd.f32 %v2526_v33, %v14392_v6  ;;  %v9421_v25 = vpop.f32.mrf.mxu0  ;;  %9740 = vmatmul.mubr.msk.f32.gmra.mxu0 %vm400_vm1, %v14394_v20 }
 0x1c7   : > { %14391 = vst [vmem:[#allocation5_spill] sm:$0xff] %v12261_v53  ;;  %v9501_v23 = vpop.f32.mrf.mxu1  ;;  %9820 = vmatmul.mubr.msk.f32.gmra.mxu1 %vm400_vm1, %v14394_v20  ;;  %v12271_v31 = vadd.f32 %v9421_v25, %v14395_v49  ;;  %9742 = vmatprep.mubr.msk.f32.mxu0 %vm400_vm1, %v14397_v55  ;;  %v14400_v25 = vld [vmem:[#allocation53_spill] sm:$0xff] }
 0x1c8   : > { %14393 = vst [vmem:[#allocation38_spill] sm:$0xff] %v12264_v12  ;;  %v12274_v9 = vadd.f32 %v9501_v23, %v14396_v38  ;;  %9822 = vmatprep.mubr.msk.f32.mxu1 %vm400_vm1, %v14397_v55  ;;  %v2175_v33 = vpop.f32.mrf.mxu0  ;;  %v14398_v38 = vld [vmem:[#allocation12_spill] sm:$0xff]  ;;  %v14402_v55 = vld [vmem:[#allocation55_spill] sm:$0xff]  ;;  %v14403_v12 = vld [vmem:[#allocation13_spill] sm:$0xff] }
 0x1c9   : > { %v2536_v14 = vpop.f32.mrf.mxu1  ;;  %v12287_v6 = vadd.f32 %v2175_v33, %v14398_v38  ;;  %v14405_v33 = vld [vmem:[#allocation56_spill] sm:$0xff] }
 0x1ca   : > { %v12290_v23 = vadd.f32 %v2536_v14, %v14400_v25  ;;  %v9424_v20 = vpop.f32.mrf.mxu0  ;;  %9743 = vmatmul.mubr.msk.f32.gmra.mxu0 %vm400_vm1, %v14402_v55  ;;  %v14406_v14 = vld [vmem:[#allocation14_spill] sm:$0xff]  ;;  %v14408_v25 = vld [vmem:[#allocation57_spill] sm:$0xff] }
 0x1cb   : > { %14399 = vst [vmem:[#allocation40_spill] sm:$0xff] %v12287_v6  ;;  %v9504_v49 = vpop.f32.mrf.mxu1  ;;  %9823 = vmatmul.mubr.msk.f32.gmra.mxu1 %vm400_vm1, %v14402_v55  ;;  %v12297_v53 = vadd.f32 %v9424_v20, %v14403_v12  ;;  %9745 = vmatprep.mubr.msk.f32.mxu0 %vm400_vm1, %v14405_v33  ;;  %v7852_v12 = vld [vmem:[%s14213_s3 + $0xc8] sm:$0xff]  ;;  %v14410_v55 = vld [vmem:[#allocation59_spill] sm:$0xff] }
 0x1cc   : > { %14401 = vst [vmem:[#allocation6_spill] sm:$0xff] %v12290_v23  ;;  %v12300_v40 = vadd.f32 %v9504_v49, %v14404_v4  ;;  %9825 = vmatprep.mubr.msk.f32.mxu1 %vm400_vm1, %v14405_v33  ;;  %v2185_v35 = vpop.f32.mrf.mxu0  ;;  %v4733_v4 = vld [vmem:[%s14213_s3 + $0x50] sm:$0xff]  ;;  %v14411_v33 = vld [vmem:[#allocation15_spill] sm:$0xff]  ;;  %9863 = vmatprep.subr.mxu0 %v7852_v12  ;;  %v14414_v6 = vld [vmem:[#allocation16_spill] sm:$0xff] }
 0x1cd   : > { %v2546_v47 = vpop.f32.mrf.mxu1  ;;  %v12307_v38 = vadd.f32 %v2185_v35, %v14406_v14  ;;  %9917 = vmatprep.subr.mxu1 %v4733_v4  ;;  %9864 = vmatpush3.msra.mxu0 %v7852_v12 }
 0x1ce   : > { %v12310_v23 = vadd.f32 %v2546_v47, %v14408_v25  ;;  %v9427_v20 = vpop.f32.mrf.mxu0  ;;  %9746 = vmatmul.mubr.msk.f32.gmra.mxu0 %vm400_vm1, %v14410_v55  ;;  %v14412_v47 = vld [vmem:[#allocation58_spill] sm:$0xff]  ;;  %v14413_v25 = vld [vmem:[#allocation60_spill] sm:$0xff]  ;;  %9918 = vmatpush3.msra.mxu1 %v4733_v4 }
 0x1cf   : > { %14407 = vst [vmem:[#allocation41_spill] sm:$0xff] %v12307_v38  ;;  %v9507_v49 = vpop.f32.mrf.mxu1  ;;  %9826 = vmatmul.mubr.msk.f32.gmra.mxu1 %vm400_vm1, %v14410_v55  ;;  %v12323_v35 = vadd.f32 %v9427_v20, %v14411_v33  ;;  %9748 = vmatprep.mubr.msk.f32.mxu0 %vm400_vm1, %v14413_v25  ;;  %v14416_v55 = vld [vmem:[#allocation61_spill] sm:$0xff]  ;;  %v14418_v33 = vld [vmem:[#allocation63_spill] sm:$0xff] }
 0x1d0   : > { %14409 = vst [vmem:[#allocation43_spill] sm:$0xff] %v12310_v23  ;;  %v12326_v14 = vadd.f32 %v9507_v49, %v14412_v47  ;;  %9828 = vmatprep.mubr.msk.f32.mxu1 %vm400_vm1, %v14413_v25  ;;  %v2195_v23 = vpop.f32.mrf.mxu0  ;;  %v14419_v47 = vld [vmem:[#allocation17_spill] sm:$0xff] }
 0x1d1   : > { %v2556_v38 = vpop.f32.mrf.mxu1  ;;  %v12333_v44 = vadd.f32 %v2195_v23, %v14414_v6  ;;  %v14421_v6 = vld [vmem:[#allocation64_spill] sm:$0xff]  ;;  %v7851_v23 = vld [vmem:[%s14213_s3 + $0xc0] sm:$0xff] }
 0x1d2   : > { %v12336_v27 = vadd.f32 %v2556_v38, %v14416_v55  ;;  %v9430_v20 = vpop.f32.mrf.mxu0  ;;  %9749 = vmatmul.mubr.msk.f32.gmra.mxu0 %vm400_vm1, %v14418_v33  ;;  %v4732_v38 = vld [vmem:[%s14213_s3 + $0x48] sm:$0xff]  ;;  %9865 = vmatprep.subr.mxu0 %v7851_v23 }
 0x1d3   : > { %14415 = vst [vmem:[#allocation7_spill] sm:$0xff] %v12333_v44  ;;  %v9510_v49 = vpop.f32.mrf.mxu1  ;;  %9829 = vmatmul.mubr.msk.f32.gmra.mxu1 %vm400_vm1, %v14418_v33  ;;  %v12343_v25 = vadd.f32 %v9430_v20, %v14419_v47  ;;  %9751 = vmatprep.mubr.msk.f32.mxu0 %vm400_vm1, %v14421_v6  ;;  %v14424_v20 = vld [vmem:[#allocation65_spill] sm:$0xff] }
 0x1d4   : > { %14417 = vst [vmem:[#allocation42_spill] sm:$0xff] %v12336_v27  ;;  %v12346_v21 = vadd.f32 %v9510_v49, %v14420_v50  ;;  %9831 = vmatprep.mubr.msk.f32.mxu1 %vm400_vm1, %v14421_v6  ;;  %v2205_v12 = vpop.f32.mrf.mxu0  ;;  %9919 = vmatprep.subr.mxu1 %v4732_v38  ;;  %v14422_v50 = vld [vmem:[#allocation18_spill] sm:$0xff]  ;;  %v14426_v6 = vld [vmem:[#allocation67_spill] sm:$0xff] }
 0x1d5   : > { %v2566_v4 = vpop.f32.mrf.mxu1  ;;  %v12359_v55 = vadd.f32 %v2205_v12, %v14422_v50  ;;  %9866 = vmatpush3.msra.mxu0 %v7851_v23  ;;  %9920 = vmatpush3.msra.mxu1 %v4732_v38  ;;  %v14427_v27 = vld [vmem:[#allocation19_spill] sm:$0xff]  ;;  %v14429_v12 = vld [vmem:[#allocation68_spill] sm:$0xff] }
 0x1d6   : > { %v12362_v49 = vadd.f32 %v2566_v4, %v14424_v20  ;;  %v9433_v33 = vpop.f32.mrf.mxu0  ;;  %9752 = vmatmul.mubr.msk.f32.gmra.mxu0 %vm400_vm1, %v14426_v6  ;;  %v14432_v20 = vld [vmem:[#allocation71_spill] sm:$0xff] }
 0x1d7   : > { %14423 = vst [vmem:[#allocation44_spill] sm:$0xff] %v12359_v55  ;;  %v9513_v47 = vpop.f32.mrf.mxu1  ;;  %9832 = vmatmul.mubr.msk.f32.gmra.mxu1 %vm400_vm1, %v14426_v6  ;;  %v12369_v44 = vadd.f32 %v9433_v33, %v14427_v27  ;;  %9754 = vmatprep.mubr.msk.f32.mxu0 %vm400_vm1, %v14429_v12  ;;  %v14434_v33 = vld [vmem:[#allocation70_spill] sm:$0xff]  ;;  %v14435_v6 = vld [vmem:[#allocation72_spill] sm:$0xff] }
 0x1d8   : > { %14425 = vst [vmem:[#allocation8_spill] sm:$0xff] %v12362_v49  ;;  %v12372_v46 = vadd.f32 %v9513_v47, %v14428_v28  ;;  %9834 = vmatprep.mubr.msk.f32.mxu1 %vm400_vm1, %v14429_v12  ;;  %v12378_v23 = vpop.f32.mrf.mxu0  ;;  %v14433_v28 = vld [vmem:[#allocation21_spill] sm:$0xff] }
 0x1d9   : > { %14430 = vst [vmem:[#allocation45_spill] sm:$0xff] %v12378_v23  ;;  %v12380_v38 = vpop.f32.mrf.mxu1 }
 0x1da   : > { %14431 = vst [vmem:[#allocation47_spill] sm:$0xff] %v12380_v38  ;;  %v9436_v4 = vpop.f32.mrf.mxu0  ;;  %9755 = vmatmul.mubr.msk.f32.gmra.mxu0 %vm400_vm1, %v14432_v20 }
 0x1db   : > { %v9516_v50 = vpop.f32.mrf.mxu1  ;;  %9835 = vmatmul.mubr.msk.f32.gmra.mxu1 %vm400_vm1, %v14432_v20  ;;  %v12387_v27 = vadd.f32 %v9436_v4, %v14433_v28  ;;  %9757 = vmatprep.mubr.msk.f32.mxu0 %vm400_vm1, %v14435_v6  ;;  %v4731_v20 = vld [vmem:[%s14213_s3 + $0x40] sm:$0xff] }
 0x1dc   : > { %v12390_v47 = vadd.f32 %v9516_v50, %v14434_v33  ;;  %9837 = vmatprep.mubr.msk.f32.mxu1 %vm400_vm1, %v14435_v6  ;;  %v12396_v12 = vpop.f32.mrf.mxu0  ;;  %v14438_v50 = vld [vmem:[#allocation23_spill] sm:$0xff]  ;;  %v14439_v33 = vld [vmem:[#allocation74_spill] sm:$0xff]  ;;  %9921 = vmatprep.subr.mxu1 %v4731_v20 }
 0x1dd   : > { %14436 = vst [vmem:[#allocation9_spill] sm:$0xff] %v12396_v12  ;;  %v12398_v38 = vpop.f32.mrf.mxu1  ;;  %v14440_v12 = vld [vmem:[#allocation75_spill] sm:$0xff]  ;;  %9922 = vmatpush3.msra.mxu1 %v4731_v20 }
 0x1de   : > { %14437 = vst [vmem:[#allocation46_spill] sm:$0xff] %v12398_v38  ;;  %v9439_v49 = vpop.f32.mrf.mxu0  ;;  %9758 = vmatmul.mubr.msk.f32.gmra.mxu0 %vm400_vm1, %v11926_v45 }
 0x1df   : > { %v9519_v4 = vpop.f32.mrf.mxu1  ;;  %9838 = vmatmul.mubr.msk.f32.gmra.mxu1 %vm400_vm1, %v11926_v45  ;;  %v12408_v28 = vadd.f32 %v9439_v49, %v14438_v50  ;;  %9760 = vmatprep.mubr.msk.f32.mxu0 %vm400_vm1, %v14440_v12  ;;  %v4730_v45 = vld [vmem:[%s14213_s3 + $0x38] sm:$0xff] }
 0x1e0   : > { %v12411_v6 = vadd.f32 %v9519_v4, %v14439_v33  ;;  %9840 = vmatprep.mubr.msk.f32.mxu1 %vm400_vm1, %v14440_v12  ;;  %v12417_v38 = vpop.f32.mrf.mxu0  ;;  %v14443_v12 = vld [vmem:[#allocation25_spill] sm:$0xff]  ;;  %9923 = vmatprep.subr.mxu1 %v4730_v45 }
 0x1e1   : > { %14441 = vst [vmem:[#allocation48_spill] sm:$0xff] %v12417_v38  ;;  %v12419_v55 = vpop.f32.mrf.mxu1  ;;  %v14444_v33 = vld [vmem:[#allocation77_spill] sm:$0xff]  ;;  %9924 = vmatpush3.msra.mxu1 %v4730_v45  ;;  %v3660_v45 = vld [vmem:[%s10626_s16 + $0x198] sm:$0xff] }
 0x1e2   : > { %14442 = vst [vmem:[#allocation10_spill] sm:$0xff] %v12419_v55  ;;  %v9442_v49 = vpop.f32.mrf.mxu0  ;;  %9761 = vmatmul.mubr.msk.f32.gmra.mxu0 %vm400_vm1, %v11944_v41  ;;  %v14445_v55 = vld [vmem:[#allocation78_spill] sm:$0xff] }
 0x1e3   : > { %v9522_v4 = vpop.f32.mrf.mxu1  ;;  %9841 = vmatmul.mubr.msk.f32.gmra.mxu1 %vm400_vm1, %v11944_v41  ;;  %v12429_v50 = vadd.f32 %v9442_v49, %v14443_v12  ;;  %9763 = vmatprep.mubr.msk.f32.mxu0 %vm400_vm1, %v14445_v55  ;;  %v7850_v41 = vld [vmem:[%s14213_s3 + $0xb8] sm:$0xff]  ;;  %v4729_v49 = vld [vmem:[%s14213_s3 + $0x30] sm:$0xff] }
 0x1e4   : > { %v12432_v38 = vadd.f32 %v9522_v4, %v14444_v33  ;;  %9843 = vmatprep.mubr.msk.f32.mxu1 %vm400_vm1, %v14445_v55  ;;  %v12438_v20 = vpop.f32.mrf.mxu0  ;;  %v14448_v55 = vld [vmem:[#allocation27_spill] sm:$0xff]  ;;  %9867 = vmatprep.subr.mxu0 %v7850_v41 }
 0x1e5   : > { %14446 = vst [vmem:[#allocation49_spill] sm:$0xff] %v12438_v20  ;;  %v12440_v23 = vpop.f32.mrf.mxu1  ;;  %9925 = vmatprep.subr.mxu1 %v4729_v49  ;;  %9868 = vmatpush3.msra.mxu0 %v7850_v41 }
 0x1e6   : > { %14447 = vst [vmem:[#allocation51_spill] sm:$0xff] %v12440_v23  ;;  %v9445_v4 = vpop.f32.mrf.mxu0  ;;  %9764 = vmatmul.mubr.msk.f32.gmra.mxu0 %vm400_vm1, %v11962_v10  ;;  %v14449_v23 = vld [vmem:[#allocation80_spill] sm:$0xff]  ;;  %9926 = vmatpush3.msra.mxu1 %v4729_v49 }
 0x1e7   : > { %v9525_v12 = vpop.f32.mrf.mxu1  ;;  %9844 = vmatmul.mubr.msk.f32.gmra.mxu1 %vm400_vm1, %v11962_v10  ;;  %v12454_v33 = vadd.f32 %v9445_v4, %v14448_v55  ;;  %9766 = vmatprep.mubr.msk.f32.mxu0 %vm400_vm1, %v3659_v18  ;;  %v7849_v10 = vld [vmem:[%s14213_s3 + $0xb0] sm:$0xff] }
 0x1e8   : > { %v12457_v20 = vadd.f32 %v9525_v12, %v14449_v23  ;;  %9846 = vmatprep.mubr.msk.f32.mxu1 %vm400_vm1, %v3659_v18  ;;  %v12462_v17 = vpop.f32.mrf.mxu0  ;;  %v4728_v23 = vld [vmem:[%s14213_s3 + $0x28] sm:$0xff]  ;;  %v14452_v12 = vld [vmem:[#allocation29_spill] sm:$0xff]  ;;  %9869 = vmatprep.subr.mxu0 %v7849_v10 }
 0x1e9   : > { %14450 = vst [vmem:[#allocation11_spill] sm:$0xff] %v12462_v17  ;;  %v12464_v19 = vpop.f32.mrf.mxu1  ;;  %9927 = vmatprep.subr.mxu1 %v4728_v23  ;;  %9870 = vmatpush3.msra.mxu0 %v7849_v10 }
 0x1ea   : > { %14451 = vst [vmem:[#allocation50_spill] sm:$0xff] %v12464_v19  ;;  %v9448_v4 = vpop.f32.mrf.mxu0  ;;  %9767 = vmatmul.mubr.msk.f32.gmra.mxu0 %vm400_vm1, %v3660_v45  ;;  %v14453_v19 = vld [vmem:[#allocation82_spill] sm:$0xff]  ;;  %9928 = vmatpush3.msra.mxu1 %v4728_v23 }
 0x1eb   : > { %v9528_v18 = vpop.f32.mrf.mxu1  ;;  %9847 = vmatmul.mubr.msk.f32.gmra.mxu1 %vm400_vm1, %v3660_v45  ;;  %v12475_v55 = vadd.f32 %v9448_v4, %v14452_v12  ;;  %9769 = vmatprep.mubr.msk.f32.mxu0 %vm400_vm1, %v11977_v48  ;;  %v7848_v45 = vld [vmem:[%s14213_s3 + $0xa8] sm:$0xff]  ;;  %v3664_v23 = vld [vmem:[%s10626_s16 + $0x1b8] sm:$0xff]  ;;  %s7299_s16 = sshll.u32 %s14697_s11, 3 }
 0x1ec   : > { %v12478_v41 = vadd.f32 %v9528_v18, %v14453_v19  ;;  %9849 = vmatprep.mubr.msk.f32.mxu1 %vm400_vm1, %v11977_v48  ;;  %v12484_v49 = vpop.f32.mrf.mxu0  ;;  %v4727_v19 = vld [vmem:[%s14213_s3 + $0x20] sm:$0xff]  ;;  %9871 = vmatprep.subr.mxu0 %v7848_v45  ;;  %s334_s14 = scalar_lea.vmem %s14219_s9, %s7299_s16 }
 0x1ed   : > { %14454 = vst [vmem:[#allocation52_spill] sm:$0xff] %v12484_v49  ;;  %v12486_v17 = vpop.f32.mrf.mxu1  ;;  %v14456_v18 = vld [vmem:[#allocation31_spill] sm:$0xff]  ;;  %9929 = vmatprep.subr.mxu1 %v4727_v19  ;;  %9872 = vmatpush3.msra.mxu0 %v7848_v45 }
 0x1ee   : > { %14455 = vst [vmem:[#allocation12_spill] sm:$0xff] %v12486_v17  ;;  %v9451_v4 = vpop.f32.mrf.mxu0  ;;  %9770 = vmatmul.mubr.msk.f32.gmra.mxu0 %vm400_vm1, %v11992_v42  ;;  %9930 = vmatpush3.msra.mxu1 %v4727_v19 }
 0x1ef   : > { %v9531_v48 = vpop.f32.mrf.mxu1  ;;  %9850 = vmatmul.mubr.msk.f32.gmra.mxu1 %vm400_vm1, %v11992_v42  ;;  %v12500_v12 = vadd.f32 %v9451_v4, %v14456_v18  ;;  %9772 = vmatprep.mubr.msk.f32.mxu0 %vm400_vm1, %v3663_v60  ;;  %v4726_v42 = vld [vmem:[%s14213_s3 + $0x18] sm:$0xff] }
 0x1f0   : > { %v12503_v10 = vadd.f32 %v9531_v48, %v11985_v8  ;;  %9852 = vmatprep.mubr.msk.f32.mxu1 %vm400_vm1, %v3663_v60  ;;  %v12508_v17 = vpop.f32.mrf.mxu0  ;;  %v7847_v8 = vld [vmem:[%s14213_s3 + $0xa0] sm:$0xff]  ;;  %v4725_v60 = vld [vmem:[%s14213_s3 + $0x10] sm:$0xff]  ;;  %v7846_v18 = vld [vmem:[%s14213_s3 + $0x98] sm:$0xff]  ;;  %9931 = vmatprep.subr.mxu1 %v4726_v42 }
 0x1f1   : > { %14457 = vst [vmem:[#allocation53_spill] sm:$0xff] %v12508_v17  ;;  %v12510_v49 = vpop.f32.mrf.mxu1  ;;  %9873 = vmatprep.subr.mxu0 %v7847_v8  ;;  %9932 = vmatpush3.msra.mxu1 %v4726_v42  ;;  %v7844_v42 = vld [vmem:[%s14213_s3 + $0x88] sm:$0xff] }
 0x1f2   : > { %14458 = vst [vmem:[#allocation55_spill] sm:$0xff] %v12510_v49  ;;  %v9454_v4 = vpop.f32.mrf.mxu0  ;;  %9773 = vmatmul.mubr.msk.f32.gmra.mxu0 %vm400_vm1, %v3664_v23  ;;  %v14459_v49 = vld [vmem:[#allocation33_spill] sm:$0xff]  ;;  %9933 = vmatprep.subr.mxu1 %v4725_v60 }
 0x1f3   : > { %v9534_v48 = vpop.f32.mrf.mxu1  ;;  %9853 = vmatmul.mubr.msk.f32.gmra.mxu1 %vm400_vm1, %v3664_v23  ;;  %v12527_v17 = vadd.f32 %v9454_v4, %v14459_v49  ;;  %v4724_v23 = vld [vmem:[%s14213_s3 + $0x8] sm:$0xff]  ;;  %9874 = vmatpush3.msra.mxu0 %v7847_v8  ;;  %v7845_v49 = vld [vmem:[%s14213_s3 + $0x90] sm:$0xff] }
 0x1f4   : > { %v12530_v19 = vadd.f32 %v9534_v48, %v12000_v2  ;;  %v12532_v45 = vpop.f32.mrf.mxu0  ;;  %9875 = vmatprep.subr.mxu0 %v7846_v18  ;;  %9934 = vmatpush3.msra.mxu1 %v4725_v60  ;;  %v4723_v48 = vld [vmem:[%s14213_s3] sm:$0xff] }
 0x1f5   : > { %14460 = vst [vmem:[#allocation13_spill] sm:$0xff] %v12532_v45  ;;  %v12534_v5 = vpop.f32.mrf.mxu1  ;;  %9876 = vmatpush3.msra.mxu0 %v7846_v18  ;;  %9935 = vmatprep.subr.mxu1 %v4724_v23  ;;  %v7843_v18 = vld [vmem:[%s14213_s3 + $0x80] sm:$0xff] }
 0x1f6   : > { %14461 = vst [vmem:[#allocation54_spill] sm:$0xff] %v12534_v5  ;;  %v9545_v2 = vpop.f32.mrf.mxu0  ;;  %9877 = vmatprep.subr.mxu0 %v7845_v49  ;;  %9936 = vmatpush3.msra.mxu1 %v4724_v23 }
 0x1f7   : > { %v9625_v4 = vpop.f32.mrf.mxu1  ;;  %v12549_v8 = vadd.f32 %v9545_v2, %v12013_v43  ;;  %9878 = vmatpush3.msra.mxu0 %v7845_v49  ;;  %9937 = vmatprep.subr.mxu1 %v4723_v48 }
 0x1f8   : > { %v12552_v5 = vadd.f32 %v9625_v4, %v12016_v37  ;;  %v12554_v45 = vpop.f32.mrf.mxu0  ;;  %9879 = vmatprep.subr.mxu0 %v7844_v42  ;;  %9938 = vmatpush3.msra.mxu1 %v4723_v48  ;;  %v7842_v37 = vld [vmem:[%s14213_s3 + $0x78] sm:$0xff] }
 0x1f9   : > { %v12556_v60 = vpop.f32.mrf.mxu1  ;;  %9880 = vmatpush3.msra.mxu0 %v7844_v42 }
 0x1fa   : > { %v9548_v0 = vpop.f32.mrf.mxu0  ;;  %9881 = vmatprep.subr.mxu0 %v7843_v18 }
 0x1fb   : > { %v9628_v43 = vpop.f32.mrf.mxu1  ;;  %v12565_v2 = vadd.f32 %v9548_v0, %v12033_v52  ;;  %9882 = vmatpush3.msra.mxu0 %v7843_v18 }
 0x1fc   : > { %v12568_v23 = vadd.f32 %v9628_v43, %v12036_v62  ;;  %v12570_v49 = vpop.f32.mrf.mxu0  ;;  %9883 = vmatprep.subr.mxu0 %v7842_v37 }
 0x1fd   : > { %14462 = vst [vmem:[#allocation56_spill] sm:$0xff] %v12565_v2  ;;  %v12572_v4 = vpop.f32.mrf.mxu1  ;;  %9884 = vmatpush3.msra.mxu0 %v7842_v37 }
 0x1fe   : > { %14463 = vst [vmem:[#allocation14_spill] sm:$0xff] %v12568_v23  ;;  %v9551_v24 = vpop.f32.mrf.mxu0 }
 0x1ff   : > { %v9631_v48 = vpop.f32.mrf.mxu1  ;;  %v12575_v42 = vadd.f32 %v9551_v24, %v12053_v58 }
 0x200   : > { %v12578_v11 = vadd.f32 %v9631_v48, %v12056_v29  ;;  %v12580_v52 = vpop.f32.mrf.mxu0 }
 0x201   : > { %v12582_v62 = vpop.f32.mrf.mxu1 }
 0x202   : > { %14464 = vst [vmem:[#allocation57_spill] sm:$0xff] %v12578_v11  ;;  %14465 = vst [vmem:[#allocation59_spill] sm:$0xff] %v12582_v62  ;;  %v9554_v0 = vpop.f32.mrf.mxu0 }
 0x203   : > { %v9634_v43 = vpop.f32.mrf.mxu1  ;;  %v12585_v23 = vadd.f32 %v9554_v0, %v12073_v56 }
 0x204   : > { %v12588_v18 = vadd.f32 %v9634_v43, %v12076_v36  ;;  %v12590_v2 = vpop.f32.mrf.mxu0 }
 0x205   : > { %14466 = vst [vmem:[#allocation15_spill] sm:$0xff] %v12585_v23  ;;  %v12592_v37 = vpop.f32.mrf.mxu1 }
 0x206   : > { %14467 = vst [vmem:[#allocation58_spill] sm:$0xff] %v12588_v18  ;;  %v9557_v24 = vpop.f32.mrf.mxu0 }
 0x207   : > { %v9637_v58 = vpop.f32.mrf.mxu1  ;;  %v12595_v29 = vadd.f32 %v9557_v24, %v12093_v32 }
 0x208   : > { %v12598_v48 = vadd.f32 %v9637_v58, %v12096_v54  ;;  %v12600_v62 = vpop.f32.mrf.mxu0  ;;  %v12617_v54 = vld [vmem:[%s14213_s3 + $0x2c8] sm:$0xff] }
 0x209   : > { %v12602_v11 = vpop.f32.mrf.mxu1  ;;  %14472 = vst [vmem:[#allocation17_spill] sm:$0xff] %v12617_v54  ;;  %10017 = vmatprep.subr.mxu1 %v12617_v54 }
 0x20a   : > { %v9560_v56 = vpop.f32.mrf.mxu0 }
 0x20b   : > { %v9640_v0 = vpop.f32.mrf.mxu1  ;;  %v12605_v36 = vadd.f32 %v9560_v56, %v12113_v1 }
 0x20c   : > { %v12608_v43 = vadd.f32 %v9640_v0, %v12116_v7  ;;  %v12610_v18 = vpop.f32.mrf.mxu0 }
 0x20d   : > { %14468 = vst [vmem:[#allocation60_spill] sm:$0xff] %v12605_v36  ;;  %14470 = vst [vmem:[#allocation61_spill] sm:$0xff] %v12610_v18  ;;  %v12612_v23 = vpop.f32.mrf.mxu1 }
 0x20e   : > { %14469 = vst [vmem:[#allocation16_spill] sm:$0xff] %v12608_v43  ;;  %14471 = vst [vmem:[#allocation63_spill] sm:$0xff] %v12612_v23  ;;  %v9563_v32 = vpop.f32.mrf.mxu0 }
 0x20f   : > { %v9643_v24 = vpop.f32.mrf.mxu1  ;;  %v12620_v58 = vadd.f32 %v9563_v32, %v12133_v26 }
 0x210   : > { %v12623_v1 = vadd.f32 %v9643_v24, %v12136_v57  ;;  %v12626_v7 = vpop.f32.mrf.mxu0  ;;  %v12643_v24 = vld [vmem:[%s14213_s3 + $0x340] sm:$0xff] }
 0x211   : > { %v12628_v56 = vpop.f32.mrf.mxu1  ;;  %14477 = vst [vmem:[#allocation67_spill] sm:$0xff] %v12643_v24  ;;  %9963 = vmatprep.subr.mxu0 %v12643_v24 }
 0x212   : > { %v9566_v0 = vpop.f32.mrf.mxu0 }
 0x213   : > { %v9646_v43 = vpop.f32.mrf.mxu1  ;;  %v12631_v36 = vadd.f32 %v9566_v0, %v12153_v59 }
 0x214   : > { %v12634_v23 = vadd.f32 %v9646_v43, %v12156_v51  ;;  %v12636_v18 = vpop.f32.mrf.mxu0 }
 0x215   : > { %14473 = vst [vmem:[#allocation62_spill] sm:$0xff] %v12631_v36  ;;  %14475 = vst [vmem:[#allocation18_spill] sm:$0xff] %v12636_v18  ;;  %v12638_v26 = vpop.f32.mrf.mxu1 }
 0x216   : > { %14474 = vst [vmem:[#allocation64_spill] sm:$0xff] %v12634_v23  ;;  %14476 = vst [vmem:[#allocation65_spill] sm:$0xff] %v12638_v26  ;;  %v9569_v57 = vpop.f32.mrf.mxu0 }
 0x217   : > { %v9649_v32 = vpop.f32.mrf.mxu1  ;;  %v12646_v54 = vadd.f32 %v9569_v57, %v12179_v34 }
 0x218   : > { %v12649_v59 = vadd.f32 %v9649_v32, %v12182_v16  ;;  %v12652_v51 = vpop.f32.mrf.mxu0 }
 0x219   : > { %14478 = vst [vmem:[#allocation19_spill] sm:$0xff] %v12646_v54  ;;  %v12654_v43 = vpop.f32.mrf.mxu1 }
 0x21a   : > { %14479 = vst [vmem:[#allocation66_spill] sm:$0xff] %v12649_v59  ;;  %v9572_v0 = vpop.f32.mrf.mxu0 }
 0x21b   : > { %v9652_v23 = vpop.f32.mrf.mxu1  ;;  %v12657_v36 = vadd.f32 %v9572_v0, %v12199_v22 }
 0x21c   : > { %v12660_v26 = vadd.f32 %v9652_v23, %v12202_v61  ;;  %v12662_v18 = vpop.f32.mrf.mxu0 }
 0x21d   : > { %14480 = vst [vmem:[#allocation68_spill] sm:$0xff] %v12657_v36  ;;  %v12664_v34 = vpop.f32.mrf.mxu1 }
 0x21e   : > { %14481 = vst [vmem:[#allocation71_spill] sm:$0xff] %v12660_v26  ;;  %v9575_v16 = vpop.f32.mrf.mxu0 }
 0x21f   : > { %v9655_v57 = vpop.f32.mrf.mxu1  ;;  %v12667_v32 = vadd.f32 %v9575_v16, %v12225_v30 }
 0x220   : > { %v12670_v24 = vadd.f32 %v9655_v57, %v12228_v63  ;;  %v12672_v59 = vpop.f32.mrf.mxu0 }
 0x221   : > { %14482 = vst [vmem:[#allocation21_spill] sm:$0xff] %v12667_v32  ;;  %v12674_v54 = vpop.f32.mrf.mxu1 }
 0x222   : > { %14483 = vst [vmem:[#allocation70_spill] sm:$0xff] %v12670_v24  ;;  %v9578_v22 = vpop.f32.mrf.mxu0 }
 0x223   : > { %v9658_v0 = vpop.f32.mrf.mxu1  ;;  %v12677_v61 = vadd.f32 %v9578_v22, %v12251_v3 }
 0x224   : > { %v12680_v23 = vadd.f32 %v9658_v0, %v12254_v15  ;;  %v12682_v26 = vpop.f32.mrf.mxu0 }
 0x225   : > { %14484 = vst [vmem:[#allocation72_spill] sm:$0xff] %v12677_v61  ;;  %v12684_v36 = vpop.f32.mrf.mxu1 }
 0x226   : > { %14485 = vst [vmem:[#allocation23_spill] sm:$0xff] %v12680_v23  ;;  %v9581_v30 = vpop.f32.mrf.mxu0 }
 0x227   : > { %v9661_v16 = vpop.f32.mrf.mxu1  ;;  %v12687_v63 = vadd.f32 %v9581_v30, %v12271_v31 }
 0x228   : > { %v12690_v57 = vadd.f32 %v9661_v16, %v12274_v9  ;;  %v12692_v24 = vpop.f32.mrf.mxu0 }
 0x229   : > { %14486 = vst [vmem:[#allocation74_spill] sm:$0xff] %v12687_v63  ;;  %v12694_v32 = vpop.f32.mrf.mxu1 }
 0x22a   : > { %14487 = vst [vmem:[#allocation75_spill] sm:$0xff] %v12690_v57  ;;  %v9584_v3 = vpop.f32.mrf.mxu0 }
 0x22b   : > { %v9664_v22 = vpop.f32.mrf.mxu1  ;;  %v12697_v15 = vadd.f32 %v9584_v3, %v12297_v53 }
 0x22c   : > { %v12700_v0 = vadd.f32 %v9664_v22, %v12300_v40  ;;  %v12702_v23 = vpop.f32.mrf.mxu0 }
 0x22d   : > { %14488 = vst [vmem:[#allocation25_spill] sm:$0xff] %v12697_v15  ;;  %v12704_v61 = vpop.f32.mrf.mxu1 }
 0x22e   : > { %14489 = vst [vmem:[#allocation77_spill] sm:$0xff] %v12700_v0  ;;  %v9587_v31 = vpop.f32.mrf.mxu0 }
 0x22f   : > { %v9667_v30 = vpop.f32.mrf.mxu1  ;;  %v12707_v9 = vadd.f32 %v9587_v31, %v12323_v35 }
 0x230   : > { %v12710_v16 = vadd.f32 %v9667_v30, %v12326_v14  ;;  %v12712_v57 = vpop.f32.mrf.mxu0 }
 0x231   : > { %14490 = vst [vmem:[#allocation78_spill] sm:$0xff] %v12707_v9  ;;  %v12714_v63 = vpop.f32.mrf.mxu1 }
 0x232   : > { %14491 = vst [vmem:[#allocation27_spill] sm:$0xff] %v12710_v16  ;;  %v9590_v53 = vpop.f32.mrf.mxu0 }
 0x233   : > { %v9670_v3 = vpop.f32.mrf.mxu1  ;;  %v12717_v40 = vadd.f32 %v9590_v53, %v12343_v25 }
 0x234   : > { %v12720_v22 = vadd.f32 %v9670_v3, %v12346_v21  ;;  %v12722_v0 = vpop.f32.mrf.mxu0 }
 0x235   : > { %14492 = vst [vmem:[#allocation80_spill] sm:$0xff] %v12717_v40  ;;  %v12724_v15 = vpop.f32.mrf.mxu1 }
 0x236   : > { %14493 = vst [vmem:[#allocation29_spill] sm:$0xff] %v12720_v22  ;;  %v9593_v35 = vpop.f32.mrf.mxu0 }
 0x237   : > { %v9673_v31 = vpop.f32.mrf.mxu1  ;;  %v12727_v14 = vadd.f32 %v9593_v35, %v12369_v44 }
 0x238   : > { %v12730_v30 = vadd.f32 %v9673_v31, %v12372_v46  ;;  %v12732_v16 = vpop.f32.mrf.mxu0 }
 0x239   : > { %14494 = vst [vmem:[#allocation82_spill] sm:$0xff] %v12727_v14  ;;  %v12734_v9 = vpop.f32.mrf.mxu1 }
 0x23a   : > { %14495 = vst [vmem:[#allocation31_spill] sm:$0xff] %v12730_v30  ;;  %v9596_v25 = vpop.f32.mrf.mxu0 }
 0x23b   : > { %v9676_v53 = vpop.f32.mrf.mxu1  ;;  %v12737_v21 = vadd.f32 %v9596_v25, %v12387_v27 }
 0x23c   : > { %v12740_v3 = vadd.f32 %v9676_v53, %v12390_v47  ;;  %v12742_v22 = vpop.f32.mrf.mxu0 }
 0x23d   : > { %14496 = vst [vmem:[#allocation33_spill] sm:$0xff] %v12737_v21  ;;  %v12744_v40 = vpop.f32.mrf.mxu1 }
 0x23e   : > { %14497 = vst [vmem:[#allocation100_spill] sm:$0xff] %v12740_v3  ;;  %v9599_v44 = vpop.f32.mrf.mxu0 }
 0x23f   : > { %v9679_v35 = vpop.f32.mrf.mxu1  ;;  %v12747_v46 = vadd.f32 %v9599_v44, %v12408_v28 }
 0x240   : > { %v12750_v31 = vadd.f32 %v9679_v35, %v12411_v6  ;;  %v12752_v30 = vpop.f32.mrf.mxu0 }
 0x241   : > { %14498 = vst [vmem:[#allocation101_spill] sm:$0xff] %v12747_v46  ;;  %v12754_v14 = vpop.f32.mrf.mxu1 }
 0x242   : > { %14499 = vst [vmem:[#allocation102_spill] sm:$0xff] %v12750_v31  ;;  %v9602_v27 = vpop.f32.mrf.mxu0 }
 0x243   : > { %v9682_v25 = vpop.f32.mrf.mxu1  ;;  %v12757_v47 = vadd.f32 %v9602_v27, %v12429_v50 }
 0x244   : > { %v12760_v53 = vadd.f32 %v9682_v25, %v12432_v38  ;;  %v12762_v3 = vpop.f32.mrf.mxu0 }
 0x245   : > { %14500 = vst [vmem:[#allocation103_spill] sm:$0xff] %v12757_v47  ;;  %v12764_v21 = vpop.f32.mrf.mxu1 }
 0x246   : > { %14501 = vst [vmem:[#allocation104_spill] sm:$0xff] %v12760_v53  ;;  %v9605_v28 = vpop.f32.mrf.mxu0 }
 0x247   : > { %v9685_v44 = vpop.f32.mrf.mxu1  ;;  %v12767_v6 = vadd.f32 %v9605_v28, %v12454_v33 }
 0x248   : > { %v12770_v35 = vadd.f32 %v9685_v44, %v12457_v20  ;;  %v12772_v31 = vpop.f32.mrf.mxu0 }
 0x249   : > { %14502 = vst [vmem:[#allocation105_spill] sm:$0xff] %v12767_v6  ;;  %v12774_v46 = vpop.f32.mrf.mxu1 }
 0x24a   : > { %14503 = vst [vmem:[#allocation106_spill] sm:$0xff] %v12770_v35  ;;  %v9608_v50 = vpop.f32.mrf.mxu0 }
 0x24b   : > { %v9688_v27 = vpop.f32.mrf.mxu1  ;;  %v12777_v38 = vadd.f32 %v9608_v50, %v12475_v55 }
 0x24c   : > { %v12780_v25 = vadd.f32 %v9688_v27, %v12478_v41  ;;  %v12782_v53 = vpop.f32.mrf.mxu0 }
 0x24d   : > { %14504 = vst [vmem:[#allocation107_spill] sm:$0xff] %v12777_v38  ;;  %v12784_v47 = vpop.f32.mrf.mxu1 }
 0x24e   : > { %14505 = vst [vmem:[#allocation108_spill] sm:$0xff] %v12780_v25  ;;  %14506 = vst [vmem:[#allocation109_spill] sm:$0xff] %v12784_v47  ;;  %v9611_v33 = vpop.f32.mrf.mxu0 }
 0x24f   : > { %v9691_v28 = vpop.f32.mrf.mxu1  ;;  %v12787_v20 = vadd.f32 %v9611_v33, %v12500_v12 }
 0x250   : > { %v12790_v44 = vadd.f32 %v9691_v28, %v12503_v10  ;;  %v12792_v35 = vpop.f32.mrf.mxu0  ;;  %v3208_v10 = vadd.f32 %v12554_v45, %v12023_v13  ;;  %v3569_v28 = vadd.f32 %v12556_v60, %v12026_v39  ;;  %v12819_v39 = vld [vmem:[%s14212_s2] ss:$0 sm:$0xff]  ;;  %v14518_v60 = vld [vmem:[#allocation14_spill] sm:$0xff] }
 0x251   : > { %14507 = vst [vmem:[#allocation110_spill] sm:$0xff] %v12787_v20  ;;  %14509 = vst [vmem:[#allocation112_spill] sm:$0xff] %v12792_v35  ;;  %v12794_v6 = vpop.f32.mrf.mxu1  ;;  %v14516_v35 = vld [vmem:[#allocation87_spill] sm:$0xff] }
 0x252   : > { %14508 = vst [vmem:[#allocation111_spill] sm:$0xff] %v12790_v44  ;;  %14510 = vst [vmem:[#allocation113_spill] sm:$0xff] %v12794_v6  ;;  %v9614_v55 = vpop.f32.mrf.mxu0  ;;  %v3571_v13 = vadd.f32 %v12572_v4, %v14516_v35 }
 0x253   : > { %v9694_v50 = vpop.f32.mrf.mxu1  ;;  %v12797_v41 = vadd.f32 %v9614_v55, %v12527_v17 }
 0x254   : > { %v12800_v27 = vadd.f32 %v9694_v50, %v12530_v19  ;;  %v12802_v25 = vpop.f32.mrf.mxu0 }
 0x255   : > { %14511 = vst [vmem:[#allocation114_spill] sm:$0xff] %v12797_v41  ;;  %14513 = vst [vmem:[#allocation116_spill] sm:$0xff] %v12802_v25  ;;  %v12804_v38 = vpop.f32.mrf.mxu1  ;;  %v14515_v25 = vld [vmem:[#allocation86_spill] sm:$0xff] }
 0x256   : > { %14512 = vst [vmem:[#allocation115_spill] sm:$0xff] %v12800_v27  ;;  %14514 = vst [vmem:[#allocation117_spill] sm:$0xff] %v12804_v38  ;;  %v9705_v12 = vpop.f32.mrf.mxu0  ;;  %v3210_v38 = vadd.f32 %v12570_v49, %v14515_v25  ;;  %v14519_v25 = vld [vmem:[#allocation88_spill] sm:$0xff] }
 0x257   : > { %v9785_v33 = vpop.f32.mrf.mxu1  ;;  %v4123_v44 = vadd.f32 %v9705_v12, %v12549_v8 }
 0x258   : > { %v4484_v17 = vadd.f32 %v9785_v33, %v12552_v5  ;;  %v3883_v55 = vpop.f32.mrf.mxu0  ;;  %v14517_v5 = vld [vmem:[#allocation56_spill] sm:$0xff] }
 0x259   : > { %v4244_v41 = vpop.f32.mrf.mxu1  ;;  %v4122_v50 = vadd.f32 %v3883_v55, %v3208_v10 }
 0x25a   : > { %v4532_v19 = vmax.f32 %v4123_v44, %v4484_v17  ;;  %v4483_v27 = vadd.f32 %v4244_v41, %v3569_v28  ;;  %v9708_v20 = vpop.f32.mrf.mxu0  ;;  %v3212_v28 = vadd.f32 %v12580_v52, %v14519_v25  ;;  %v14524_v25 = vld [vmem:[#allocation91_spill] sm:$0xff] }
 0x25b   : > { %v9788_v6 = vpop.f32.mrf.mxu1  ;;  %v4125_v8 = vadd.f32 %v9708_v20, %v14517_v5  ;;  %v14520_v20 = vld [vmem:[#allocation57_spill] sm:$0xff]  ;;  %v14522_v5 = vld [vmem:[#allocation59_spill] sm:$0xff] }
 0x25c   : > { %v4531_v45 = vmax.f32 %v4122_v50, %v4483_v27  ;;  %v4486_v44 = vadd.f32 %v9788_v6, %v14518_v60  ;;  %v3893_v12 = vpop.f32.mrf.mxu0  ;;  %v4587_v4 = vadd.f32 %v12819_v39, %v4532_v19  ;;  %v14521_v6 = vld [vmem:[#allocation89_spill] sm:$0xff] }
 0x25d   : > { %v4254_v41 = vpop.f32.mrf.mxu1  ;;  %v4124_v10 = vadd.f32 %v3893_v12, %v3210_v38  ;;  %v3573_v60 = vadd.f32 %v14522_v5, %v14521_v6 }
 0x25e   : > { %v4534_v33 = vmax.f32 %v4125_v8, %v4486_v44  ;;  %v4485_v49 = vadd.f32 %v4254_v41, %v3571_v13  ;;  %v9711_v35 = vpop.f32.mrf.mxu0  ;;  %v4586_v38 = vadd.f32 %v12819_v39, %v4531_v45  ;;  %v14523_v41 = vld [vmem:[#allocation90_spill] sm:$0xff]  ;;  %v14525_v45 = vld [vmem:[#allocation15_spill] sm:$0xff] }
 0x25f   : > { %v9791_v17 = vpop.f32.mrf.mxu1  ;;  %v4127_v27 = vadd.f32 %v9711_v35, %v12575_v42  ;;  %v3575_v35 = vadd.f32 %v12592_v37, %v14524_v25 }
 0x260   : > { %v4589_v55 = vadd.f32 %v12819_v39, %v4534_v33  ;;  %v4533_v47 = vmax.f32 %v4124_v10, %v4485_v49  ;;  %v4488_v50 = vadd.f32 %v9791_v17, %v14520_v20  ;;  %v3903_v13 = vpop.f32.mrf.mxu0  ;;  %v3214_v33 = vadd.f32 %v12590_v2, %v14523_v41 }
 0x261   : > { %v4264_v8 = vpop.f32.mrf.mxu1  ;;  %v4126_v12 = vadd.f32 %v3903_v13, %v3212_v28 }
 0x262   : > { %v4635_v44 = vmax.f32 %v4587_v4, %v4589_v55  ;;  %v4588_v52 = vadd.f32 %v12819_v39, %v4533_v47  ;;  %v4536_v19 = vmax.f32 %v4127_v27, %v4488_v50  ;;  %v4487_v10 = vadd.f32 %v4264_v8, %v3573_v60  ;;  %v9714_v42 = vpop.f32.mrf.mxu0  ;;  %v14526_v4 = vld [vmem:[#allocation58_spill] sm:$0xff]  ;;  %v14527_v60 = vld [vmem:[#allocation92_spill] sm:$0xff] }
 0x263   : > { %v9794_v49 = vpop.f32.mrf.mxu1  ;;  %v4129_v6 = vadd.f32 %v9714_v42, %v14525_v45  ;;  %v3216_v13 = vadd.f32 %v12600_v62, %v14527_v60  ;;  %v14529_v45 = vld [vmem:[#allocation94_spill] sm:$0xff] }
 0x264   : > { %v4637_v17 = vmax.f32 %v4635_v44, 0.0  ;;  %v4634_v20 = vmax.f32 %v4586_v38, %v4588_v52  ;;  %v4535_v5 = vmax.f32 %v4126_v12, %v4487_v10  ;;  %v4490_v55 = vadd.f32 %v9794_v49, %v14526_v4  ;;  %v3913_v47 = vpop.f32.mrf.mxu0  ;;  %v14528_v44 = vld [vmem:[#allocation93_spill] sm:$0xff] }
 0x265   : > { %v4274_v27 = vpop.f32.mrf.mxu1  ;;  %v4128_v2 = vadd.f32 %v3913_v47, %v3214_v33  ;;  %v3577_v38 = vadd.f32 %v12602_v11, %v14528_v44  ;;  %v4591_v42 = vadd.f32 %v12819_v39, %v4536_v19 }
 0x266   : > { %4640 = vst.msk [vmem:[#allocation2 + $0x8] sm:$0xff] %vm4638_vm2, %v4637_v17  ;;  %v4636_v28 = vmax.f32 %v4634_v20, 0.0  ;;  %v4489_v50 = vadd.f32 %v4274_v27, %v3575_v35  ;;  %v4538_v8 = vmax.f32 %v4129_v6, %v4490_v55  ;;  %v9717_v41 = vpop.f32.mrf.mxu0  ;;  %v4590_v33 = vadd.f32 %v12819_v39, %v4535_v5  ;;  %v14530_v6 = vld [vmem:[#allocation61_spill] sm:$0xff]  ;;  %v14532_v27 = vld [vmem:[#allocation63_spill] sm:$0xff] }
 0x267   : > { %v9797_v37 = vpop.f32.mrf.mxu1  ;;  %v4131_v12 = vadd.f32 %v9717_v41, %v12595_v29  ;;  %v3218_v4 = vadd.f32 %v14530_v6, %v14529_v45  ;;  %v7840_v6 = vld [vmem:[%s14213_s3 + $0x2c0] sm:$0xff] }
 0x268   : > { %4639 = vst.msk [vmem:[#allocation2] sm:$0xff] %vm4638_vm2, %v4636_v28  ;;  %v4537_v52 = vmax.f32 %v4128_v2, %v4489_v50  ;;  %v4492_v10 = vadd.f32 %v9797_v37, %v12598_v48  ;;  %v4593_v49 = vadd.f32 %v12819_v39, %v4538_v8  ;;  %v3923_v62 = vpop.f32.mrf.mxu0  ;;  %v14531_v48 = vld [vmem:[#allocation95_spill] sm:$0xff]  ;;  %v14533_v2 = vld [vmem:[#allocation60_spill] sm:$0xff] }
 0x269   : > { %v4284_v25 = vpop.f32.mrf.mxu1  ;;  %v4130_v20 = vadd.f32 %v3923_v62, %v3216_v13  ;;  %v3579_v19 = vadd.f32 %v14532_v27, %v14531_v48  ;;  %v14534_v8 = vld [vmem:[#allocation16_spill] sm:$0xff] }
 0x26a   : > { %v4592_v35 = vadd.f32 %v12819_v39, %v4537_v52  ;;  %v4540_v17 = vmax.f32 %v4131_v12, %v4492_v10  ;;  %v4491_v11 = vadd.f32 %v4284_v25, %v3577_v38  ;;  %v4642_v55 = vmax.f32 %v4591_v42, %v4593_v49  ;;  %v9720_v29 = vpop.f32.mrf.mxu0  ;;  %v14535_v12 = vld [vmem:[#allocation96_spill] sm:$0xff]  ;;  %v14536_v25 = vld [vmem:[#allocation97_spill] sm:$0xff] }
 0x26b   : > { %v9800_v47 = vpop.f32.mrf.mxu1  ;;  %v4133_v50 = vadd.f32 %v9720_v29, %v14533_v2  ;;  %v3220_v10 = vadd.f32 %v12626_v7, %v14535_v12 }
 0x26c   : > { %v4641_v28 = vmax.f32 %v4590_v33, %v4592_v35  ;;  %v4539_v5 = vmax.f32 %v4130_v20, %v4491_v11  ;;  %v4644_v60 = vmax.f32 %v4642_v55, 0.0  ;;  %v4494_v41 = vadd.f32 %v9800_v47, %v14534_v8  ;;  %v3933_v37 = vpop.f32.mrf.mxu0 }
 0x26d   : > { %v4294_v44 = vpop.f32.mrf.mxu1  ;;  %v4132_v38 = vadd.f32 %v3933_v37, %v3218_v4  ;;  %v3581_v35 = vadd.f32 %v12628_v56, %v14536_v25  ;;  %v12869_v7 = vld [vmem:[#allocation2 + $0x8] sm:$0xff]  ;;  %v4595_v4 = vadd.f32 %v12819_v39, %v4540_v17  ;;  %v7839_v17 = vld [vmem:[%s14213_s3 + $0x2b8] sm:$0xff]  ;;  %v14541_v37 = vld [vmem:[#allocation65_spill] sm:$0xff] }
 0x26e   : > { %v4643_v13 = vmax.f32 %v4641_v28, 0.0  ;;  %v4493_v52 = vadd.f32 %v4294_v44, %v3579_v19  ;;  %4646 = vst.msk [vmem:[#allocation2 + $0x18] sm:$0xff] %vm4638_vm2, %v4644_v60  ;;  %v4542_v42 = vmax.f32 %v4133_v50, %v4494_v41  ;;  %v9723_v49 = vpop.f32.mrf.mxu0  ;;  %v4594_v56 = vadd.f32 %v12819_v39, %v4539_v5  ;;  %v14537_v19 = vld [vmem:[#allocation17_spill] sm:$0xff]  ;;  %v14538_v28 = vld [vmem:[#allocation98_spill] sm:$0xff]  ;;  %v14540_v41 = vld [vmem:[#allocation99_spill] sm:$0xff] }
 0x26f   : > { %v9803_v62 = vpop.f32.mrf.mxu1  ;;  %v12860_v33 = vld [vmem:[#allocation2] sm:$0xff]  ;;  %v4135_v11 = vadd.f32 %v9723_v49, %v12620_v58  ;;  %v14539_v5 = vld [vmem:[#allocation18_spill] sm:$0xff]  ;;  %v3583_v44 = vadd.f32 %v14541_v37, %v14540_v41  ;;  %v14543_v49 = vld [vmem:[#allocation64_spill] sm:$0xff] }
 0x270   : > { %4645 = vst.msk [vmem:[#allocation2 + $0x10] sm:$0xff] %vm4638_vm2, %v4643_v13  ;;  %v4541_v20 = vmax.f32 %v4132_v38, %v4493_v52  ;;  %v4496_v45 = vadd.f32 %v9803_v62, %v12623_v1  ;;  %9939 = vmatprep.mubr.msk.f32.mxu1 %vm4638_vm2, %v12860_v33  ;;  %v4597_v55 = vadd.f32 %v12819_v39, %v4542_v42  ;;  %v3943_v29 = vpop.f32.mrf.mxu0  ;;  %v14542_v52 = vld [vmem:[#allocation62_spill] sm:$0xff]  ;;  %v7837_v37 = vld [vmem:[%s14213_s3 + $0x2a8] sm:$0xff] }
 0x271   : > { %v4304_v47 = vpop.f32.mrf.mxu1  ;;  %9940 = vmatmul.mubr.msk.f32.vlgmr.msra.gmra.mxu1 %vm4638_vm2, %v12869_v7  ;;  %v4134_v48 = vadd.f32 %v3943_v29, %v3220_v10  ;;  %v3222_v2 = vadd.f32 %v14539_v5, %v14538_v28  ;;  %v7838_v10 = vld [vmem:[%s14213_s3 + $0x2b0] sm:$0xff] }
 0x272   : > { %v4596_v58 = vadd.f32 %v12819_v39, %v4541_v20  ;;  %v4544_v1 = vmax.f32 %v4135_v11, %v4496_v45  ;;  %v4495_v27 = vadd.f32 %v4304_v47, %v3581_v35  ;;  %10018 = vmatpush3.msra.mxu1 %v14537_v19  ;;  %v4648_v50 = vmax.f32 %v4595_v4, %v4597_v55  ;;  %v9726_v60 = vpop.f32.mrf.mxu0  ;;  %v14544_v4 = vld [vmem:[#allocation3_spill] sm:$0xff] }
 0x273   : > { %v9806_v8 = vpop.f32.mrf.mxu1  ;;  %10019 = vmatprep.subr.mxu1 %v7840_v6  ;;  %v4137_v12 = vadd.f32 %v9726_v60, %v14542_v52  ;;  %v14545_v55 = vld [vmem:[#allocation35_spill] sm:$0xff] }
 0x274   : > { %v4647_v13 = vmax.f32 %v4594_v56, %v4596_v58  ;;  %v4543_v38 = vmax.f32 %v4134_v48, %v4495_v27  ;;  %10020 = vmatpush3.msra.mxu1 %v7840_v6  ;;  %v4650_v42 = vmax.f32 %v4648_v50, 0.0  ;;  %v4498_v62 = vadd.f32 %v9806_v8, %v14543_v49  ;;  %v3953_v25 = vpop.f32.mrf.mxu0  ;;  %v14546_v19 = vld [vmem:[#allocation19_spill] sm:$0xff] }
 0x275   : > { %v4314_v35 = vpop.f32.mrf.mxu1  ;;  %10021 = vmatprep.subr.mxu1 %v7839_v17  ;;  %v4136_v11 = vadd.f32 %v3953_v25, %v3222_v2  ;;  %v3224_v56 = vadd.f32 %v12652_v51, %v14544_v4  ;;  %v3585_v6 = vadd.f32 %v12654_v43, %v14545_v55  ;;  %v12907_v51 = vld [vmem:[#allocation2 + $0x18] sm:$0xff]  ;;  %v4599_v2 = vadd.f32 %v12819_v39, %v4544_v1  ;;  %v14551_v55 = vld [vmem:[#allocation68_spill] sm:$0xff] }
 0x276   : > { %v4649_v20 = vmax.f32 %v4647_v13, 0.0  ;;  %v4497_v45 = vadd.f32 %v4314_v35, %v3583_v44  ;;  %10022 = vmatpush3.msra.mxu1 %v7839_v17  ;;  %4652 = vst.msk [vmem:[#allocation2 + $0x28] sm:$0xff] %vm4638_vm2, %v4650_v42  ;;  %v4546_v29 = vmax.f32 %v4137_v12, %v4498_v62  ;;  %v9729_v47 = vpop.f32.mrf.mxu0  ;;  %v14547_v17 = vld [vmem:[#allocation66_spill] sm:$0xff]  ;;  %v4598_v50 = vadd.f32 %v12819_v39, %v4543_v38  ;;  %v14548_v38 = vld [vmem:[#allocation67_spill] sm:$0xff]  ;;  %v14549_v12 = vld [vmem:[#allocation36_spill] sm:$0xff] }
 0x277   : > { %v9809_v58 = vpop.f32.mrf.mxu1  ;;  %v12898_v48 = vld [vmem:[#allocation2 + $0x10] sm:$0xff]  ;;  %10023 = vmatprep.subr.mxu1 %v7838_v10  ;;  %v4139_v28 = vadd.f32 %v9729_v47, %v14546_v19  ;;  %v7902_v43 = vld [vmem:[%s14213_s3 + $0x338] sm:$0xff]  ;;  %v3226_v42 = vadd.f32 %v12662_v18, %v14549_v12 }
 0x278   : > { %4651 = vst.msk [vmem:[#allocation2 + $0x20] sm:$0xff] %vm4638_vm2, %v4649_v20  ;;  %v4545_v27 = vmax.f32 %v4136_v11, %v4497_v45  ;;  %v4500_v5 = vadd.f32 %v9809_v58, %v14547_v17  ;;  %9885 = vmatprep.mubr.msk.f32.mxu0 %vm4638_vm2, %v12898_v48  ;;  %9942 = vmatprep.mubr.msk.f32.mxu1 %vm4638_vm2, %v12898_v48  ;;  %v3963_v8 = vpop.f32.mrf.mxu0  ;;  %v7901_v35 = vld [vmem:[%s14213_s3 + $0x330] sm:$0xff]  ;;  %v7836_v20 = vld [vmem:[%s14213_s3 + $0x2a0] sm:$0xff]  ;;  %v14550_v11 = vld [vmem:[#allocation4_spill] sm:$0xff] }
 0x279   : > { %v4601_v60 = vadd.f32 %v12819_v39, %v4546_v29  ;;  %v4324_v41 = vpop.f32.mrf.mxu1  ;;  %9886 = vmatmul.mubr.msk.f32.vlgmr.msra.gmra.mxu0 %vm4638_vm2, %v12907_v51  ;;  %9943 = vmatmul.mubr.msk.f32.gmra.mxu1 %vm4638_vm2, %v12907_v51  ;;  %v4138_v1 = vadd.f32 %v3963_v8, %v3224_v56  ;;  %v3587_v45 = vadd.f32 %v12664_v34, %v14550_v11  ;;  %v14552_v29 = vld [vmem:[#allocation71_spill] sm:$0xff]  ;;  %v14553_v17 = vld [vmem:[#allocation37_spill] sm:$0xff] }
 0x27a   : > { %v4600_v44 = vadd.f32 %v12819_v39, %v4545_v27  ;;  %v4548_v13 = vmax.f32 %v4139_v28, %v4500_v5  ;;  %v4499_v52 = vadd.f32 %v4324_v41, %v3585_v6  ;;  %9964 = vmatpush3.msra.mxu0 %v14548_v38  ;;  %v9732_v62 = vpop.f32.mrf.mxu0  ;;  %10024 = vmatpush3.msra.mxu1 %v7838_v10  ;;  %v14554_v5 = vld [vmem:[#allocation39_spill] sm:$0xff]  ;;  %v7835_v38 = vld [vmem:[%s14213_s3 + $0x298] sm:$0xff] }
 0x27b   : > { %v4654_v49 = vmax.f32 %v4599_v2, %v4601_v60  ;;  %v9812_v25 = vpop.f32.mrf.mxu1  ;;  %9965 = vmatprep.subr.mxu0 %v7902_v43  ;;  %v4141_v18 = vadd.f32 %v9732_v62, %v14551_v55  ;;  %10025 = vmatprep.subr.mxu1 %v7837_v37  ;;  %v3228_v34 = vadd.f32 %v12672_v59, %v14553_v17  ;;  %v14555_v59 = vld [vmem:[#allocation21_spill] sm:$0xff]  ;;  %v7898_v17 = vld [vmem:[%s14213_s3 + $0x318] sm:$0xff] }
 0x27c   : > { %v4653_v4 = vmax.f32 %v4598_v50, %v4600_v44  ;;  %v4547_v56 = vmax.f32 %v4138_v1, %v4499_v52  ;;  %v4502_v10 = vadd.f32 %v9812_v25, %v14552_v29  ;;  %v3973_v47 = vpop.f32.mrf.mxu0  ;;  %9966 = vmatpush3.msra.mxu0 %v7902_v43  ;;  %10026 = vmatpush3.msra.mxu1 %v7837_v37  ;;  %v7900_v43 = vld [vmem:[%s14213_s3 + $0x328] sm:$0xff]  ;;  %v14556_v1 = vld [vmem:[#allocation70_spill] sm:$0xff] }
 0x27d   : > { %v4656_v6 = vmax.f32 %v4654_v49, 0.0  ;;  %v4334_v58 = vpop.f32.mrf.mxu1  ;;  %v4140_v19 = vadd.f32 %v3973_v47, %v3226_v42  ;;  %9967 = vmatprep.subr.mxu0 %v7901_v35  ;;  %10027 = vmatprep.subr.mxu1 %v7836_v20  ;;  %v3589_v2 = vadd.f32 %v12674_v54, %v14554_v5  ;;  %v12953_v52 = vld [vmem:[#allocation2 + $0x28] sm:$0xff]  ;;  %v4603_v12 = vadd.f32 %v12819_v39, %v4548_v13  ;;  %v7899_v13 = vld [vmem:[%s14213_s3 + $0x320] sm:$0xff] }
 0x27e   : > { %v4655_v27 = vmax.f32 %v4653_v4, 0.0  ;;  %v4501_v28 = vadd.f32 %v4334_v58, %v3587_v45  ;;  %v4550_v50 = vmax.f32 %v4141_v18, %v4502_v10  ;;  %v9735_v60 = vpop.f32.mrf.mxu0  ;;  %9968 = vmatpush3.msra.mxu0 %v7901_v35  ;;  %10028 = vmatpush3.msra.mxu1 %v7836_v20  ;;  %v4602_v42 = vadd.f32 %v12819_v39, %v4547_v56  ;;  %v7834_v4 = vld [vmem:[%s14213_s3 + $0x290] sm:$0xff]  ;;  %v14558_v10 = vld [vmem:[#allocation38_spill] sm:$0xff]  ;;  %v14560_v5 = vld [vmem:[#allocation23_spill] sm:$0xff] }
 0x27f   : > { %4658 = vst.msk [vmem:[#allocation2 + $0x38] sm:$0xff] %vm4638_vm2, %v4656_v6  ;;  %v9815_v8 = vpop.f32.mrf.mxu1  ;;  %v12941_v41 = vld [vmem:[#allocation2 + $0x20] sm:$0xff]  ;;  %v4143_v44 = vadd.f32 %v9735_v60, %v14555_v59  ;;  %9969 = vmatprep.subr.mxu0 %v7900_v43  ;;  %v14557_v56 = vld [vmem:[#allocation5_spill] sm:$0xff]  ;;  %10029 = vmatprep.subr.mxu1 %v7835_v38  ;;  %v3591_v47 = vadd.f32 %v12684_v36, %v14558_v10 }
 0x280   : > { %4657 = vst.msk [vmem:[#allocation2 + $0x30] sm:$0xff] %vm4638_vm2, %v4655_v27  ;;  %v4549_v37 = vmax.f32 %v4140_v19, %v4501_v28  ;;  %v4504_v54 = vadd.f32 %v9815_v8, %v14556_v1  ;;  %9888 = vmatprep.mubr.msk.f32.mxu0 %vm4638_vm2, %v12941_v41  ;;  %9945 = vmatprep.mubr.msk.f32.mxu1 %vm4638_vm2, %v12941_v41  ;;  %v3983_v62 = vpop.f32.mrf.mxu0  ;;  %v14559_v19 = vld [vmem:[#allocation72_spill] sm:$0xff] }
 0x281   : > { %v4605_v49 = vadd.f32 %v12819_v39, %v4550_v50  ;;  %v4344_v25 = vpop.f32.mrf.mxu1  ;;  %9889 = vmatmul.mubr.msk.f32.gmra.mxu0 %vm4638_vm2, %v12953_v52  ;;  %9946 = vmatmul.mubr.msk.f32.gmra.mxu1 %vm4638_vm2, %v12953_v52  ;;  %v4142_v11 = vadd.f32 %v3983_v62, %v3228_v34  ;;  %v3230_v55 = vadd.f32 %v12682_v26, %v14557_v56  ;;  %v7833_v26 = vld [vmem:[%s14213_s3 + $0x288] sm:$0xff]  ;;  %v14563_v62 = vld [vmem:[#allocation74_spill] sm:$0xff] }
 0x282   : > { %v4604_v35 = vadd.f32 %v12819_v39, %v4549_v37  ;;  %v4552_v20 = vmax.f32 %v4143_v44, %v4504_v54  ;;  %v4503_v45 = vadd.f32 %v4344_v25, %v3589_v2  ;;  %v9738_v6 = vpop.f32.mrf.mxu0  ;;  %9970 = vmatpush3.msra.mxu0 %v7900_v43  ;;  %10030 = vmatpush3.msra.mxu1 %v7835_v38  ;;  %v14561_v37 = vld [vmem:[#allocation40_spill] sm:$0xff]  ;;  %v14562_v44 = vld [vmem:[#allocation6_spill] sm:$0xff] }
 0x283   : > { %v4660_v18 = vmax.f32 %v4603_v12, %v4605_v49  ;;  %v9818_v29 = vpop.f32.mrf.mxu1  ;;  %v4145_v28 = vadd.f32 %v9738_v6, %v14559_v19  ;;  %9971 = vmatprep.subr.mxu0 %v7899_v13  ;;  %10031 = vmatprep.subr.mxu1 %v7834_v4  ;;  %v3232_v59 = vadd.f32 %v12692_v24, %v14561_v37 }
 0x284   : > { %v4659_v58 = vmax.f32 %v4602_v42, %v4604_v35  ;;  %v4551_v27 = vmax.f32 %v4142_v11, %v4503_v45  ;;  %v4506_v2 = vadd.f32 %v9818_v29, %v14560_v5  ;;  %v3993_v50 = vpop.f32.mrf.mxu0  ;;  %9972 = vmatpush3.msra.mxu0 %v7899_v13  ;;  %10032 = vmatpush3.msra.mxu1 %v7834_v4  ;;  %v14564_v35 = vld [vmem:[#allocation75_spill] sm:$0xff]  ;;  %v7831_v5 = vld [vmem:[%s14213_s3 + $0x278] sm:$0xff] }
 0x285   : > { %v4662_v34 = vmax.f32 %v4660_v18, 0.0  ;;  %v4354_v60 = vpop.f32.mrf.mxu1  ;;  %v4144_v8 = vadd.f32 %v3993_v50, %v3230_v55  ;;  %v3593_v1 = vadd.f32 %v12694_v32, %v14562_v44  ;;  %9973 = vmatprep.subr.mxu0 %v7898_v17  ;;  %10033 = vmatprep.subr.mxu1 %v7833_v26  ;;  %v7897_v32 = vld [vmem:[%s14213_s3 + $0x310] sm:$0xff]  ;;  %v4607_v45 = vadd.f32 %v12819_v39, %v4552_v20  ;;  %v7832_v18 = vld [vmem:[%s14213_s3 + $0x280] sm:$0xff] }
 0x286   : > { %v4661_v36 = vmax.f32 %v4659_v58, 0.0  ;;  %v4505_v43 = vadd.f32 %v4354_v60, %v3591_v47  ;;  %v4554_v54 = vmax.f32 %v4145_v28, %v4506_v2  ;;  %v9741_v38 = vpop.f32.mrf.mxu0  ;;  %v12998_v24 = vld [vmem:[#allocation2 + $0x38] sm:$0xff]  ;;  %v4606_v13 = vadd.f32 %v12819_v39, %v4551_v27  ;;  %9974 = vmatpush3.msra.mxu0 %v7898_v17  ;;  %v14565_v47 = vld [vmem:[#allocation41_spill] sm:$0xff]  ;;  %10034 = vmatpush3.msra.mxu1 %v7833_v26  ;;  %v14566_v2 = vld [vmem:[#allocation43_spill] sm:$0xff] }
 0x287   : > { %4664 = vst.msk [vmem:[#allocation2 + $0x48] sm:$0xff] %vm4638_vm2, %v4662_v34  ;;  %v9821_v12 = vpop.f32.mrf.mxu1  ;;  %v12989_v42 = vld [vmem:[#allocation2 + $0x30] sm:$0xff]  ;;  %v4147_v25 = vadd.f32 %v9741_v38, %v14563_v62  ;;  %v3234_v58 = vadd.f32 %v12702_v23, %v14565_v47  ;;  %9975 = vmatprep.subr.mxu0 %v7897_v32  ;;  %v7896_v34 = vld [vmem:[%s14213_s3 + $0x308] sm:$0xff]  ;;  %v3595_v50 = vadd.f32 %v12704_v61, %v14566_v2  ;;  %v14569_v38 = vld [vmem:[#allocation7_spill] sm:$0xff] }
 0x288   : > { %4663 = vst.msk [vmem:[#allocation2 + $0x40] sm:$0xff] %vm4638_vm2, %v4661_v36  ;;  %v4553_v49 = vmax.f32 %v4144_v8, %v4505_v43  ;;  %v4508_v11 = vadd.f32 %v9821_v12, %v14564_v35  ;;  %9891 = vmatprep.mubr.msk.f32.mxu0 %vm4638_vm2, %v12989_v42  ;;  %9948 = vmatprep.mubr.msk.f32.mxu1 %vm4638_vm2, %v12989_v42  ;;  %v4003_v56 = vpop.f32.mrf.mxu0  ;;  %v14567_v36 = vld [vmem:[#allocation25_spill] sm:$0xff]  ;;  %v14570_v12 = vld [vmem:[#allocation42_spill] sm:$0xff] }
 0x289   : > { %v4609_v4 = vadd.f32 %v12819_v39, %v4554_v54  ;;  %v4364_v55 = vpop.f32.mrf.mxu1  ;;  %9892 = vmatmul.mubr.msk.f32.gmra.mxu0 %vm4638_vm2, %v12998_v24  ;;  %9949 = vmatmul.mubr.msk.f32.gmra.mxu1 %vm4638_vm2, %v12998_v24  ;;  %v4146_v20 = vadd.f32 %v4003_v56, %v3232_v59  ;;  %v14568_v43 = vld [vmem:[#allocation77_spill] sm:$0xff]  ;;  %v3236_v61 = vadd.f32 %v12712_v57, %v14569_v38  ;;  %v14571_v57 = vld [vmem:[#allocation78_spill] sm:$0xff] }
 0x28a   : > { %v4608_v6 = vadd.f32 %v12819_v39, %v4553_v49  ;;  %v4556_v29 = vmax.f32 %v4147_v25, %v4508_v11  ;;  %v4507_v10 = vadd.f32 %v4364_v55, %v3593_v1  ;;  %v9744_v19 = vpop.f32.mrf.mxu0  ;;  %10035 = vmatprep.subr.mxu1 %v7832_v18  ;;  %9976 = vmatpush3.msra.mxu0 %v7897_v32  ;;  %v7830_v32 = vld [vmem:[%s14213_s3 + $0x270] sm:$0xff]  ;;  %v7895_v55 = vld [vmem:[%s14213_s3 + $0x300] sm:$0xff] }
 0x28b   : > { %v4666_v27 = vmax.f32 %v4607_v45, %v4609_v4  ;;  %v9824_v28 = vpop.f32.mrf.mxu1  ;;  %v4149_v23 = vadd.f32 %v9744_v19, %v14567_v36  ;;  %10036 = vmatpush3.msra.mxu1 %v7832_v18  ;;  %9977 = vmatprep.subr.mxu0 %v7896_v34  ;;  %v3597_v49 = vadd.f32 %v12714_v63, %v14570_v12  ;;  %v14572_v63 = vld [vmem:[#allocation27_spill] sm:$0xff]  ;;  %v14574_v2 = vld [vmem:[#allocation45_spill] sm:$0xff] }
 0x28c   : > { %v4665_v17 = vmax.f32 %v4606_v13, %v4608_v6  ;;  %v4555_v60 = vmax.f32 %v4146_v20, %v4507_v10  ;;  %v4510_v26 = vadd.f32 %v9824_v28, %v14568_v43  ;;  %v4013_v37 = vpop.f32.mrf.mxu0  ;;  %10037 = vmatprep.subr.mxu1 %v7831_v5  ;;  %9978 = vmatpush3.msra.mxu0 %v7896_v34  ;;  %v7894_v34 = vld [vmem:[%s14213_s3 + $0x2f8] sm:$0xff]  ;;  %v14576_v43 = vld [vmem:[#allocation8_spill] sm:$0xff]  ;;  %v14578_v38 = vld [vmem:[#allocation69_spill] sm:$0xff] }
 0x28d   : > { %v4668_v8 = vmax.f32 %v4666_v27, 0.0  ;;  %v4374_v59 = vpop.f32.mrf.mxu1  ;;  %v4148_v1 = vadd.f32 %v4013_v37, %v3234_v58  ;;  %10038 = vmatpush3.msra.mxu1 %v7831_v5  ;;  %v4611_v18 = vadd.f32 %v12819_v39, %v4556_v29  ;;  %v7829_v29 = vld [vmem:[%s14213_s3 + $0x268] sm:$0xff]  ;;  %9979 = vmatprep.subr.mxu0 %v7895_v55 }
 0x28e   : > { %v4667_v44 = vmax.f32 %v4665_v17, 0.0  ;;  %v4509_v54 = vadd.f32 %v4374_v59, %v3595_v50  ;;  %v4558_v62 = vmax.f32 %v4149_v23, %v4510_v26  ;;  %v9747_v25 = vpop.f32.mrf.mxu0  ;;  %v13047_v56 = vld [vmem:[#allocation2 + $0x48] sm:$0xff]  ;;  %v4610_v6 = vadd.f32 %v12819_v39, %v4555_v60  ;;  %10039 = vmatprep.subr.mxu1 %v7830_v32  ;;  %9980 = vmatpush3.msra.mxu0 %v7895_v55 }
 0x28f   : > { %4670 = vst.msk [vmem:[#allocation2 + $0x58] sm:$0xff] %vm4638_vm2, %v4668_v8  ;;  %v9827_v35 = vpop.f32.mrf.mxu1  ;;  %v13031_v11 = vld [vmem:[#allocation2 + $0x40] sm:$0xff]  ;;  %v13038_v13 = vadd.f32 %v9747_v25, %v14571_v57  ;;  %v14573_v5 = vld [vmem:[#allocation20_spill] sm:$0xff]  ;;  %10040 = vmatpush3.msra.mxu1 %v7830_v32  ;;  %v3599_v26 = vadd.f32 %v12724_v15, %v14576_v43  ;;  %9981 = vmatprep.subr.mxu0 %v7894_v34 }
 0x290   : > { %4669 = vst.msk [vmem:[#allocation2 + $0x50] sm:$0xff] %vm4638_vm2, %v4667_v44  ;;  %v4557_v45 = vmax.f32 %v4148_v1, %v4509_v54  ;;  %v13041_v4 = vadd.f32 %v9827_v35, %v14572_v63  ;;  %9894 = vmatprep.mubr.msk.f32.mxu0 %vm4638_vm2, %v13031_v11  ;;  %9951 = vmatprep.mubr.msk.f32.mxu1 %vm4638_vm2, %v13031_v11  ;;  %v4023_v10 = vpop.f32.mrf.mxu0  ;;  %v14575_v17 = vld [vmem:[#allocation44_spill] sm:$0xff]  ;;  %v7828_v54 = vld [vmem:[%s14213_s3 + $0x260] sm:$0xff]  ;;  %v14582_v35 = vld [vmem:[#allocation29_spill] sm:$0xff] }
 0x291   : > { %v4613_v20 = vadd.f32 %v12819_v39, %v4558_v62  ;;  %v4384_v47 = vpop.f32.mrf.mxu1  ;;  %9895 = vmatmul.mubr.msk.f32.gmra.mxu0 %vm4638_vm2, %v13047_v56  ;;  %9952 = vmatmul.mubr.msk.f32.gmra.mxu1 %vm4638_vm2, %v13047_v56  ;;  %v4150_v19 = vadd.f32 %v4023_v10, %v3236_v61  ;;  %v2326_v50 = vadd.f32 %v14574_v2, %v14573_v5  ;;  %v14577_v44 = vld [vmem:[#allocation80_spill] sm:$0xff]  ;;  %v14579_v61 = vld [vmem:[#allocation47_spill] sm:$0xff]  ;;  %v14581_v62 = vld [vmem:[#allocation9_spill] sm:$0xff] }
 0x292   : > { %v4612_v58 = vadd.f32 %v12819_v39, %v4557_v45  ;;  %v4560_v27 = vmax.f32 %v13038_v13, %v13041_v4  ;;  %v4511_v28 = vadd.f32 %v4384_v47, %v3597_v49  ;;  %v3238_v60 = vadd.f32 %v12722_v0, %v14575_v17  ;;  %v9750_v23 = vpop.f32.mrf.mxu0  ;;  %v7893_v0 = vld [vmem:[%s14213_s3 + $0x2f0] sm:$0xff]  ;;  %v14580_v49 = vld [vmem:[#allocation22_spill] sm:$0xff]  ;;  %10041 = vmatprep.subr.mxu1 %v7829_v29  ;;  %v7892_v43 = vld [vmem:[%s14213_s3 + $0x2e8] sm:$0xff] }
 0x293   : > { %v4672_v36 = vmax.f32 %v4611_v18, %v4613_v20  ;;  %v9830_v8 = vpop.f32.mrf.mxu1  ;;  %v4153_v1 = vadd.f32 %v9750_v23, %v14577_v44  ;;  %v2687_v12 = vadd.f32 %v14579_v61, %v14578_v38  ;;  %v2328_v25 = vadd.f32 %v14581_v62, %v14580_v49  ;;  %v14583_v13 = vld [vmem:[#allocation73_spill] sm:$0xff]  ;;  %v14584_v63 = vld [vmem:[#allocation46_spill] sm:$0xff]  ;;  %10042 = vmatpush3.msra.mxu1 %v7829_v29  ;;  %v14586_v29 = vld [vmem:[#allocation31_spill] sm:$0xff] }
 0x294   : > { %v4671_v37 = vmax.f32 %v4610_v6, %v4612_v58  ;;  %v4559_v59 = vmax.f32 %v4150_v19, %v4511_v28  ;;  %v4514_v32 = vadd.f32 %v9830_v8, %v14582_v35  ;;  %v4033_v45 = vpop.f32.mrf.mxu0  ;;  %v2689_v4 = vadd.f32 %v14584_v63, %v14583_v13  ;;  %9982 = vmatpush3.msra.mxu0 %v7894_v34  ;;  %v14585_v2 = vld [vmem:[#allocation82_spill] sm:$0xff]  ;;  %v14587_v35 = vld [vmem:[#allocation33_spill] sm:$0xff] }
 0x295   : > { %v4674_v15 = vmax.f32 %v4672_v36, 0.0  ;;  %v4394_v57 = vpop.f32.mrf.mxu1  ;;  %v4152_v18 = vadd.f32 %v4033_v45, %v3238_v60  ;;  %v3240_v20 = vadd.f32 %v12732_v16, %v2326_v50  ;;  %v3601_v10 = vadd.f32 %v12734_v9, %v2687_v12  ;;  %10043 = vmatprep.subr.mxu1 %v7828_v54  ;;  %9983 = vmatprep.subr.mxu0 %v7893_v0  ;;  %v7827_v16 = vld [vmem:[%s14213_s3 + $0x258] sm:$0xff]  ;;  %v7891_v12 = vld [vmem:[%s14213_s3 + $0x2e0] sm:$0xff]  ;;  %v14590_v45 = vld [vmem:[#allocation76_spill] sm:$0xff] }
 0x296   : > { %v4673_v55 = vmax.f32 %v4671_v37, 0.0  ;;  %v4513_v6 = vadd.f32 %v4394_v57, %v3599_v26  ;;  %v4562_v47 = vmax.f32 %v4153_v1, %v4514_v32  ;;  %v9753_v58 = vpop.f32.mrf.mxu0  ;;  %v13104_v9 = vld [vmem:[#allocation2 + $0x58] sm:$0xff]  ;;  %v4615_v50 = vadd.f32 %v12819_v39, %v4560_v27  ;;  %10044 = vmatpush3.msra.mxu1 %v7828_v54  ;;  %9984 = vmatpush3.msra.mxu0 %v7893_v0  ;;  %v14589_v32 = vld [vmem:[#allocation48_spill] sm:$0xff] }
 0x297   : > { %4676 = vst.msk [vmem:[#allocation2 + $0x68] sm:$0xff] %vm4638_vm2, %v4674_v15  ;;  %v9833_v19 = vpop.f32.mrf.mxu1  ;;  %v13091_v28 = vld [vmem:[#allocation2 + $0x50] sm:$0xff]  ;;  %v13095_v17 = vadd.f32 %v9753_v58, %v14585_v2  ;;  %v4614_v60 = vadd.f32 %v12819_v39, %v4559_v59  ;;  %v3242_v44 = vadd.f32 %v12742_v22, %v2328_v25  ;;  %10045 = vmatprep.subr.mxu1 %v7827_v16  ;;  %v13129_v49 = vld [vmem:[%s14213_s3 + $0x3b8] sm:$0xff]  ;;  %v14588_v25 = vld [vmem:[#allocation24_spill] sm:$0xff] }
 0x298   : > { %4675 = vst.msk [vmem:[#allocation2 + $0x60] sm:$0xff] %vm4638_vm2, %v4673_v55  ;;  %v4561_v5 = vmax.f32 %v4152_v18, %v4513_v6  ;;  %v13098_v34 = vadd.f32 %v9833_v19, %v14586_v29  ;;  %9897 = vmatprep.mubr.msk.f32.mxu0 %vm4638_vm2, %v13091_v28  ;;  %9954 = vmatprep.mubr.msk.f32.mxu1 %vm4638_vm2, %v13091_v28  ;;  %v4043_v23 = vpop.f32.mrf.mxu0  ;;  %v14591_v57 = vld [vmem:[#allocation10_spill] sm:$0xff]  ;;  %v14592_v55 = vld [vmem:[#allocation100_spill] sm:$0xff]  ;;  %v14596_v2 = vld [vmem:[#allocation51_spill] sm:$0xff] }
 0x299   : > { %v4617_v36 = vadd.f32 %v12819_v39, %v4562_v47  ;;  %v4404_v8 = vpop.f32.mrf.mxu1  ;;  %9898 = vmatmul.mubr.msk.f32.gmra.mxu0 %vm4638_vm2, %v13104_v9  ;;  %9955 = vmatmul.mubr.msk.f32.gmra.mxu1 %vm4638_vm2, %v13104_v9  ;;  %v4154_v37 = vadd.f32 %v4043_v23, %v3240_v20  ;;  %v3603_v62 = vadd.f32 %v12744_v40, %v2689_v4  ;;  %v14594_v40 = vld [vmem:[#allocation49_spill] sm:$0xff]  ;;  %v7890_v23 = vld [vmem:[%s14213_s3 + $0x2d8] sm:$0xff] }
 0x29a   : > { %v4616_v26 = vadd.f32 %v12819_v39, %v4561_v5  ;;  %v4564_v27 = vmax.f32 %v13095_v17, %v13098_v34  ;;  %v4515_v59 = vadd.f32 %v4404_v8, %v3601_v10  ;;  %v9756_v38 = vpop.f32.mrf.mxu0  ;;  %9985 = vmatprep.subr.mxu0 %v7892_v43  ;;  %v2330_v0 = vadd.f32 %v14589_v32, %v14588_v25  ;;  %v14593_v10 = vld [vmem:[#allocation26_spill] sm:$0xff]  ;;  %v14595_v5 = vld [vmem:[#allocation79_spill] sm:$0xff] }
 0x29b   : > { %v4678_v1 = vmax.f32 %v4615_v50, %v4617_v36  ;;  %v9836_v61 = vpop.f32.mrf.mxu1  ;;  %v4157_v22 = vadd.f32 %v9756_v38, %v14587_v35  ;;  %v2691_v13 = vadd.f32 %v14591_v57, %v14590_v45  ;;  %10046 = vmatpush3.msra.mxu1 %v7827_v16  ;;  %9986 = vmatpush3.msra.mxu0 %v7892_v43  ;;  %v14597_v43 = vld [vmem:[#allocation101_spill] sm:$0xff] }
 0x29c   : > { %v4677_v15 = vmax.f32 %v4614_v60, %v4616_v26  ;;  %v4563_v54 = vmax.f32 %v4154_v37, %v4515_v59  ;;  %v4518_v18 = vadd.f32 %v9836_v61, %v14592_v55  ;;  %v4053_v6 = vpop.f32.mrf.mxu0  ;;  %v2332_v4 = vadd.f32 %v14594_v40, %v14593_v10  ;;  %9987 = vmatprep.subr.mxu0 %v7891_v12  ;;  %v14603_v10 = vld [vmem:[#allocation50_spill] sm:$0xff] }
 0x29d   : > { %v4680_v63 = vmax.f32 %v4678_v1, 0.0  ;;  %v4414_v20 = vpop.f32.mrf.mxu1  ;;  %v4156_v58 = vadd.f32 %v4053_v6, %v3242_v44  ;;  %10125 = vmatprep.subr.mxu1 %v13129_v49  ;;  %v2693_v17 = vadd.f32 %v14596_v2, %v14595_v5  ;;  %v3244_v29 = vadd.f32 %v12752_v30, %v2330_v0  ;;  %9988 = vmatpush3.msra.mxu0 %v7891_v12  ;;  %v14598_v30 = vld [vmem:[#allocation102_spill] sm:$0xff]  ;;  %v7889_v12 = vld [vmem:[%s14213_s3 + $0x2d0] sm:$0xff]  ;;  %v13175_v0 = vld [vmem:[%s14213_s3 + $0x160] sm:$0xff] }
 0x29e   : > { %v4679_v47 = vmax.f32 %v4677_v15, 0.0  ;;  %v4517_v19 = vadd.f32 %v4414_v20, %v3603_v62  ;;  %v3605_v34 = vadd.f32 %v12754_v14, %v2691_v13  ;;  %v4566_v16 = vmax.f32 %v4157_v22, %v4518_v18  ;;  %v9759_v50 = vpop.f32.mrf.mxu0  ;;  %v13158_v14 = vld [vmem:[#allocation2 + $0x68] sm:$0xff]  ;;  %9989 = vmatprep.subr.mxu0 %v7890_v23  ;;  %v14601_v6 = vld [vmem:[#allocation11_spill] sm:$0xff]  ;;  %v14605_v2 = vld [vmem:[#allocation30_spill] sm:$0xff] }
 0x29f   : > { %4682 = vst.msk [vmem:[#allocation2 + $0x78] sm:$0xff] %vm4638_vm2, %v4680_v63  ;;  %v9839_v60 = vpop.f32.mrf.mxu1  ;;  %v13146_v36 = vld [vmem:[#allocation2 + $0x60] sm:$0xff]  ;;  %v4159_v26 = vadd.f32 %v9759_v50, %v14597_v43  ;;  %v4619_v59 = vadd.f32 %v12819_v39, %v4564_v27  ;;  %v4618_v44 = vadd.f32 %v12819_v39, %v4563_v54  ;;  %v3246_v54 = vadd.f32 %v12762_v3, %v2332_v4  ;;  %v14600_v18 = vld [vmem:[#allocation28_spill] sm:$0xff]  ;;  %v14602_v3 = vld [vmem:[#allocation81_spill] sm:$0xff] }
 0x2a0   : > { %4681 = vst.msk [vmem:[#allocation2 + $0x70] sm:$0xff] %vm4638_vm2, %v4679_v47  ;;  %v4565_v8 = vmax.f32 %v4156_v58, %v4517_v19  ;;  %v4520_v37 = vadd.f32 %v9839_v60, %v14598_v30  ;;  %9900 = vmatprep.mubr.msk.f32.mxu0 %vm4638_vm2, %v13146_v36  ;;  %9957 = vmatprep.mubr.msk.f32.mxu1 %vm4638_vm2, %v13146_v36  ;;  %v4063_v38 = vpop.f32.mrf.mxu0  ;;  %v14599_v63 = vld [vmem:[#allocation103_spill] sm:$0xff]  ;;  %v14604_v47 = vld [vmem:[#allocation104_spill] sm:$0xff] }
 0x2a1   : > { %v4621_v1 = vadd.f32 %v12819_v39, %v4566_v16  ;;  %v4424_v61 = vpop.f32.mrf.mxu1  ;;  %9901 = vmatmul.mubr.msk.f32.gmra.mxu0 %vm4638_vm2, %v13158_v14  ;;  %9958 = vmatmul.mubr.msk.f32.gmra.mxu1 %vm4638_vm2, %v13158_v14  ;;  %v4158_v27 = vadd.f32 %v4063_v38, %v3244_v29  ;;  %v3607_v45 = vadd.f32 %v12764_v21, %v2693_v17  ;;  %v14606_v29 = vld [vmem:[#allocation52_spill] sm:$0xff]  ;;  %v14607_v50 = vld [vmem:[#allocation83_spill] sm:$0xff] }
 0x2a2   : > { %v4620_v62 = vadd.f32 %v12819_v39, %v4565_v8  ;;  %v4568_v15 = vmax.f32 %v4159_v26, %v4520_v37  ;;  %v4519_v35 = vadd.f32 %v4424_v61, %v3605_v34  ;;  %v9762_v25 = vpop.f32.mrf.mxu0  ;;  %9990 = vmatpush3.msra.mxu0 %v7890_v23  ;;  %v2334_v20 = vadd.f32 %v14601_v6, %v14600_v18  ;;  %v14608_v60 = vld [vmem:[#allocation12_spill] sm:$0xff]  ;;  %v14610_v61 = vld [vmem:[#allocation106_spill] sm:$0xff] }
 0x2a3   : > { %v4684_v22 = vmax.f32 %v4619_v59, %v4621_v1  ;;  %v9842_v32 = vpop.f32.mrf.mxu1  ;;  %v4161_v55 = vadd.f32 %v9762_v25, %v14599_v63  ;;  %9991 = vmatprep.subr.mxu0 %v7889_v12  ;;  %v2695_v40 = vadd.f32 %v14603_v10, %v14602_v3  ;;  %v2336_v21 = vadd.f32 %v14606_v29, %v14605_v2  ;;  %v14609_v1 = vld [vmem:[#allocation105_spill] sm:$0xff]  ;;  %v14612_v3 = vld [vmem:[#allocation107_spill] sm:$0xff] }
 0x2a4   : > { %v4683_v57 = vmax.f32 %v4618_v44, %v4620_v62  ;;  %v4567_v13 = vmax.f32 %v4158_v27, %v4519_v35  ;;  %v4522_v58 = vadd.f32 %v9842_v32, %v14604_v47  ;;  %v4073_v19 = vpop.f32.mrf.mxu0  ;;  %9992 = vmatpush3.msra.mxu0 %v7889_v12  ;;  %v2697_v23 = vadd.f32 %v14608_v60, %v14607_v50 }
 0x2a5   : > { %v4686_v4 = vmax.f32 %v4684_v22, 0.0  ;;  %v4434_v5 = vpop.f32.mrf.mxu1  ;;  %v4160_v34 = vadd.f32 %v4073_v19, %v3246_v54  ;;  %10071 = vmatprep.subr.mxu0 %v13175_v0  ;;  %v3248_v8 = vadd.f32 %v12772_v31, %v2334_v20  ;;  %v3609_v43 = vadd.f32 %v12774_v46, %v2695_v40  ;;  %v14613_v40 = vld [vmem:[#allocation32_spill] sm:$0xff] }
 0x2a6   : > { %v4685_v17 = vmax.f32 %v4683_v57, 0.0  ;;  %v4521_v16 = vadd.f32 %v4434_v5, %v3607_v45  ;;  %v4570_v26 = vmax.f32 %v4161_v55, %v4522_v58  ;;  %v9765_v30 = vpop.f32.mrf.mxu0  ;;  %v13201_v46 = vld [vmem:[#allocation2 + $0x78] sm:$0xff]  ;;  %v4623_v31 = vadd.f32 %v12819_v39, %v4568_v15  ;;  %v14611_v55 = vld [vmem:[#allocation109_spill] sm:$0xff]  ;;  %v14615_v58 = vld [vmem:[#allocation84_spill] sm:$0xff] }
 0x2a7   : > { %4688 = vst.msk [vmem:[#allocation2 + $0x88] sm:$0xff] %vm4638_vm2, %v4686_v4  ;;  %v9845_v37 = vpop.f32.mrf.mxu1  ;;  %v13192_v59 = vld [vmem:[#allocation2 + $0x70] sm:$0xff]  ;;  %v4163_v38 = vadd.f32 %v9765_v30, %v14609_v1  ;;  %v4622_v62 = vadd.f32 %v12819_v39, %v4567_v13  ;;  %v3250_v15 = vadd.f32 %v12782_v53, %v2336_v21  ;;  %v3611_v18 = vadd.f32 %v14611_v55, %v2697_v23  ;;  %v14617_v5 = vld [vmem:[#allocation108_spill] sm:$0xff] }
 0x2a8   : > { %4687 = vst.msk [vmem:[#allocation2 + $0x80] sm:$0xff] %vm4638_vm2, %v4685_v17  ;;  %v4569_v44 = vmax.f32 %v4160_v34, %v4521_v16  ;;  %v4524_v12 = vadd.f32 %v9845_v37, %v14610_v61  ;;  %9903 = vmatprep.mubr.msk.f32.mxu0 %vm4638_vm2, %v13192_v59  ;;  %9960 = vmatprep.mubr.msk.f32.mxu1 %vm4638_vm2, %v13192_v59  ;;  %v4083_v35 = vpop.f32.mrf.mxu0  ;;  %v14614_v4 = vld [vmem:[#allocation53_spill] sm:$0xff]  ;;  %v14618_v17 = vld [vmem:[#allocation34_spill] sm:$0xff]  ;;  %v14622_v30 = vld [vmem:[#allocation112_spill] sm:$0xff] }
 0x2a9   : > { %v4625_v27 = vadd.f32 %v12819_v39, %v4570_v26  ;;  %v4444_v54 = vpop.f32.mrf.mxu1  ;;  %9904 = vmatmul.mubr.msk.f32.gmra.mxu0 %vm4638_vm2, %v13201_v46  ;;  %9961 = vmatmul.mubr.msk.f32.gmra.mxu1 %vm4638_vm2, %v13201_v46  ;;  %v4162_v32 = vadd.f32 %v4083_v35, %v3248_v8  ;;  %v2338_v47 = vadd.f32 %v14614_v4, %v14613_v40  ;;  %v14619_v34 = vld [vmem:[#allocation13_spill] sm:$0xff]  ;;  %v7978_v4 = vld [vmem:[%s14213_s3 + $0x3a0] sm:$0xff] }
 0x2aa   : > { %v4624_v22 = vadd.f32 %v12819_v39, %v4569_v44  ;;  %v4572_v25 = vmax.f32 %v4163_v38, %v4524_v12  ;;  %v4523_v45 = vadd.f32 %v4444_v54, %v3609_v43  ;;  %10047 = vmatprep.mubr.msk.f32.mxu1 %vm4638_vm2, %v12860_v33  ;;  %v9768_v13 = vpop.f32.mrf.mxu0  ;;  %v7980_v39 = vld [vmem:[%s14213_s3 + $0x3b0] sm:$0xff]  ;;  %v14616_v33 = vld [vmem:[#allocation55_spill] sm:$0xff]  ;;  %v2340_v16 = vadd.f32 %v14619_v34, %v14618_v17  ;;  %v14621_v43 = vld [vmem:[#allocation54_spill] sm:$0xff] }
 0x2ab   : > { %v4690_v57 = vmax.f32 %v4623_v31, %v4625_v27  ;;  %v9848_v63 = vpop.f32.mrf.mxu1  ;;  %v4165_v10 = vadd.f32 %v9768_v13, %v14612_v3  ;;  %v2699_v19 = vadd.f32 %v14616_v33, %v14615_v58  ;;  %v14620_v8 = vld [vmem:[#allocation85_spill] sm:$0xff]  ;;  %v3252_v37 = vadd.f32 %v14622_v30, %v2338_v47  ;;  %v14625_v27 = vld [vmem:[#allocation111_spill] sm:$0xff]  ;;  %v7949_v34 = vld [vmem:[%s14213_s3 + $0x158] sm:$0xff] }
 0x2ac   : > { %v4689_v6 = vmax.f32 %v4622_v62, %v4624_v22  ;;  %v4571_v20 = vmax.f32 %v4162_v32, %v4523_v45  ;;  %v4526_v2 = vadd.f32 %v9848_v63, %v14617_v5  ;;  %v4093_v29 = vpop.f32.mrf.mxu0  ;;  %v2701_v26 = vadd.f32 %v14621_v43, %v14620_v8  ;;  %v14623_v44 = vld [vmem:[#allocation113_spill] sm:$0xff]  ;;  %v14624_v62 = vld [vmem:[#allocation110_spill] sm:$0xff]  ;;  %v7979_v22 = vld [vmem:[%s14213_s3 + $0x3a8] sm:$0xff] }
 0x2ad   : > { %v4692_v53 = vmax.f32 %v4690_v57, 0.0  ;;  %v4454_v21 = vpop.f32.mrf.mxu1  ;;  %10048 = vmatmul.mubr.msk.f32.vlgmr.msra.gmra.mxu1 %vm4638_vm2, %v12869_v7  ;;  %v4164_v60 = vadd.f32 %v4093_v29, %v3250_v15  ;;  %v3613_v1 = vadd.f32 %v14623_v44, %v2699_v19  ;;  %v10520_v32 = vld [vmem:[%s14212_s2] ss:$0 sm:$0xff]  ;;  %v14627_v47 = vld [vmem:[#allocation117_spill] sm:$0xff] }
 0x2ae   : > { %v4691_v50 = vmax.f32 %v4689_v6, 0.0  ;;  %v4525_v23 = vadd.f32 %v4454_v21, %v3611_v18  ;;  %10050 = vmatprep.mubr.msk.f32.mxu1 %vm4638_vm2, %v12898_v48  ;;  %10126 = vmatpush3.msra.mxu1 %v13129_v49  ;;  %v4574_v7 = vmax.f32 %v4165_v10, %v4526_v2  ;;  %v9771_v38 = vpop.f32.mrf.mxu0  ;;  %v13243_v54 = vld [vmem:[#allocation2 + $0x88] sm:$0xff]  ;;  %v4627_v45 = vadd.f32 %v10520_v32, %v4572_v25  ;;  %v14629_v2 = vld [vmem:[#allocation115_spill] sm:$0xff]  ;;  %v7976_v30 = vld [vmem:[%s14213_s3 + $0x390] sm:$0xff] }
 0x2af   : > { %4694 = vst.msk [vmem:[#allocation2 + $0x98] sm:$0xff] %vm4638_vm2, %v4692_v53  ;;  %v9851_v61 = vpop.f32.mrf.mxu1  ;;  %v13236_v12 = vld [vmem:[#allocation2 + $0x80] sm:$0xff]  ;;  %10127 = vmatprep.subr.mxu1 %v7980_v39  ;;  %v4167_v49 = vadd.f32 %v9771_v38, %v14624_v62  ;;  %v4626_v15 = vadd.f32 %v10520_v32, %v4571_v20  ;;  %v14626_v10 = vld [vmem:[#allocation116_spill] sm:$0xff]  ;;  %v3615_v58 = vadd.f32 %v14627_v47, %v2701_v26  ;;  %v14628_v53 = vld [vmem:[#allocation114_spill] sm:$0xff] }
 0x2b0   : > { %4693 = vst.msk [vmem:[#allocation2 + $0x90] sm:$0xff] %vm4638_vm2, %v4691_v50  ;;  %v4573_v31 = vmax.f32 %v4164_v60, %v4525_v23  ;;  %v4528_v35 = vadd.f32 %v9851_v61, %v14625_v27  ;;  %9906 = vmatprep.mubr.msk.f32.mxu0 %vm4638_vm2, %v13236_v12  ;;  %10128 = vmatpush3.msra.mxu1 %v7980_v39  ;;  %v4103_v13 = vpop.f32.mrf.mxu0  ;;  %v7977_v23 = vld [vmem:[%s14213_s3 + $0x398] sm:$0xff]  ;;  %v7975_v61 = vld [vmem:[%s14213_s3 + $0x388] sm:$0xff]  ;;  %v7974_v27 = vld [vmem:[%s14213_s3 + $0x380] sm:$0xff] }
 0x2b1   : > { %v4629_v57 = vadd.f32 %v10520_v32, %v4574_v7  ;;  %v4464_v63 = vpop.f32.mrf.mxu1  ;;  %9907 = vmatmul.mubr.msk.f32.gmra.mxu0 %vm4638_vm2, %v13243_v54  ;;  %10051 = vmatmul.mubr.msk.f32.gmra.mxu1 %vm4638_vm2, %v12907_v51  ;;  %v4166_v6 = vadd.f32 %v4103_v13, %v3252_v37  ;;  %v3254_v39 = vadd.f32 %v14626_v10, %v2340_v16  ;;  %v7947_v7 = vld [vmem:[%s14213_s3 + $0x148] sm:$0xff]  ;;  %v7970_v13 = vld [vmem:[%s14213_s3 + $0x360] sm:$0xff]  ;;  %v7936_v47 = vld [vmem:[%s14213_s3 + $0xf0] sm:$0xff] }
 0x2b2   : > { %v4628_v55 = vadd.f32 %v10520_v32, %v4573_v31  ;;  %v4576_v18 = vmax.f32 %v4167_v49, %v4528_v35  ;;  %v4527_v3 = vadd.f32 %v4464_v63, %v3613_v1  ;;  %9993 = vmatprep.mubr.msk.f32.mxu0 %vm4638_vm2, %v12898_v48  ;;  %10053 = vmatprep.mubr.msk.f32.mxu1 %vm4638_vm2, %v12941_v41  ;;  %v9774_v20 = vpop.f32.mrf.mxu0  ;;  %v7946_v49 = vld [vmem:[%s14213_s3 + $0x140] sm:$0xff]  ;;  %v7945_v35 = vld [vmem:[%s14213_s3 + $0x138] sm:$0xff]  ;;  %v7967_v10 = vld [vmem:[%s14213_s3 + $0x348] sm:$0xff] }
 0x2b3   : > { %v4696_v25 = vmax.f32 %v4627_v45, %v4629_v57  ;;  %v9854_v40 = vpop.f32.mrf.mxu1  ;;  %10129 = vmatprep.subr.mxu1 %v7979_v22  ;;  %v4169_v5 = vadd.f32 %v9774_v20, %v14628_v53  ;;  %v7972_v45 = vld [vmem:[%s14213_s3 + $0x370] sm:$0xff]  ;;  %v7971_v57 = vld [vmem:[%s14213_s3 + $0x368] sm:$0xff]  ;;  %v7942_v63 = vld [vmem:[%s14213_s3 + $0x120] sm:$0xff] }
 0x2b4   : > { %v4695_v33 = vmax.f32 %v4626_v15, %v4628_v55  ;;  %v4575_v19 = vmax.f32 %v4166_v6, %v4527_v3  ;;  %10130 = vmatpush3.msra.mxu1 %v7979_v22  ;;  %v4530_v29 = vadd.f32 %v9854_v40, %v14629_v2  ;;  %v4113_v21 = vpop.f32.mrf.mxu0  ;;  %v4631_v43 = vadd.f32 %v10520_v32, %v4576_v18  ;;  %v7973_v22 = vld [vmem:[%s14213_s3 + $0x378] sm:$0xff]  ;;  %v7943_v15 = vld [vmem:[%s14213_s3 + $0x128] sm:$0xff]  ;;  %v7968_v6 = vld [vmem:[%s14213_s3 + $0x350] sm:$0xff] }
 0x2b5   : > { %v4698_v48 = vmax.f32 %v4696_v25, 0.0  ;;  %v4474_v17 = vpop.f32.mrf.mxu1  ;;  %9994 = vmatmul.mubr.msk.f32.vlgmr.msra.gmra.mxu0 %vm4638_vm2, %v12907_v51  ;;  %10054 = vmatmul.mubr.msk.f32.gmra.mxu1 %vm4638_vm2, %v12953_v52  ;;  %v4168_v50 = vadd.f32 %v4113_v21, %v3254_v39  ;;  %v7969_v55 = vld [vmem:[%s14213_s3 + $0x358] sm:$0xff]  ;;  %v7940_v3 = vld [vmem:[%s14213_s3 + $0x110] sm:$0xff]  ;;  %v7939_v39 = vld [vmem:[%s14213_s3 + $0x108] sm:$0xff] }
 0x2b6   : > { %v4697_v16 = vmax.f32 %v4695_v33, 0.0  ;;  %v4529_v60 = vadd.f32 %v4474_v17, %v3615_v58  ;;  %10072 = vmatpush3.msra.mxu0 %v13175_v0  ;;  %10131 = vmatprep.subr.mxu1 %v7978_v4  ;;  %v4578_v51 = vmax.f32 %v4169_v5, %v4530_v29  ;;  %v7948_v0 = vld [vmem:[%s14213_s3 + $0x150] sm:$0xff]  ;;  %v4630_v37 = vadd.f32 %v10520_v32, %v4575_v19  ;;  %v7941_v18 = vld [vmem:[%s14213_s3 + $0x118] sm:$0xff]  ;;  %v7938_v25 = vld [vmem:[%s14213_s3 + $0x100] sm:$0xff] }
 0x2b7   : > { %4700 = vst.msk [vmem:[#allocation2 + $0xa8] sm:$0xff] %vm4638_vm2, %v4698_v48  ;;  %9996 = vmatprep.mubr.msk.f32.mxu0 %vm4638_vm2, %v12941_v41  ;;  %10056 = vmatprep.mubr.msk.f32.mxu1 %vm4638_vm2, %v12989_v42  ;;  %v8043_v20 = vld [vmem:[%s14213_s3 + $0x430] sm:$0xff]  ;;  %v7937_v40 = vld [vmem:[%s14213_s3 + $0xf8] sm:$0xff]  ;;  %v8041_v58 = vld [vmem:[%s14213_s3 + $0x420] sm:$0xff] }
 0x2b8   : > { %4699 = vst.msk [vmem:[#allocation2 + $0xa0] sm:$0xff] %vm4638_vm2, %v4697_v16  ;;  %v4577_v8 = vmax.f32 %v4168_v50, %v4529_v60  ;;  %10132 = vmatpush3.msra.mxu1 %v7978_v4  ;;  %10073 = vmatprep.subr.mxu0 %v7949_v34  ;;  %v4633_v26 = vadd.f32 %v10520_v32, %v4578_v51  ;;  %v8042_v4 = vld [vmem:[%s14213_s3 + $0x428] sm:$0xff]  ;;  %v8012_v33 = vld [vmem:[%s14213_s3 + $0x1d8] sm:$0xff]  ;;  %v8039_v53 = vld [vmem:[%s14213_s3 + $0x410] sm:$0xff] }
 0x2b9   : > { %10133 = vmatprep.subr.mxu1 %v7977_v23  ;;  %10074 = vmatpush3.msra.mxu0 %v7949_v34  ;;  %v8040_v19 = vld [vmem:[%s14213_s3 + $0x418] sm:$0xff]  ;;  %v8038_v5 = vld [vmem:[%s14213_s3 + $0x408] sm:$0xff]  ;;  %v8037_v48 = vld [vmem:[%s14213_s3 + $0x400] sm:$0xff] }
 0x2ba   : > { %v4632_v44 = vadd.f32 %v10520_v32, %v4577_v8  ;;  %10134 = vmatpush3.msra.mxu1 %v7977_v23  ;;  %9997 = vmatmul.mubr.msk.f32.gmra.mxu0 %vm4638_vm2, %v12953_v52  ;;  %v4702_v1 = vmax.f32 %v4631_v43, %v4633_v26  ;;  %v7944_v32 = vld [vmem:[%s14213_s3 + $0x130] sm:$0xff]  ;;  %v8034_v21 = vld [vmem:[%s14213_s3 + $0x3e8] sm:$0xff]  ;;  %v8005_v17 = vld [vmem:[%s14213_s3 + $0x1a0] sm:$0xff] }
 0x2bb   : > { %10057 = vmatmul.mubr.msk.f32.gmra.mxu1 %vm4638_vm2, %v12998_v24  ;;  %10075 = vmatprep.subr.mxu0 %v7948_v0  ;;  %v8007_v2 = vld [vmem:[%s14213_s3 + $0x1b0] sm:$0xff]  ;;  %v8033_v34 = vld [vmem:[%s14213_s3 + $0x3e0] sm:$0xff]  ;;  %v8032_v16 = vld [vmem:[%s14213_s3 + $0x3d8] sm:$0xff] }
 0x2bc   : > { %v4701_v38 = vmax.f32 %v4630_v37, %v4632_v44  ;;  %10135 = vmatprep.subr.mxu1 %v7976_v30  ;;  %9999 = vmatprep.mubr.msk.f32.mxu0 %vm4638_vm2, %v12989_v42  ;;  %v4704_v31 = vmax.f32 %v4702_v1, 0.0  ;;  %v8035_v29 = vld [vmem:[%s14213_s3 + $0x3f0] sm:$0xff]  ;;  %v8004_v50 = vld [vmem:[%s14213_s3 + $0x198] sm:$0xff]  ;;  %v8030_v8 = vld [vmem:[%s14213_s3 + $0x3c8] sm:$0xff] }
 0x2bd   : > { %10059 = vmatprep.mubr.msk.f32.mxu1 %vm4638_vm2, %v13031_v11  ;;  %10076 = vmatpush3.msra.mxu0 %v7948_v0  ;;  %v13509_v60 = vld [vmem:[#allocation2 + $0x90] sm:$0xff]  ;;  %v13524_v0 = vld [vmem:[#allocation2 + $0x98] sm:$0xff]  ;;  %v8002_v43 = vld [vmem:[%s14213_s3 + $0x188] sm:$0xff] }
 0x2be   : > { %v4703_v62 = vmax.f32 %v4701_v38, 0.0  ;;  %10136 = vmatpush3.msra.mxu1 %v7976_v30  ;;  %10077 = vmatprep.subr.mxu0 %v7947_v7  ;;  %4706 = vst.msk [vmem:[#allocation2 + $0xb8] sm:$0xff] %vm4638_vm2, %v4704_v31  ;;  %v8031_v23 = vld [vmem:[%s14213_s3 + $0x3d0] sm:$0xff]  ;;  %v8029_v26 = vld [vmem:[%s14213_s3 + $0x3c0] sm:$0xff]  ;;  %v5841_v44 = vld [vmem:[#allocation2 + $0x38] sm:$0xff] }
 0x2bf   : > { %10137 = vmatprep.subr.mxu1 %v7975_v61  ;;  %10078 = vmatpush3.msra.mxu0 %v7947_v7  ;;  %v8003_v51 = vld [vmem:[%s14213_s3 + $0x190] sm:$0xff]  ;;  %v8001_v37 = vld [vmem:[%s14213_s3 + $0x180] sm:$0xff]  ;;  %v8000_v1 = vld [vmem:[%s14213_s3 + $0x178] sm:$0xff] }
 0x2c0   : > { %4705 = vst.msk [vmem:[#allocation2 + $0xb0] sm:$0xff] %vm4638_vm2, %v4703_v62  ;;  %10138 = vmatpush3.msra.mxu1 %v7975_v61  ;;  %10000 = vmatmul.mubr.msk.f32.gmra.mxu0 %vm4638_vm2, %v12998_v24  ;;  %v5840_v30 = vld [vmem:[#allocation2 + $0x30] sm:$0xff]  ;;  %v8105_v7 = vld [vmem:[%s14213_s3 + $0x4a8] sm:$0xff]  ;;  %v13553_v38 = vld [vmem:[#allocation2 + $0x40] sm:$0xff] }
 0x2c1   : > { %10060 = vmatmul.mubr.msk.f32.gmra.mxu1 %vm4638_vm2, %v13047_v56  ;;  %10079 = vmatprep.subr.mxu0 %v7946_v49  ;;  %v7999_v61 = vld [vmem:[%s14213_s3 + $0x170] sm:$0xff]  ;;  %v8104_v31 = vld [vmem:[%s14213_s3 + $0x4a0] sm:$0xff]  ;;  %v13563_v62 = vld [vmem:[#allocation2 + $0x48] sm:$0xff] }
 0x2c2   : > { %10139 = vmatprep.subr.mxu1 %v7974_v27  ;;  %10002 = vmatprep.mubr.msk.f32.mxu0 %vm4638_vm2, %v13031_v11 }
 0x2c3   : > { %10062 = vmatprep.mubr.msk.f32.mxu1 %vm4638_vm2, %v13091_v28  ;;  %10080 = vmatpush3.msra.mxu0 %v7946_v49  ;;  %v7998_v49 = vld [vmem:[%s14213_s3 + $0x168] sm:$0xff] }
 0x2c4   : > { %10140 = vmatpush3.msra.mxu1 %v7974_v27  ;;  %10081 = vmatprep.subr.mxu0 %v7945_v35  ;;  %v8103_v27 = vld [vmem:[%s14213_s3 + $0x498] sm:$0xff] }
 0x2c5   : > { %10141 = vmatprep.subr.mxu1 %v7973_v22  ;;  %10082 = vmatpush3.msra.mxu0 %v7945_v35  ;;  %v8074_v35 = vld [vmem:[%s14213_s3 + $0x250] sm:$0xff] }
 0x2c6   : > { %10142 = vmatpush3.msra.mxu1 %v7973_v22  ;;  %10003 = vmatmul.mubr.msk.f32.gmra.mxu0 %vm4638_vm2, %v13047_v56  ;;  %v8102_v22 = vld [vmem:[%s14213_s3 + $0x490] sm:$0xff] }
 0x2c7   : > { %10063 = vmatmul.mubr.msk.f32.gmra.mxu1 %vm4638_vm2, %v13104_v9  ;;  %10083 = vmatprep.subr.mxu0 %v7944_v32 }
 0x2c8   : > { %10143 = vmatprep.subr.mxu1 %v7972_v45  ;;  %10005 = vmatprep.mubr.msk.f32.mxu0 %vm4638_vm2, %v13091_v28 }
 0x2c9   : > { %10065 = vmatprep.mubr.msk.f32.mxu1 %vm4638_vm2, %v13146_v36  ;;  %10084 = vmatpush3.msra.mxu0 %v7944_v32  ;;  %v8073_v32 = vld [vmem:[%s14213_s3 + $0x248] sm:$0xff] }
 0x2ca   : > { %10144 = vmatpush3.msra.mxu1 %v7972_v45  ;;  %10085 = vmatprep.subr.mxu0 %v7943_v15  ;;  %v8101_v45 = vld [vmem:[%s14213_s3 + $0x488] sm:$0xff] }
 0x2cb   : > { %10145 = vmatprep.subr.mxu1 %v7971_v57  ;;  %10086 = vmatpush3.msra.mxu0 %v7943_v15  ;;  %v8072_v15 = vld [vmem:[%s14213_s3 + $0x240] sm:$0xff] }
 0x2cc   : > { %10146 = vmatpush3.msra.mxu1 %v7971_v57  ;;  %10006 = vmatmul.mubr.msk.f32.gmra.mxu0 %vm4638_vm2, %v13104_v9  ;;  %v8100_v57 = vld [vmem:[%s14213_s3 + $0x480] sm:$0xff] }
 0x2cd   : > { %10066 = vmatmul.mubr.msk.f32.gmra.mxu1 %vm4638_vm2, %v13158_v14  ;;  %10147 = vmatprep.subr.mxu1 %v7970_v13 }
 0x2ce   : > { %10008 = vmatprep.mubr.msk.f32.mxu0 %vm4638_vm2, %v13146_v36  ;;  %10068 = vmatprep.mubr.msk.f32.mxu1 %vm4638_vm2, %v13192_v59 }
 0x2cf   : > { %10087 = vmatprep.subr.mxu0 %v7942_v63  ;;  %10148 = vmatpush3.msra.mxu1 %v7970_v13  ;;  %v8071_v13 = vld [vmem:[%s14213_s3 + $0x238] sm:$0xff] }
 0x2d0   : > { %10088 = vmatpush3.msra.mxu0 %v7942_v63  ;;  %10149 = vmatprep.subr.mxu1 %v7969_v55  ;;  %v8099_v63 = vld [vmem:[%s14213_s3 + $0x478] sm:$0xff] }
 0x2d1   : > { %10089 = vmatprep.subr.mxu0 %v7941_v18  ;;  %10150 = vmatpush3.msra.mxu1 %v7969_v55  ;;  %v8070_v55 = vld [vmem:[%s14213_s3 + $0x230] sm:$0xff] }
 0x2d2   : > { %10009 = vmatmul.mubr.msk.f32.gmra.mxu0 %vm4638_vm2, %v13158_v14  ;;  %10069 = vmatmul.mubr.msk.f32.gmra.mxu1 %vm4638_vm2, %v13201_v46 }
 0x2d3   : > { %10090 = vmatpush3.msra.mxu0 %v7941_v18  ;;  %10151 = vmatprep.subr.mxu1 %v7968_v6  ;;  %v8069_v18 = vld [vmem:[%s14213_s3 + $0x228] sm:$0xff] }
 0x2d4   : > { %10011 = vmatprep.mubr.msk.f32.mxu0 %vm4638_vm2, %v13192_v59  ;;  %10091 = vmatprep.subr.mxu0 %v7940_v3 }
 0x2d5   : > { %10152 = vmatpush3.msra.mxu1 %v7968_v6  ;;  %10155 = vmatprep.mubr.msk.f32.mxu1 %vm4638_vm2, %v12941_v41  ;;  %v8097_v6 = vld [vmem:[%s14213_s3 + $0x468] sm:$0xff] }
 0x2d6   : > { %10092 = vmatpush3.msra.mxu0 %v7940_v3  ;;  %10153 = vmatprep.subr.mxu1 %v7967_v10  ;;  %v8067_v3 = vld [vmem:[%s14213_s3 + $0x218] sm:$0xff] }
 0x2d7   : > { %10093 = vmatprep.subr.mxu0 %v7939_v39  ;;  %10154 = vmatpush3.msra.mxu1 %v7967_v10  ;;  %v8095_v10 = vld [vmem:[%s14213_s3 + $0x458] sm:$0xff] }
 0x2d8   : > { %10012 = vmatmul.mubr.msk.f32.gmra.mxu0 %vm4638_vm2, %v13201_v46  ;;  %10156 = vmatmul.mubr.msk.f32.vlgmr.msra.gmra.mxu1 %vm4638_vm2, %v12953_v52 }
 0x2d9   : > { %10094 = vmatpush3.msra.mxu0 %v7939_v39  ;;  %10014 = vmatprep.mubr.msk.f32.mxu0 %vm4638_vm2, %v13236_v12  ;;  %v8066_v39 = vld [vmem:[%s14213_s3 + $0x210] sm:$0xff] }
 0x2da   : > { %10095 = vmatprep.subr.mxu0 %v7938_v25  ;;  %10158 = vmatprep.mubr.msk.f32.mxu1 %vm4638_vm2, %v12989_v42 }
 0x2db   : > { %10096 = vmatpush3.msra.mxu0 %v7938_v25  ;;  %10233 = vmatprep.subr.mxu1 %v8043_v20  ;;  %v13667_v25 = vld [vmem:[#allocation2 + $0xa0] sm:$0xff] }
 0x2dc   : > { %10097 = vmatprep.subr.mxu0 %v7937_v40  ;;  %10234 = vmatpush3.msra.mxu1 %v8043_v20  ;;  %v8093_v20 = vld [vmem:[%s14213_s3 + $0x448] sm:$0xff] }
 0x2dd   : > { %10015 = vmatmul.mubr.msk.f32.gmra.mxu0 %vm4638_vm2, %v13243_v54  ;;  %10159 = vmatmul.mubr.msk.f32.gmra.mxu1 %vm4638_vm2, %v12998_v24 }
 0x2de   : > { %10098 = vmatpush3.msra.mxu0 %v7937_v40  ;;  %10235 = vmatprep.subr.mxu1 %v8042_v4  ;;  %v8065_v40 = vld [vmem:[%s14213_s3 + $0x208] sm:$0xff] }
 0x2df   : > { %10099 = vmatprep.subr.mxu0 %v7936_v47  ;;  %10101 = vmatprep.mubr.msk.f32.mxu0 %vm4638_vm2, %v12941_v41  ;;  %v8011_v41 = vld [vmem:[%s14213_s3 + $0x1d0] sm:$0xff] }
 0x2e0   : > { %10161 = vmatprep.mubr.msk.f32.mxu1 %vm4638_vm2, %v13031_v11  ;;  %10236 = vmatpush3.msra.mxu1 %v8042_v4  ;;  %v8092_v4 = vld [vmem:[%s14213_s3 + $0x440] sm:$0xff] }
 0x2e1   : > { %10100 = vmatpush3.msra.mxu0 %v7936_v47  ;;  %10237 = vmatprep.subr.mxu1 %v8041_v58  ;;  %v13682_v47 = vld [vmem:[#allocation2 + $0xa8] sm:$0xff] }
 0x2e2   : > { %10179 = vmatprep.subr.mxu0 %v8012_v33  ;;  %10238 = vmatpush3.msra.mxu1 %v8041_v58  ;;  %v8064_v58 = vld [vmem:[%s14213_s3 + $0x200] sm:$0xff] }
 0x2e3   : > { %10102 = vmatmul.mubr.msk.f32.vlgmr.msra.gmra.mxu0 %vm4638_vm2, %v12953_v52  ;;  %10162 = vmatmul.mubr.msk.f32.gmra.mxu1 %vm4638_vm2, %v13047_v56  ;;  %v8010_v52 = vld [vmem:[%s14213_s3 + $0x1c8] sm:$0xff] }
 0x2e4   : > { %10180 = vmatpush3.msra.mxu0 %v8012_v33  ;;  %10239 = vmatprep.subr.mxu1 %v8040_v19  ;;  %v8091_v33 = vld [vmem:[%s14213_s3 + $0x438] sm:$0xff] }
 0x2e5   : > { %10104 = vmatprep.mubr.msk.f32.mxu0 %vm4638_vm2, %v12989_v42  ;;  %10164 = vmatprep.mubr.msk.f32.mxu1 %vm4638_vm2, %v13091_v28  ;;  %v8009_v42 = vld [vmem:[%s14213_s3 + $0x1c0] sm:$0xff] }
 0x2e6   : > { %10240 = vmatpush3.msra.mxu1 %v8040_v19  ;;  %10181 = vmatprep.subr.mxu0 %v8011_v41  ;;  %v8063_v19 = vld [vmem:[%s14213_s3 + $0x1f8] sm:$0xff] }
 0x2e7   : > { %10241 = vmatprep.subr.mxu1 %v8039_v53  ;;  %10182 = vmatpush3.msra.mxu0 %v8011_v41  ;;  %v8062_v41 = vld [vmem:[%s14213_s3 + $0x1f0] sm:$0xff] }
 0x2e8   : > { %10242 = vmatpush3.msra.mxu1 %v8039_v53  ;;  %10105 = vmatmul.mubr.msk.f32.gmra.mxu0 %vm4638_vm2, %v12998_v24  ;;  %v8008_v24 = vld [vmem:[%s14213_s3 + $0x1b8] sm:$0xff]  ;;  %v6260_v53 = vld [vmem:[#allocation2 + $0x50] sm:$0xff] }
 0x2e9   : > { %10165 = vmatmul.mubr.msk.f32.gmra.mxu1 %vm4638_vm2, %v13104_v9  ;;  %10183 = vmatprep.subr.mxu0 %v8010_v52 }
 0x2ea   : > { %10243 = vmatprep.subr.mxu1 %v8038_v5  ;;  %10107 = vmatprep.mubr.msk.f32.mxu0 %vm4638_vm2, %v13031_v11  ;;  %v8036_v11 = vld [vmem:[%s14213_s3 + $0x3f8] sm:$0xff] }
 0x2eb   : > { %10167 = vmatprep.mubr.msk.f32.mxu1 %vm4638_vm2, %v13146_v36  ;;  %10184 = vmatpush3.msra.mxu0 %v8010_v52  ;;  %v8061_v52 = vld [vmem:[%s14213_s3 + $0x1e8] sm:$0xff] }
 0x2ec   : > { %10244 = vmatpush3.msra.mxu1 %v8038_v5  ;;  %10185 = vmatprep.subr.mxu0 %v8009_v42  ;;  %v8060_v5 = vld [vmem:[%s14213_s3 + $0x1e0] sm:$0xff] }
 0x2ed   : > { %10245 = vmatprep.subr.mxu1 %v8037_v48  ;;  %10186 = vmatpush3.msra.mxu0 %v8009_v42 }
 0x2ee   : > { %10246 = vmatpush3.msra.mxu1 %v8037_v48  ;;  %10108 = vmatmul.mubr.msk.f32.gmra.mxu0 %vm4638_vm2, %v13047_v56  ;;  %v8006_v56 = vld [vmem:[%s14213_s3 + $0x1a8] sm:$0xff]  ;;  %v6261_v48 = vld [vmem:[#allocation2 + $0x58] sm:$0xff] }
 0x2ef   : > { %10168 = vmatmul.mubr.msk.f32.gmra.mxu1 %vm4638_vm2, %v13158_v14  ;;  %10187 = vmatprep.subr.mxu0 %v8008_v24 }
 0x2f0   : > { %10247 = vmatprep.subr.mxu1 %v8036_v11  ;;  %10110 = vmatprep.mubr.msk.f32.mxu0 %vm4638_vm2, %v13091_v28 }
 0x2f1   : > { %10170 = vmatprep.mubr.msk.f32.mxu1 %vm4638_vm2, %v13192_v59  ;;  %10188 = vmatpush3.msra.mxu0 %v8008_v24 }
 0x2f2   : > { %10248 = vmatpush3.msra.mxu1 %v8036_v11  ;;  %10189 = vmatprep.subr.mxu0 %v8007_v2  ;;  %v6262_v11 = vld [vmem:[#allocation2 + $0x60] sm:$0xff] }
 0x2f3   : > { %10249 = vmatprep.subr.mxu1 %v8035_v29  ;;  %10190 = vmatpush3.msra.mxu0 %v8007_v2 }
 0x2f4   : > { %10250 = vmatpush3.msra.mxu1 %v8035_v29  ;;  %10111 = vmatmul.mubr.msk.f32.gmra.mxu0 %vm4638_vm2, %v13104_v9 }
 0x2f5   : > { %10171 = vmatmul.mubr.msk.f32.gmra.mxu1 %vm4638_vm2, %v13201_v46  ;;  %10191 = vmatprep.subr.mxu0 %v8006_v56 }
 0x2f6   : > { %10251 = vmatprep.subr.mxu1 %v8034_v21  ;;  %10113 = vmatprep.mubr.msk.f32.mxu0 %vm4638_vm2, %v13146_v36 }
 0x2f7   : > { %10173 = vmatprep.mubr.msk.f32.mxu1 %vm4638_vm2, %v13236_v12  ;;  %10192 = vmatpush3.msra.mxu0 %v8006_v56 }
 0x2f8   : > { %10252 = vmatpush3.msra.mxu1 %v8034_v21  ;;  %10193 = vmatprep.subr.mxu0 %v8005_v17  ;;  %v6263_v21 = vld [vmem:[#allocation2 + $0x68] sm:$0xff] }
 0x2f9   : > { %10253 = vmatprep.subr.mxu1 %v8033_v34  ;;  %10194 = vmatpush3.msra.mxu0 %v8005_v17 }
 0x2fa   : > { %10254 = vmatpush3.msra.mxu1 %v8033_v34  ;;  %10114 = vmatmul.mubr.msk.f32.gmra.mxu0 %vm4638_vm2, %v13158_v14 }
 0x2fb   : > { %10174 = vmatmul.mubr.msk.f32.gmra.mxu1 %vm4638_vm2, %v13243_v54  ;;  %10255 = vmatprep.subr.mxu1 %v8032_v16 }
 0x2fc   : > { %10116 = vmatprep.mubr.msk.f32.mxu0 %vm4638_vm2, %v13192_v59  ;;  %10176 = vmatprep.mubr.msk.f32.mxu1 %vm4638_vm2, %v13509_v60 }
 0x2fd   : > { %10195 = vmatprep.subr.mxu0 %v8004_v50  ;;  %10256 = vmatpush3.msra.mxu1 %v8032_v16 }
 0x2fe   : > { %10196 = vmatpush3.msra.mxu0 %v8004_v50  ;;  %10257 = vmatprep.subr.mxu1 %v8031_v23 }
 0x2ff   : > { %10197 = vmatprep.subr.mxu0 %v8003_v51  ;;  %10258 = vmatpush3.msra.mxu1 %v8031_v23 }
 0x300   : > { %10117 = vmatmul.mubr.msk.f32.gmra.mxu0 %vm4638_vm2, %v13201_v46  ;;  %10177 = vmatmul.mubr.msk.f32.gmra.mxu1 %vm4638_vm2, %v13524_v0 }
 0x301   : > { %10198 = vmatpush3.msra.mxu0 %v8003_v51  ;;  %10259 = vmatprep.subr.mxu1 %v8030_v8 }
 0x302   : > { %10119 = vmatprep.mubr.msk.f32.mxu0 %vm4638_vm2, %v13236_v12  ;;  %10199 = vmatprep.subr.mxu0 %v8002_v43 }
 0x303   : > { %10260 = vmatpush3.msra.mxu1 %v8030_v8  ;;  %10263 = vmatprep.mubr.msk.f32.mxu1 %vm4638_vm2, %v5840_v30 }
 0x304   : > { %10200 = vmatpush3.msra.mxu0 %v8002_v43  ;;  %10261 = vmatprep.subr.mxu1 %v8029_v26 }
 0x305   : > { %10201 = vmatprep.subr.mxu0 %v8001_v37  ;;  %10262 = vmatpush3.msra.mxu1 %v8029_v26 }
 0x306   : > { %10120 = vmatmul.mubr.msk.f32.gmra.mxu0 %vm4638_vm2, %v13243_v54  ;;  %10264 = vmatmul.mubr.msk.f32.vlgmr.msra.gmra.mxu1 %vm4638_vm2, %v5841_v44 }
 0x307   : > { %10202 = vmatpush3.msra.mxu0 %v8001_v37  ;;  %10122 = vmatprep.mubr.msk.f32.mxu0 %vm4638_vm2, %v13509_v60 }
 0x308   : > { %10203 = vmatprep.subr.mxu0 %v8000_v1  ;;  %10266 = vmatprep.mubr.msk.f32.mxu1 %vm4638_vm2, %v13553_v38 }
 0x309   : > { %10204 = vmatpush3.msra.mxu0 %v8000_v1  ;;  %10341 = vmatprep.subr.mxu1 %v8105_v7  ;;  %v6273_v1 = vld [vmem:[#allocation2 + $0xb8] sm:$0xff] }
 0x30a   : > { %10205 = vmatprep.subr.mxu0 %v7999_v61  ;;  %10342 = vmatpush3.msra.mxu1 %v8105_v7 }
 0x30b   : > { %10123 = vmatmul.mubr.msk.f32.gmra.mxu0 %vm4638_vm2, %v13524_v0  ;;  %10267 = vmatmul.mubr.msk.f32.gmra.mxu1 %vm4638_vm2, %v13563_v62 }
 0x30c   : > { %10206 = vmatpush3.msra.mxu0 %v7999_v61  ;;  %10343 = vmatprep.subr.mxu1 %v8104_v31 }
 0x30d   : > { %10207 = vmatprep.subr.mxu0 %v7998_v49  ;;  %10209 = vmatprep.mubr.msk.f32.mxu0 %vm4638_vm2, %v5840_v30 }
 0x30e   : > { %10269 = vmatprep.mubr.msk.f32.mxu1 %vm4638_vm2, %v13091_v28  ;;  %10344 = vmatpush3.msra.mxu1 %v8104_v31 }
 0x30f   : > { %10208 = vmatpush3.msra.mxu0 %v7998_v49  ;;  %10345 = vmatprep.subr.mxu1 %v8103_v27 }
 0x310   : > { %10287 = vmatprep.subr.mxu0 %v8074_v35  ;;  %10346 = vmatpush3.msra.mxu1 %v8103_v27 }
 0x311   : > { %10210 = vmatmul.mubr.msk.f32.vlgmr.msra.gmra.mxu0 %vm4638_vm2, %v5841_v44  ;;  %10270 = vmatmul.mubr.msk.f32.gmra.mxu1 %vm4638_vm2, %v13104_v9 }
 0x312   : > { %10288 = vmatpush3.msra.mxu0 %v8074_v35  ;;  %10347 = vmatprep.subr.mxu1 %v8102_v22 }
 0x313   : > { %10212 = vmatprep.mubr.msk.f32.mxu0 %vm4638_vm2, %v13553_v38  ;;  %10272 = vmatprep.mubr.msk.f32.mxu1 %vm4638_vm2, %v13146_v36 }
 0x314   : > { %10348 = vmatpush3.msra.mxu1 %v8102_v22  ;;  %10289 = vmatprep.subr.mxu0 %v8073_v32 }
 0x315   : > { %10349 = vmatprep.subr.mxu1 %v8101_v45  ;;  %10290 = vmatpush3.msra.mxu0 %v8073_v32 }
 0x316   : > { %10350 = vmatpush3.msra.mxu1 %v8101_v45  ;;  %10213 = vmatmul.mubr.msk.f32.gmra.mxu0 %vm4638_vm2, %v13563_v62 }
 0x317   : > { %10273 = vmatmul.mubr.msk.f32.gmra.mxu1 %vm4638_vm2, %v13158_v14  ;;  %10291 = vmatprep.subr.mxu0 %v8072_v15 }
 0x318   : > { %10351 = vmatprep.subr.mxu1 %v8100_v57  ;;  %10215 = vmatprep.mubr.msk.f32.mxu0 %vm4638_vm2, %v13091_v28  ;;  %v8098_v28 = vld [vmem:[%s14213_s3 + $0x470] sm:$0xff] }
 0x319   : > { %10275 = vmatprep.mubr.msk.f32.mxu1 %vm4638_vm2, %v13192_v59  ;;  %10292 = vmatpush3.msra.mxu0 %v8072_v15 }
 0x31a   : > { %10352 = vmatpush3.msra.mxu1 %v8100_v57  ;;  %10293 = vmatprep.subr.mxu0 %v8071_v13 }
 0x31b   : > { %10353 = vmatprep.subr.mxu1 %v8099_v63  ;;  %10294 = vmatpush3.msra.mxu0 %v8071_v13 }
 0x31c   : > { %10354 = vmatpush3.msra.mxu1 %v8099_v63  ;;  %10216 = vmatmul.mubr.msk.f32.gmra.mxu0 %vm4638_vm2, %v13104_v9  ;;  %v8068_v9 = vld [vmem:[%s14213_s3 + $0x220] sm:$0xff] }
 0x31d   : > { %10276 = vmatmul.mubr.msk.f32.gmra.mxu1 %vm4638_vm2, %v13201_v46  ;;  %10295 = vmatprep.subr.mxu0 %v8070_v55 }
 0x31e   : > { %10355 = vmatprep.subr.mxu1 %v8098_v28  ;;  %10218 = vmatprep.mubr.msk.f32.mxu0 %vm4638_vm2, %v13146_v36  ;;  %v8096_v36 = vld [vmem:[%s14213_s3 + $0x460] sm:$0xff] }
 0x31f   : > { %10278 = vmatprep.mubr.msk.f32.mxu1 %vm4638_vm2, %v13236_v12  ;;  %10296 = vmatpush3.msra.mxu0 %v8070_v55 }
 0x320   : > { %10356 = vmatpush3.msra.mxu1 %v8098_v28  ;;  %10297 = vmatprep.subr.mxu0 %v8069_v18 }
 0x321   : > { %10357 = vmatprep.subr.mxu1 %v8097_v6  ;;  %10298 = vmatpush3.msra.mxu0 %v8069_v18 }
 0x322   : > { %10358 = vmatpush3.msra.mxu1 %v8097_v6  ;;  %10219 = vmatmul.mubr.msk.f32.gmra.mxu0 %vm4638_vm2, %v13158_v14  ;;  %v8094_v14 = vld [vmem:[%s14213_s3 + $0x450] sm:$0xff] }
 0x323   : > { %10279 = vmatmul.mubr.msk.f32.gmra.mxu1 %vm4638_vm2, %v13243_v54  ;;  %10299 = vmatprep.subr.mxu0 %v8068_v9 }
 0x324   : > { %10359 = vmatprep.subr.mxu1 %v8096_v36  ;;  %10221 = vmatprep.mubr.msk.f32.mxu0 %vm4638_vm2, %v13192_v59 }
 0x325   : > { %10281 = vmatprep.mubr.msk.f32.mxu1 %vm4638_vm2, %v13509_v60  ;;  %10300 = vmatpush3.msra.mxu0 %v8068_v9 }
 0x326   : > { %10360 = vmatpush3.msra.mxu1 %v8096_v36  ;;  %10301 = vmatprep.subr.mxu0 %v8067_v3 }
 0x327   : > { %10361 = vmatprep.subr.mxu1 %v8095_v10  ;;  %10302 = vmatpush3.msra.mxu0 %v8067_v3 }
 0x328   : > { %10362 = vmatpush3.msra.mxu1 %v8095_v10  ;;  %10222 = vmatmul.mubr.msk.f32.gmra.mxu0 %vm4638_vm2, %v13201_v46 }
 0x329   : > { %10282 = vmatmul.mubr.msk.f32.gmra.mxu1 %vm4638_vm2, %v13524_v0  ;;  %10363 = vmatprep.subr.mxu1 %v8094_v14 }
 0x32a   : > { %10224 = vmatprep.mubr.msk.f32.mxu0 %vm4638_vm2, %v13236_v12  ;;  %10284 = vmatprep.mubr.msk.f32.mxu1 %vm4638_vm2, %v13667_v25 }
 0x32b   : > { %10303 = vmatprep.subr.mxu0 %v8066_v39  ;;  %10364 = vmatpush3.msra.mxu1 %v8094_v14 }
 0x32c   : > { %10304 = vmatpush3.msra.mxu0 %v8066_v39  ;;  %10365 = vmatprep.subr.mxu1 %v8093_v20 }
 0x32d   : > { %10305 = vmatprep.subr.mxu0 %v8065_v40  ;;  %10366 = vmatpush3.msra.mxu1 %v8093_v20 }
 0x32e   : > { %10225 = vmatmul.mubr.msk.f32.gmra.mxu0 %vm4638_vm2, %v13243_v54  ;;  %10285 = vmatmul.mubr.msk.f32.gmra.mxu1 %vm4638_vm2, %v13682_v47 }
 0x32f   : > { %10306 = vmatpush3.msra.mxu0 %v8065_v40  ;;  %10367 = vmatprep.subr.mxu1 %v8092_v4 }
 0x330   : > { %10227 = vmatprep.mubr.msk.f32.mxu0 %vm4638_vm2, %v13509_v60  ;;  %10307 = vmatprep.subr.mxu0 %v8064_v58 }
 0x331   : > { %10368 = vmatpush3.msra.mxu1 %v8092_v4  ;;  %10371 = vmatprep.mubr.msk.f32.mxu1 %vm4638_vm2, %v13553_v38  ;;  %v9941_v42 = vpop.f32.mrf.mxu1 }
 0x332   : > { %10308 = vmatpush3.msra.mxu0 %v8064_v58  ;;  %10369 = vmatprep.subr.mxu1 %v8091_v33 }
 0x333   : > { %10309 = vmatprep.subr.mxu0 %v8063_v19  ;;  %10370 = vmatpush3.msra.mxu1 %v8091_v33  ;;  %v5037_v29 = vpop.f32.mrf.mxu1 }
 0x334   : > { %10228 = vmatmul.mubr.msk.f32.gmra.mxu0 %vm4638_vm2, %v13524_v0  ;;  %10372 = vmatmul.mubr.msk.f32.vlgmr.msra.gmra.mxu1 %vm4638_vm2, %v13563_v62 }
 0x335   : > { %10310 = vmatpush3.msra.mxu0 %v8063_v19  ;;  %10230 = vmatprep.mubr.msk.f32.mxu0 %vm4638_vm2, %v13667_v25  ;;  %v8132_v19 = vld [vmem:[%s14215_s5 + $0x98] sm:$0xff] }
 0x336   : > { %10311 = vmatprep.subr.mxu0 %v8062_v41  ;;  %10374 = vmatprep.mubr.msk.f32.mxu1 %vm4638_vm2, %v6260_v53 }
 0x337   : > { %10312 = vmatpush3.msra.mxu0 %v8062_v41 }
 0x338   : > { %10313 = vmatprep.subr.mxu0 %v8061_v52  ;;  %10231 = vmatmul.mubr.msk.f32.gmra.mxu0 %vm4638_vm2, %v13682_v47 }
 0x339   : > { %10314 = vmatpush3.msra.mxu0 %v8061_v52  ;;  %10375 = vmatmul.mubr.msk.f32.gmra.mxu1 %vm4638_vm2, %v6261_v48  ;;  %v9887_v24 = vpop.f32.mrf.mxu0  ;;  %v9944_v34 = vpop.f32.mrf.mxu1 }
 0x33a   : > { %10315 = vmatprep.subr.mxu0 %v8060_v5  ;;  %10317 = vmatprep.mubr.msk.f32.mxu0 %vm4638_vm2, %v13553_v38  ;;  %v13722_v2 = vadd.f32 %v9941_v42, %v9887_v24  ;;  %v8131_v24 = vld [vmem:[%s14215_s5 + $0x90] sm:$0xff] }
 0x33b   : > { %10377 = vmatprep.mubr.msk.f32.mxu1 %vm4638_vm2, %v6262_v11  ;;  %10316 = vmatpush3.msra.mxu0 %v8060_v5  ;;  %v4886_v56 = vpop.f32.mrf.mxu0  ;;  %v5047_v23 = vpop.f32.mrf.mxu1  ;;  %v6728_v5 = vld [vmem:[%s14215_s5 + $0x48] sm:$0xff] }
 0x33c   : > { %10318 = vmatmul.mubr.msk.f32.vlgmr.msra.gmra.mxu0 %vm4638_vm2, %v13563_v62  ;;  %v13727_v17 = vadd.f32 %v5037_v29, %v4886_v56  ;;  %10395 = vmatprep.subr.mxu0 %v8132_v19 }
 0x33d   : > { %10378 = vmatmul.mubr.msk.f32.gmra.mxu1 %vm4638_vm2, %v6263_v21  ;;  %10320 = vmatprep.mubr.msk.f32.mxu0 %vm4638_vm2, %v6260_v53 }
 0x33e   : > { %10380 = vmatprep.mubr.msk.f32.mxu1 %vm4638_vm2, %v13192_v59  ;;  %10396 = vmatpush3.msra.mxu0 %v8132_v19  ;;  %v8124_v19 = vld [vmem:[%s14215_s5 + $0x58] sm:$0xff] }
 0x33f   : > { %10418 = vmatprep.subr.mxu1 %v6728_v5  ;;  %10397 = vmatprep.subr.mxu0 %v8131_v24 }
 0x340   : > { %10321 = vmatmul.mubr.msk.f32.gmra.mxu0 %vm4638_vm2, %v6261_v48  ;;  %10419 = vmatpush3.msra.mxu1 %v6728_v5 }
 0x341   : > { %10381 = vmatmul.mubr.msk.f32.gmra.mxu1 %vm4638_vm2, %v13201_v46  ;;  %10323 = vmatprep.mubr.msk.f32.mxu0 %vm4638_vm2, %v6262_v11  ;;  %v9890_v16 = vpop.f32.mrf.mxu0  ;;  %v9947_v43 = vpop.f32.mrf.mxu1 }
 0x342   : > { %10383 = vmatprep.mubr.msk.f32.mxu1 %vm4638_vm2, %v13236_v12  ;;  %v13739_v50 = vadd.f32 %v9944_v34, %v9890_v16  ;;  %10398 = vmatpush3.msra.mxu0 %v8131_v24  ;;  %v8123_v24 = vld [vmem:[%s14215_s5 + $0x50] sm:$0xff] }
 0x343   : > { %v4896_v51 = vpop.f32.mrf.mxu0 }
 0x344   : > { %10324 = vmatmul.mubr.msk.f32.gmra.mxu0 %vm4638_vm2, %v6263_v21  ;;  %v13742_v8 = vadd.f32 %v5047_v23, %v4896_v51  ;;  %v6727_v21 = vld [vmem:[%s14215_s5 + $0x40] sm:$0xff]  ;;  %v6726_v23 = vld [vmem:[%s14215_s5 + $0x38] sm:$0xff] }
 0x345   : > { %10384 = vmatmul.mubr.msk.f32.gmra.mxu1 %vm4638_vm2, %v13243_v54  ;;  %10326 = vmatprep.mubr.msk.f32.mxu0 %vm4638_vm2, %v13192_v59  ;;  %v5057_v59 = vpop.f32.mrf.mxu1 }
 0x346   : > { %10386 = vmatprep.mubr.msk.f32.mxu1 %vm4638_vm2, %v13509_v60  ;;  %10420 = vmatprep.subr.mxu1 %v6727_v21 }
 0x347   : > { %10421 = vmatpush3.msra.mxu1 %v6727_v21 }
 0x348   : > { %10327 = vmatmul.mubr.msk.f32.gmra.mxu0 %vm4638_vm2, %v13201_v46  ;;  %v6272_v46 = vld [vmem:[#allocation2 + $0xb0] sm:$0xff]  ;;  %10422 = vmatprep.subr.mxu1 %v6726_v23 }
 0x349   : > { %10387 = vmatmul.mubr.msk.f32.gmra.mxu1 %vm4638_vm2, %v13524_v0  ;;  %10329 = vmatprep.mubr.msk.f32.mxu0 %vm4638_vm2, %v13236_v12  ;;  %v9893_v26 = vpop.f32.mrf.mxu0  ;;  %v9950_v12 = vpop.f32.mrf.mxu1 }
 0x34a   : > { %10389 = vmatprep.mubr.msk.f32.mxu1 %vm4638_vm2, %v13667_v25  ;;  %v13758_v30 = vadd.f32 %v9947_v43, %v9893_v26  ;;  %10423 = vmatpush3.msra.mxu1 %v6726_v23 }
 0x34b   : > { %v4906_v37 = vpop.f32.mrf.mxu0  ;;  %v5067_v38 = vpop.f32.mrf.mxu1 }
 0x34c   : > { %10330 = vmatmul.mubr.msk.f32.gmra.mxu0 %vm4638_vm2, %v13243_v54  ;;  %v13762_v44 = vadd.f32 %v5057_v59, %v4906_v37  ;;  %v8130_v59 = vld [vmem:[%s14215_s5 + $0x88] sm:$0xff]  ;;  %v6725_v37 = vld [vmem:[%s14215_s5 + $0x30] sm:$0xff] }
 0x34d   : > { %10390 = vmatmul.mubr.msk.f32.gmra.mxu1 %vm4638_vm2, %v13682_v47  ;;  %10332 = vmatprep.mubr.msk.f32.mxu0 %vm4638_vm2, %v13509_v60 }
 0x34e   : > { %10392 = vmatprep.mubr.msk.f32.mxu1 %vm4638_vm2, %v6272_v46  ;;  %10399 = vmatprep.subr.mxu0 %v8130_v59 }
 0x34f   : > { %10424 = vmatprep.subr.mxu1 %v6725_v37  ;;  %10400 = vmatpush3.msra.mxu0 %v8130_v59 }
 0x350   : > { %10333 = vmatmul.mubr.msk.f32.gmra.mxu0 %vm4638_vm2, %v13524_v0  ;;  %10425 = vmatpush3.msra.mxu1 %v6725_v37 }
 0x351   : > { %10393 = vmatmul.mubr.msk.f32.gmra.mxu1 %vm4638_vm2, %v6273_v1  ;;  %10335 = vmatprep.mubr.msk.f32.mxu0 %vm4638_vm2, %v13667_v25  ;;  %v9896_v54 = vpop.f32.mrf.mxu0  ;;  %v9953_v31 = vpop.f32.mrf.mxu1 }
 0x352   : > { %v13774_v7 = vadd.f32 %v9950_v12, %v9896_v54  ;;  %v8129_v54 = vld [vmem:[%s14215_s5 + $0x80] sm:$0xff] }
 0x353   : > { %v4916_v61 = vpop.f32.mrf.mxu0  ;;  %v5077_v49 = vpop.f32.mrf.mxu1  ;;  %10401 = vmatprep.subr.mxu0 %v8129_v54 }
 0x354   : > { %10336 = vmatmul.mubr.msk.f32.gmra.mxu0 %vm4638_vm2, %v13682_v47  ;;  %v13778_v60 = vadd.f32 %v5067_v38, %v4916_v61  ;;  %v6724_v38 = vld [vmem:[%s14215_s5 + $0x28] sm:$0xff]  ;;  %v6723_v61 = vld [vmem:[%s14215_s5 + $0x20] sm:$0xff] }
 0x355   : > { %10338 = vmatprep.mubr.msk.f32.mxu0 %vm4638_vm2, %v6272_v46  ;;  %10426 = vmatprep.subr.mxu1 %v6724_v38 }
 0x356   : > { %10402 = vmatpush3.msra.mxu0 %v8129_v54  ;;  %10427 = vmatpush3.msra.mxu1 %v6724_v38 }
 0x357   : > { %10428 = vmatprep.subr.mxu1 %v6723_v61 }
 0x358   : > { %10339 = vmatmul.mubr.msk.f32.gmra.mxu0 %vm4638_vm2, %v6273_v1  ;;  %10429 = vmatpush3.msra.mxu1 %v6723_v61 }
 0x359   : > { %v9899_v0 = vpop.f32.mrf.mxu0  ;;  %v9956_v22 = vpop.f32.mrf.mxu1 }
 0x35a   : > { %v13782_v62 = vadd.f32 %v9953_v31, %v9899_v0 }
 0x35b   : > { %v4926_v27 = vpop.f32.mrf.mxu0  ;;  %v5087_v32 = vpop.f32.mrf.mxu1 }
 0x35c   : > { %v13784_v35 = vadd.f32 %v5077_v49, %v4926_v27  ;;  %v6722_v27 = vld [vmem:[%s14215_s5 + $0x18] sm:$0xff] }
 0x35d   : > { %10430 = vmatprep.subr.mxu1 %v6722_v27 }
 0x35e   : > { %10431 = vmatpush3.msra.mxu1 %v6722_v27 }
 0x361   : > { %v9902_v45 = vpop.f32.mrf.mxu0  ;;  %v9959_v57 = vpop.f32.mrf.mxu1 }
 0x362   : > { %v13786_v15 = vadd.f32 %v9956_v22, %v9902_v45 }
 0x363   : > { %v4936_v13 = vpop.f32.mrf.mxu0  ;;  %v5097_v55 = vpop.f32.mrf.mxu1 }
 0x364   : > { %v13788_v63 = vadd.f32 %v5087_v32, %v4936_v13  ;;  %v8128_v13 = vld [vmem:[%s14215_s5 + $0x78] sm:$0xff] }
 0x365   : > { %10403 = vmatprep.subr.mxu0 %v8128_v13 }
 0x366   : > { %10404 = vmatpush3.msra.mxu0 %v8128_v13 }
 0x369   : > { %v9905_v28 = vpop.f32.mrf.mxu0  ;;  %v9962_v18 = vpop.f32.mrf.mxu1 }
 0x36a   : > { %v13790_v6 = vadd.f32 %v9959_v57, %v9905_v28  ;;  %v6721_v57 = vld [vmem:[%s14215_s5 + $0x10] sm:$0xff]  ;;  %v6720_v28 = vld [vmem:[%s14215_s5 + $0x8] sm:$0xff] }
 0x36b   : > { %v4946_v9 = vpop.f32.mrf.mxu0  ;;  %v5107_v36 = vpop.f32.mrf.mxu1  ;;  %10432 = vmatprep.subr.mxu1 %v6721_v57 }
 0x36c   : > { %v13792_v3 = vadd.f32 %v5097_v55, %v4946_v9  ;;  %v8127_v55 = vld [vmem:[%s14215_s5 + $0x70] sm:$0xff]  ;;  %10433 = vmatpush3.msra.mxu1 %v6721_v57 }
 0x36d   : > { %v10049_v10 = vpop.f32.mrf.mxu1  ;;  %10434 = vmatprep.subr.mxu1 %v6720_v28  ;;  %10405 = vmatprep.subr.mxu0 %v8127_v55 }
 0x36e   : > { %10435 = vmatpush3.msra.mxu1 %v6720_v28  ;;  %10406 = vmatpush3.msra.mxu0 %v8127_v55 }
 0x36f   : > { %v5343_v14 = vpop.f32.mrf.mxu1 }
 0x371   : > { %v9908_v39 = vpop.f32.mrf.mxu0  ;;  %v10052_v25 = vpop.f32.mrf.mxu1 }
 0x372   : > { %v13794_v20 = vadd.f32 %v9962_v18, %v9908_v39  ;;  %v8126_v39 = vld [vmem:[%s14215_s5 + $0x68] sm:$0xff] }
 0x373   : > { %v4956_v40 = vpop.f32.mrf.mxu0  ;;  %v5353_v4 = vpop.f32.mrf.mxu1  ;;  %10407 = vmatprep.subr.mxu0 %v8126_v39 }
 0x374   : > { %14630 = vst [vmem:[#allocation86_spill] sm:$0xff] %v13794_v20  ;;  %v13796_v47 = vadd.f32 %v5107_v36, %v4956_v40  ;;  %10408 = vmatpush3.msra.mxu0 %v8126_v39 }
 0x375   : > { %v9995_v58 = vpop.f32.mrf.mxu0  ;;  %v10055_v33 = vpop.f32.mrf.mxu1 }
 0x376   : > { %14631 = vst [vmem:[#allocation87_spill] sm:$0xff] %v13796_v47  ;;  %v13801_v41 = vadd.f32 %v10049_v10, %v9995_v58  ;;  %v6719_v10 = vld [vmem:[%s14215_s5] sm:$0xff] }
 0x377   : > { %v5198_v53 = vpop.f32.mrf.mxu0  ;;  %v5363_v52 = vpop.f32.mrf.mxu1  ;;  %10436 = vmatprep.subr.mxu1 %v6719_v10 }
 0x378   : > { %v13806_v42 = vadd.f32 %v5343_v14, %v5198_v53  ;;  %10437 = vmatpush3.msra.mxu1 %v6719_v10 }
 0x37a   : > { %v9998_v48 = vpop.f32.mrf.mxu0 }
 0x37b   : > { %v13811_v11 = vadd.f32 %v10052_v25, %v9998_v48  ;;  %v10058_v29 = vpop.f32.mrf.mxu1 }
 0x37c   : > { %v5208_v56 = vpop.f32.mrf.mxu0 }
 0x37d   : > { %v13816_v34 = vadd.f32 %v5353_v4, %v5208_v56  ;;  %v5373_v16 = vpop.f32.mrf.mxu1  ;;  %v8125_v4 = vld [vmem:[%s14215_s5 + $0x60] sm:$0xff]  ;;  %v13885_v56 = vld [vmem:[%s14215_s5 + $0xe8] sm:$0xff] }
 0x37e   : > { %10409 = vmatprep.subr.mxu0 %v8125_v4  ;;  %14633 = vst [vmem:[#allocation14_spill] sm:$0xff] %v13885_v56 }
 0x37f   : > { %10410 = vmatpush3.msra.mxu0 %v8125_v4 }
 0x380   : > { %v10001_v51 = vpop.f32.mrf.mxu0  ;;  %10411 = vmatprep.subr.mxu0 %v8124_v19 }
 0x381   : > { %v13821_v43 = vadd.f32 %v10055_v33, %v10001_v51  ;;  %v10061_v26 = vpop.f32.mrf.mxu1  ;;  %10412 = vmatpush3.msra.mxu0 %v8124_v19 }
 0x382   : > { %v5218_v46 = vpop.f32.mrf.mxu0  ;;  %10413 = vmatprep.subr.mxu0 %v8123_v24 }
 0x383   : > { %v13829_v12 = vadd.f32 %v5363_v52, %v5218_v46  ;;  %v5383_v1 = vpop.f32.mrf.mxu1  ;;  %v13874_v52 = vld [vmem:[%s14215_s5 + $0x138] sm:$0xff]  ;;  %10414 = vmatpush3.msra.mxu0 %v8123_v24 }
 0x384   : > { %14632 = vst [vmem:[#allocation56_spill] sm:$0xff] %v13874_v52  ;;  %10464 = vmatprep.subr.mxu1 %v13874_v52  ;;  %10441 = vmatprep.subr.mxu0 %v13885_v56 }
 0x386   : > { %v10004_v31 = vpop.f32.mrf.mxu0 }
 0x387   : > { %v13840_v0 = vadd.f32 %v10058_v29, %v10004_v31  ;;  %v10064_v49 = vpop.f32.mrf.mxu1 }
 0x388   : > { %v5228_v22 = vpop.f32.mrf.mxu0 }
 0x389   : > { %v13845_v32 = vadd.f32 %v5373_v16, %v5228_v22  ;;  %v5393_v45 = vpop.f32.mrf.mxu1 }
 0x38c   : > { %v10007_v18 = vpop.f32.mrf.mxu0 }
 0x38d   : > { %v5389_v9 = vadd.f32 %v10061_v26, %v10007_v18  ;;  %v10067_v36 = vpop.f32.mrf.mxu1 }
 0x38e   : > { %v5238_v14 = vpop.f32.mrf.mxu0 }
 0x38f   : > { %v5384_v25 = vadd.f32 %v5383_v1, %v5238_v14  ;;  %v5403_v40 = vpop.f32.mrf.mxu1 }
 0x392   : > { %v10010_v58 = vpop.f32.mrf.mxu0  ;;  %v10070_v33 = vpop.f32.mrf.mxu1 }
 0x393   : > { %v5399_v53 = vadd.f32 %v10064_v49, %v10010_v58 }
 0x394   : > { %v5248_v5 = vpop.f32.mrf.mxu0  ;;  %v5413_v48 = vpop.f32.mrf.mxu1 }
 0x395   : > { %v13880_v29 = vadd.f32 %v5393_v45, %v5248_v5 }
 0x398   : > { %v10013_v21 = vpop.f32.mrf.mxu0  ;;  %v10157_v16 = vpop.f32.mrf.mxu1 }
 0x399   : > { %v5409_v23 = vadd.f32 %v10067_v36, %v10013_v21  ;;  %v13889_v51 = vadd.f32 %v10157_v16, %v13801_v41 }
 0x39a   : > { %v5258_v26 = vpop.f32.mrf.mxu0  ;;  %v5745_v59 = vpop.f32.mrf.mxu1 }
 0x39b   : > { %v5404_v37 = vadd.f32 %v5403_v40, %v5258_v26  ;;  %v13892_v46 = vadd.f32 %v5745_v59, %v13806_v42 }
 0x39d   : > { %v10016_v1 = vpop.f32.mrf.mxu0  ;;  %v13894_v54 = vpop.f32.mrf.mxu1 }
 0x39e   : > { %v13896_v38 = vadd.f32 %v10070_v33, %v10016_v1 }
 0x39f   : > { %v5268_v61 = vpop.f32.mrf.mxu0  ;;  %v13898_v31 = vpop.f32.mrf.mxu1 }
 0x3a0   : > { %v13900_v49 = vadd.f32 %v5413_v48, %v5268_v61 }
 0x3a2   : > { %14634 = vst [vmem:[#allocation88_spill] sm:$0xff] %v13900_v49 }
 0x3a3   : > { %v10103_v27 = vpop.f32.mrf.mxu0  ;;  %v10163_v22 = vpop.f32.mrf.mxu1 }
 0x3a4   : > { %v13903_v41 = vadd.f32 %v10103_v27, %v13722_v2  ;;  %v13906_v45 = vadd.f32 %v10163_v22, %v13821_v43 }
 0x3a5   : > { %v5568_v42 = vpop.f32.mrf.mxu0  ;;  %v5765_v57 = vpop.f32.mrf.mxu1 }
 0x3a6   : > { %v13909_v13 = vadd.f32 %v5568_v42, %v13727_v17  ;;  %v13912_v55 = vadd.f32 %v5765_v57, %v13829_v12 }
 0x3a8   : > { %v13914_v28 = vpop.f32.mrf.mxu0 }
 0x3a9   : > { %v13916_v18 = vpop.f32.mrf.mxu1 }
 0x3aa   : > { %v13918_v36 = vpop.f32.mrf.mxu0 }
 0x3ab   : > { %v13920_v10 = vpop.f32.mrf.mxu1 }
 0x3ae   : > { %v10109_v2 = vpop.f32.mrf.mxu0 }
 0x3af   : > { %v13923_v43 = vadd.f32 %v10109_v2, %v13758_v30  ;;  %v10169_v14 = vpop.f32.mrf.mxu1 }
 0x3b0   : > { %v13925_v39 = vadd.f32 %v10169_v14, %v5389_v9  ;;  %v5588_v17 = vpop.f32.mrf.mxu0 }
 0x3b1   : > { %v13928_v40 = vadd.f32 %v5588_v17, %v13762_v44  ;;  %v5785_v12 = vpop.f32.mrf.mxu1 }
 0x3b2   : > { %v13930_v4 = vadd.f32 %v5785_v12, %v5384_v25 }
 0x3b4   : > { %14635 = vst [vmem:[#allocation57_spill] sm:$0xff] %v13930_v4  ;;  %v13932_v58 = vpop.f32.mrf.mxu0 }
 0x3b5   : > { %v10172_v33 = vpop.f32.mrf.mxu1 }
 0x3b6   : > { %v13934_v19 = vadd.f32 %v10172_v33, %v5399_v53  ;;  %v13936_v5 = vpop.f32.mrf.mxu0 }
 0x3b7   : > { %v13938_v48 = vpop.f32.mrf.mxu1 }
 0x3b8   : > { %14636 = vst [vmem:[#allocation89_spill] sm:$0xff] %v13934_v19 }
 0x3ba   : > { %v10115_v30 = vpop.f32.mrf.mxu0 }
 0x3bb   : > { %v13941_v9 = vadd.f32 %v10115_v30, %v13782_v62  ;;  %v10175_v24 = vpop.f32.mrf.mxu1 }
 0x3bc   : > { %v13943_v21 = vadd.f32 %v10175_v24, %v5409_v23  ;;  %v5608_v44 = vpop.f32.mrf.mxu0 }
 0x3bd   : > { %14637 = vst [vmem:[#allocation59_spill] sm:$0xff] %v13941_v9  ;;  %v13946_v25 = vadd.f32 %v5608_v44, %v13784_v35  ;;  %v5805_v16 = vpop.f32.mrf.mxu1 }
 0x3be   : > { %14638 = vst [vmem:[#allocation90_spill] sm:$0xff] %v13943_v21  ;;  %v13948_v26 = vadd.f32 %v5805_v16, %v5404_v37 }
 0x3bf   : > { %14639 = vst [vmem:[#allocation91_spill] sm:$0xff] %v13946_v25 }
 0x3c0   : > { %14640 = vst [vmem:[#allocation15_spill] sm:$0xff] %v13948_v26  ;;  %v10118_v53 = vpop.f32.mrf.mxu0  ;;  %v13950_v59 = vpop.f32.mrf.mxu1 }
 0x3c1   : > { %v13953_v1 = vadd.f32 %v10118_v53, %v13786_v15 }
 0x3c2   : > { %v13955_v61 = vpop.f32.mrf.mxu0  ;;  %v13957_v62 = vpop.f32.mrf.mxu1 }
 0x3c3   : > { %14641 = vst [vmem:[#allocation58_spill] sm:$0xff] %v13953_v1  ;;  %14642 = vst [vmem:[#allocation92_spill] sm:$0xff] %v13957_v62 }
 0x3c6   : > { %v10121_v27 = vpop.f32.mrf.mxu0  ;;  %v10265_v23 = vpop.f32.mrf.mxu1 }
 0x3c7   : > { %v13960_v22 = vadd.f32 %v10121_v27, %v13790_v6 }
 0x3c8   : > { %v5628_v35 = vpop.f32.mrf.mxu0  ;;  %v6163_v42 = vpop.f32.mrf.mxu1 }
 0x3c9   : > { %14643 = vst [vmem:[#allocation93_spill] sm:$0xff] %v13960_v22  ;;  %v13963_v37 = vadd.f32 %v5628_v35, %v13792_v3 }
 0x3cb   : > { %14644 = vst [vmem:[#allocation94_spill] sm:$0xff] %v13963_v37  ;;  %v13965_v57 = vpop.f32.mrf.mxu0  ;;  %v10268_v2 = vpop.f32.mrf.mxu1 }
 0x3cc   : > { %14645 = vst [vmem:[#allocation61_spill] sm:$0xff] %v13965_v57 }
 0x3cd   : > { %v13967_v14 = vpop.f32.mrf.mxu0  ;;  %v6173_v15 = vpop.f32.mrf.mxu1 }
 0x3ce   : > { %14646 = vst [vmem:[#allocation95_spill] sm:$0xff] %v13967_v14 }
 0x3d1   : > { %v10211_v17 = vpop.f32.mrf.mxu0  ;;  %v10271_v12 = vpop.f32.mrf.mxu1 }
 0x3d3   : > { %v5986_v33 = vpop.f32.mrf.mxu0  ;;  %v13969_v30 = vpop.f32.mrf.mxu1 }
 0x3d6   : > { %v10214_v24 = vpop.f32.mrf.mxu0 }
 0x3d7   : > { %v13971_v44 = vpop.f32.mrf.mxu1 }
 0x3d8   : > { %v5996_v6 = vpop.f32.mrf.mxu0 }
 0x3d9   : > { %v13973_v16 = vpop.f32.mrf.mxu1 }
 0x3dc   : > { %v10217_v53 = vpop.f32.mrf.mxu0 }
 0x3dd   : > { %v13975_v3 = vpop.f32.mrf.mxu1 }
 0x3de   : > { %v6006_v27 = vpop.f32.mrf.mxu0 }
 0x3df   : > { %v13977_v35 = vpop.f32.mrf.mxu1 }
 0x3e0   : > { %14647 = vst [vmem:[#allocation63_spill] sm:$0xff] %v13977_v35  ;;  %v6065_v35 = vadd.f32 %v5986_v33, %v13909_v13 }
 0x3e2   : > { %v13979_v56 = vpop.f32.mrf.mxu0 }
 0x3e3   : > { %v13981_v14 = vpop.f32.mrf.mxu1 }
 0x3e4   : > { %14648 = vst [vmem:[#allocation60_spill] sm:$0xff] %v13981_v14  ;;  %v13983_v47 = vpop.f32.mrf.mxu0 }
 0x3e5   : > { %v13985_v37 = vpop.f32.mrf.mxu1 }
 0x3e6   : > { %14649 = vst [vmem:[#allocation16_spill] sm:$0xff] %v13985_v37 }
 0x3e8   : > { %v13987_v22 = vpop.f32.mrf.mxu0 }
 0x3e9   : > { %14650 = vst [vmem:[#allocation96_spill] sm:$0xff] %v13987_v22  ;;  %v13989_v26 = vpop.f32.mrf.mxu1 }
 0x3ea   : > { %14651 = vst [vmem:[#allocation97_spill] sm:$0xff] %v13989_v26  ;;  %v13991_v21 = vpop.f32.mrf.mxu0 }
 0x3eb   : > { %14652 = vst [vmem:[#allocation17_spill] sm:$0xff] %v13991_v21  ;;  %v13993_v57 = vpop.f32.mrf.mxu1 }
 0x3ec   : > { %14653 = vst [vmem:[#allocation98_spill] sm:$0xff] %v13993_v57  ;;  %v6243_v57 = vadd.f32 %v10265_v23, %v13889_v51  ;;  %v5826_v51 = vadd.f32 %v13898_v31, %v13816_v34  ;;  %v5831_v34 = vadd.f32 %v13916_v18, %v13840_v0  ;;  %v6247_v31 = vadd.f32 %v10271_v12, %v13906_v45 }
 0x3ed   : > { %v6246_v0 = vadd.f32 %v13969_v30, %v13912_v55  ;;  %v6069_v45 = vadd.f32 %v6006_v27, %v13928_v40 }
 0x3ee   : > { %v13995_v20 = vpop.f32.mrf.mxu0  ;;  %v13997_v62 = vpop.f32.mrf.mxu1  ;;  %v6244_v9 = vadd.f32 %v6173_v15, %v5826_v51 }
 0x3ef   : > { %14654 = vst [vmem:[#allocation18_spill] sm:$0xff] %v13995_v20  ;;  %14655 = vst [vmem:[#allocation99_spill] sm:$0xff] %v13997_v62  ;;  %v6066_v20 = vadd.f32 %v10211_v17, %v13903_v41  ;;  %v5649_v41 = vadd.f32 %v13918_v36, %v13742_v8  ;;  %v14029_v8 = vld [vmem:[%s14214_s4] ss:$0 sm:$0xff] }
 0x3f0   : > { %v13999_v49 = vpop.f32.mrf.mxu0  ;;  %v14001_v52 = vpop.f32.mrf.mxu1 }
 0x3f1   : > { %14656 = vst [vmem:[#allocation65_spill] sm:$0xff] %v13999_v49  ;;  %14657 = vst [vmem:[#allocation62_spill] sm:$0xff] %v14001_v52  ;;  %v5827_v49 = vadd.f32 %v13894_v54, %v13811_v11  ;;  %v5650_v52 = vadd.f32 %v13914_v28, %v13739_v50 }
 0x3f3   : > { %v6245_v23 = vadd.f32 %v10268_v2, %v5827_v49  ;;  %v6068_v11 = vadd.f32 %v10214_v24, %v5650_v52  ;;  %v6070_v49 = vadd.f32 %v10217_v53, %v13923_v43  ;;  %v5834_v24 = vadd.f32 %v13938_v48, %v13880_v29 }
 0x3f4   : > { %v14003_v1 = vpop.f32.mrf.mxu0  ;;  %v10373_v25 = vpop.f32.mrf.mxu1  ;;  %v6251_v29 = vadd.f32 %v13975_v3, %v13925_v39  ;;  %v14668_v39 = vld [vmem:[#allocation91_spill] sm:$0xff]  ;;  %v14669_v3 = vld [vmem:[#allocation17_spill] sm:$0xff] }
 0x3f5   : > { %14658 = vst [vmem:[#allocation64_spill] sm:$0xff] %v14003_v1 }
 0x3f6   : > { %v14005_v37 = vpop.f32.mrf.mxu0  ;;  %v6581_v14 = vpop.f32.mrf.mxu1 }
 0x3f7   : > { %14659 = vst [vmem:[#allocation3_spill] sm:$0xff] %v14005_v37  ;;  %v6242_v37 = vadd.f32 %v6163_v42, %v13892_v46  ;;  %v6067_v42 = vadd.f32 %v5996_v6, %v5649_v41  ;;  %v14049_v6 = vadd.f32 %v13950_v59, %v13896_v38  ;;  %v5657_v41 = vadd.f32 %v13955_v61, %v13788_v63 }
 0x3f8   : > { %v14007_v19 = vpop.f32.mrf.mxu0 }
 0x3f9   : > { %14660 = vst [vmem:[#allocation35_spill] sm:$0xff] %v14007_v19  ;;  %v10376_v26 = vpop.f32.mrf.mxu1  ;;  %v6661_v19 = vadd.f32 %v10373_v25, %v6243_v57  ;;  %v6660_v54 = vadd.f32 %v6581_v14, %v6242_v37  ;;  %v5830_v37 = vadd.f32 %v13920_v10, %v13845_v32  ;;  %v5653_v32 = vadd.f32 %v13936_v5, %v13778_v60 }
 0x3fa   : > { %v14009_v21 = vpop.f32.mrf.mxu0  ;;  %v6663_v13 = vadd.f32 %v10376_v26, %v6245_v23  ;;  %v14663_v23 = vld [vmem:[#allocation96_spill] sm:$0xff] }
 0x3fb   : > { %14661 = vst [vmem:[#allocation19_spill] sm:$0xff] %v14009_v21  ;;  %v6591_v62 = vpop.f32.mrf.mxu1  ;;  %v6248_v5 = vadd.f32 %v13973_v16, %v5830_v37  ;;  %v6071_v53 = vadd.f32 %v13983_v47, %v5653_v32  ;;  %v14664_v47 = vld [vmem:[#allocation57_spill] sm:$0xff] }
 0x3fc   : > { %v10319_v1 = vpop.f32.mrf.mxu0  ;;  %v6662_v36 = vadd.f32 %v6591_v62, %v6244_v9  ;;  %v5654_v62 = vadd.f32 %v13932_v58, %v13774_v7  ;;  %v6249_v7 = vadd.f32 %v13971_v44, %v5831_v34  ;;  %v14662_v44 = vld [vmem:[#allocation59_spill] sm:$0xff] }
 0x3fd   : > { %v6484_v4 = vadd.f32 %v10319_v1, %v6066_v20  ;;  %v10379_v22 = vpop.f32.mrf.mxu1 }
 0x3fe   : > { %v6404_v17 = vpop.f32.mrf.mxu0  ;;  %v6665_v18 = vadd.f32 %v10379_v22, %v6247_v31  ;;  %v6072_v60 = vadd.f32 %v13979_v56, %v5654_v62  ;;  %v6074_v56 = vadd.f32 %v14663_v23, %v14662_v44  ;;  %v14674_v62 = vld [vmem:[#allocation92_spill] sm:$0xff]  ;;  %v14683_v44 = vld [vmem:[#allocation93_spill] sm:$0xff] }
 0x3ff   : > { %v6677_v21 = vmax.f32 %v6484_v4, %v6661_v19  ;;  %v6483_v50 = vadd.f32 %v6404_v17, %v6065_v35  ;;  %v6601_v28 = vpop.f32.mrf.mxu1  ;;  %v14684_v23 = vld [vmem:[#allocation64_spill] sm:$0xff] }
 0x400   : > { %v10322_v46 = vpop.f32.mrf.mxu0  ;;  %v6664_v55 = vadd.f32 %v6601_v28, %v6246_v0 }
 0x401   : > { %v6676_v25 = vmax.f32 %v6483_v50, %v6660_v54  ;;  %v6486_v20 = vadd.f32 %v10322_v46, %v6068_v11  ;;  %v10382_v1 = vpop.f32.mrf.mxu1  ;;  %v6700_v2 = vadd.f32 %v14029_v8, %v6677_v21  ;;  %v14665_v50 = vld [vmem:[#allocation63_spill] sm:$0xff]  ;;  %v14666_v46 = vld [vmem:[#allocation89_spill] sm:$0xff] }
 0x402   : > { %v6414_v52 = vpop.f32.mrf.mxu0  ;;  %v6667_v38 = vadd.f32 %v10382_v1, %v6249_v7  ;;  %v6250_v28 = vadd.f32 %v14665_v50, %v14664_v47  ;;  %v8154_v50 = vld [vmem:[%s14215_s5 + $0x118] sm:$0xff] }
 0x403   : > { %v6679_v4 = vmax.f32 %v6486_v20, %v6663_v13  ;;  %v6485_v19 = vadd.f32 %v6414_v52, %v6067_v42  ;;  %v6611_v26 = vpop.f32.mrf.mxu1  ;;  %v6699_v10 = vadd.f32 %v14029_v8, %v6676_v25  ;;  %v14667_v42 = vld [vmem:[#allocation60_spill] sm:$0xff]  ;;  %v6073_v20 = vadd.f32 %v14669_v3, %v14668_v39 }
 0x404   : > { %v10325_v57 = vpop.f32.mrf.mxu0  ;;  %v6666_v11 = vadd.f32 %v6611_v26, %v6248_v5  ;;  %v6253_v13 = vadd.f32 %v14667_v42, %v14666_v46  ;;  %v8155_v5 = vld [vmem:[%s14215_s5 + $0x120] sm:$0xff] }
 0x405   : > { %v6702_v14 = vadd.f32 %v14029_v8, %v6679_v4  ;;  %v6678_v15 = vmax.f32 %v6485_v19, %v6662_v36  ;;  %v6488_v43 = vadd.f32 %v10325_v57, %v6070_v49  ;;  %v10385_v9 = vpop.f32.mrf.mxu1  ;;  %v8157_v49 = vld [vmem:[%s14215_s5 + $0x130] sm:$0xff]  ;;  %v14670_v36 = vld [vmem:[#allocation58_spill] sm:$0xff]  ;;  %v14686_v46 = vld [vmem:[#allocation3_spill] sm:$0xff] }
 0x406   : > { %v6424_v12 = vpop.f32.mrf.mxu0  ;;  %v6669_v1 = vadd.f32 %v10385_v9, %v6251_v29  ;;  %v14671_v4 = vld [vmem:[#allocation18_spill] sm:$0xff]  ;;  %v14673_v9 = vld [vmem:[#allocation88_spill] sm:$0xff] }
 0x407   : > { %v6716_v40 = vmax.f32 %v6700_v2, %v6702_v14  ;;  %v6701_v22 = vadd.f32 %v14029_v8, %v6678_v15  ;;  %v6681_v33 = vmax.f32 %v6488_v43, %v6665_v18  ;;  %v6487_v21 = vadd.f32 %v6424_v12, %v6069_v45  ;;  %v6621_v30 = vpop.f32.mrf.mxu1  ;;  %v14672_v15 = vld [vmem:[#allocation56_spill] sm:$0xff]  ;;  %v14676_v12 = vld [vmem:[#allocation65_spill] sm:$0xff]  ;;  %v14679_v29 = vld [vmem:[#allocation90_spill] sm:$0xff] }
 0x408   : > { %v10328_v58 = vpop.f32.mrf.mxu0  ;;  %v6076_v19 = vadd.f32 %v14671_v4, %v14670_v36  ;;  %v6668_v37 = vadd.f32 %v6621_v30, %v6250_v28  ;;  %v8156_v43 = vld [vmem:[%s14215_s5 + $0x128] sm:$0xff]  ;;  %v5838_v32 = vadd.f32 %v14674_v62, %v14673_v9  ;;  %v14685_v28 = vld [vmem:[#allocation94_spill] sm:$0xff]  ;;  %v14692_v9 = vld [vmem:[#allocation35_spill] sm:$0xff] }
 0x409   : > { %v6715_v27 = vmax.f32 %v6699_v10, %v6701_v22  ;;  %v6680_v35 = vmax.f32 %v6487_v21, %v6664_v55  ;;  %v10388_v51 = vpop.f32.mrf.mxu1  ;;  %v6490_v48 = vadd.f32 %v10328_v58, %v6072_v60  ;;  %v6718_v63 = vmax.f32 %v6716_v40, 0.0  ;;  %v14675_v10 = vld [vmem:[#allocation16_spill] sm:$0xff] }
 0x40a   : > { %v6434_v59 = vpop.f32.mrf.mxu0  ;;  %v6704_v26 = vadd.f32 %v14029_v8, %v6681_v33  ;;  %v6252_v55 = vadd.f32 %v14675_v10, %v5834_v24  ;;  %v6075_v40 = vadd.f32 %v14676_v12, %v5657_v41  ;;  %v6671_v30 = vadd.f32 %v10388_v51, %v6253_v13  ;;  %v14680_v24 = vld [vmem:[#allocation97_spill] sm:$0xff]  ;;  %v14681_v41 = vld [vmem:[#allocation15_spill] sm:$0xff]  ;;  %v8152_v12 = vld [vmem:[%s14215_s5 + $0x108] sm:$0xff] }
 0x40b   : > { %v6717_v17 = vmax.f32 %v6715_v27, 0.0  ;;  %v6489_v16 = vadd.f32 %v6434_v59, %v6071_v53  ;;  %v6631_v54 = vpop.f32.mrf.mxu1  ;;  %v6683_v61 = vmax.f32 %v6490_v48, %v6667_v38  ;;  %v6703_v18 = vadd.f32 %v14029_v8, %v6680_v35  ;;  %v14677_v53 = vld [vmem:[#allocation86_spill] sm:$0xff]  ;;  %v14678_v27 = vld [vmem:[#allocation61_spill] sm:$0xff] }
 0x40c   : > { %v10331_v25 = vpop.f32.mrf.mxu0  ;;  %v5662_v35 = vadd.f32 %v14678_v27, %v14677_v53  ;;  %v6255_v38 = vadd.f32 %v14680_v24, %v14679_v29  ;;  %v14682_v48 = vld [vmem:[#allocation98_spill] sm:$0xff]  ;;  %v6078_v51 = vadd.f32 %v14684_v23, %v14683_v44  ;;  %v6077_v42 = vadd.f32 %v14686_v46, %v14685_v28  ;;  %v8142_v53 = vld [vmem:[%s14215_s5 + $0xc8] sm:$0xff]  ;;  %v8151_v27 = vld [vmem:[%s14215_s5 + $0x100] sm:$0xff] }
 0x40d   : > { %v6682_v34 = vmax.f32 %v6489_v16, %v6666_v11  ;;  %v6492_v31 = vadd.f32 %v10331_v25, %v6074_v56  ;;  %v10391_v52 = vpop.f32.mrf.mxu1  ;;  %10438 = vmatprep.mubr.msk.f32.mxu1 %vm6744_vm3, %v6717_v17  ;;  %v6706_v0 = vadd.f32 %v14029_v8, %v6683_v61  ;;  %v6254_v59 = vadd.f32 %v14682_v48, %v14681_v41  ;;  %v8141_v24 = vld [vmem:[%s14215_s5 + $0xc0] sm:$0xff]  ;;  %v8140_v23 = vld [vmem:[%s14215_s5 + $0xb8] sm:$0xff]  ;;  %v7120_v46 = vld [vmem:[%s14217_s7 + $0x30] sm:$0x3] }
 0x40e   : > { %v6444_v45 = vpop.f32.mrf.mxu0  ;;  %10439 = vmatmul.mubr.msk.f32.vlgmr.msra.gmra.mxu1 %vm6744_vm3, %v6718_v63  ;;  %v6670_v11 = vadd.f32 %v6631_v54, %v6252_v55  ;;  %v6673_v61 = vadd.f32 %v10391_v52, %v6255_v38  ;;  %v6080_v62 = vadd.f32 %v14692_v9, %v5662_v35  ;;  %v8150_v38 = vld [vmem:[%s14215_s5 + $0xf8] sm:$0xff] }
 0x40f   : > { %v6705_v57 = vadd.f32 %v14029_v8, %v6682_v34  ;;  %v6685_v2 = vmax.f32 %v6492_v31, %v6669_v1  ;;  %v6491_v14 = vadd.f32 %v6444_v45, %v6073_v20  ;;  %10465 = vmatpush3.msra.mxu1 %v14672_v15  ;;  %v6730_v22 = vmax.f32 %v6704_v26, %v6706_v0  ;;  %v6641_v33 = vpop.f32.mrf.mxu1  ;;  %v8145_v1 = vld [vmem:[%s14215_s5 + $0xe0] sm:$0xff]  ;;  %v14691_v15 = vld [vmem:[#allocation62_spill] sm:$0xff] }
 0x410   : > { %v10334_v21 = vpop.f32.mrf.mxu0  ;;  %10466 = vmatprep.subr.mxu1 %v8157_v49  ;;  %v14687_v34 = vld [vmem:[#allocation87_spill] sm:$0xff]  ;;  %v6672_v36 = vadd.f32 %v6641_v33, %v6254_v59 }
 0x411   : > { %v6729_v7 = vmax.f32 %v6703_v18, %v6705_v57  ;;  %v6684_v60 = vmax.f32 %v6491_v14, %v6668_v37  ;;  %v6494_v58 = vadd.f32 %v10334_v21, %v6076_v19  ;;  %10467 = vmatpush3.msra.mxu1 %v8157_v49  ;;  %v6732_v13 = vmax.f32 %v6730_v22, 0.0  ;;  %v10394_v25 = vpop.f32.mrf.mxu1  ;;  %v14688_v31 = vld [vmem:[#allocation95_spill] sm:$0xff]  ;;  %v8153_v19 = vld [vmem:[%s14215_s5 + $0x110] sm:$0xff]  ;;  %v14689_v18 = vld [vmem:[#allocation14_spill] sm:$0xff] }
 0x412   : > { %v6454_v56 = vpop.f32.mrf.mxu0  ;;  %10468 = vmatprep.subr.mxu1 %v8156_v43  ;;  %v14103_v63 = vadd.f32 %v14029_v8, %v6685_v2  ;;  %v5661_v49 = vadd.f32 %v14688_v31, %v14687_v34  ;;  %v8144_v57 = vld [vmem:[%s14215_s5 + $0xd8] sm:$0xff]  ;;  %v14690_v2 = vld [vmem:[#allocation99_spill] sm:$0xff] }
 0x413   : > { %v6731_v17 = vmax.f32 %v6729_v7, 0.0  ;;  %v6687_v16 = vmax.f32 %v6494_v58, %v6671_v30  ;;  %v6493_v47 = vadd.f32 %v6454_v56, %v6075_v40  ;;  %10469 = vmatpush3.msra.mxu1 %v8156_v43  ;;  %v6707_v52 = vadd.f32 %v14029_v8, %v6684_v60  ;;  %v6651_v10 = vpop.f32.mrf.mxu1  ;;  %v14693_v40 = vld [vmem:[#allocation19_spill] sm:$0xff] }
 0x414   : > { %v10337_v39 = vpop.f32.mrf.mxu0  ;;  %10470 = vmatprep.subr.mxu1 %v8155_v5  ;;  %v6257_v14 = vadd.f32 %v14690_v2, %v14049_v6  ;;  %v6256_v43 = vadd.f32 %v14691_v15, %v5838_v32  ;;  %v6079_v22 = vadd.f32 %v14693_v40, %v5661_v49  ;;  %v8143_v6 = vld [vmem:[%s14215_s5 + $0xd0] sm:$0xff] }
 0x415   : > { %v14106_v54 = vadd.f32 %v14029_v8, %v6687_v16  ;;  %v6686_v3 = vmax.f32 %v6493_v47, %v6670_v11  ;;  %v6496_v20 = vadd.f32 %v10337_v39, %v6078_v51  ;;  %10415 = vmatprep.mubr.msk.f32.mxu0 %vm6744_vm3, %v6731_v17  ;;  %10471 = vmatpush3.msra.mxu1 %v8155_v5  ;;  %v8149_v51 = vld [vmem:[%s14215_s5 + $0xf0] sm:$0xff]  ;;  %v8138_v16 = vld [vmem:[%s14215_s5 + $0xa8] sm:$0xff]  ;;  %v7114_v39 = vld [vmem:[%s14217_s7] sm:$0xff] }
 0x416   : > { %v6464_v4 = vpop.f32.mrf.mxu0  ;;  %10416 = vmatmul.mubr.msk.f32.vlgmr.msra.gmra.mxu0 %vm6744_vm3, %v6732_v13  ;;  %10472 = vmatprep.subr.mxu1 %v8154_v50  ;;  %v6675_v32 = vadd.f32 %v10394_v25, %v6257_v14  ;;  %v6674_v58 = vadd.f32 %v6651_v10, %v6256_v43  ;;  %v8139_v11 = vld [vmem:[%s14215_s5 + $0xb0] sm:$0xff]  ;;  %v7118_v13 = vld [vmem:[%s14217_s7 + $0x20] sm:$0xff]  ;;  %v7115_v25 = vld [vmem:[%s14217_s7 + $0x8] sm:$0xff] }
 0x417   : > { %v6908_v26 = vmax.f32 %v14103_v63, %v14106_v54  ;;  %v6709_v37 = vadd.f32 %v14029_v8, %v6686_v3  ;;  %v6689_v0 = vmax.f32 %v6496_v20, %v6673_v61  ;;  %v6495_v45 = vadd.f32 %v6464_v4, %v6077_v42  ;;  %10442 = vmatpush3.msra.mxu0 %v14689_v18  ;;  %v7119_v42 = vld [vmem:[%s14217_s7 + $0x28] sm:$0xff]  ;;  %v7117_v63 = vld [vmem:[%s14217_s7 + $0x18] sm:$0xff]  ;;  %v7116_v61 = vld [vmem:[%s14217_s7 + $0x10] sm:$0xff] }
 0x418   : > { %10443 = vmatprep.subr.mxu0 %v8145_v1  ;;  %v10340_v55 = vpop.f32.mrf.mxu0  ;;  %10473 = vmatpush3.msra.mxu1 %v8154_v50  ;;  %v8137_v50 = vld [vmem:[%s14215_s5 + $0xa0] sm:$0xff] }
 0x419   : > { %v6907_v33 = vmax.f32 %v6707_v52, %v6709_v37  ;;  %v6688_v21 = vmax.f32 %v6495_v45, %v6672_v36  ;;  %10444 = vmatpush3.msra.mxu0 %v8145_v1  ;;  %10474 = vmatprep.subr.mxu1 %v8153_v19  ;;  %v6498_v30 = vadd.f32 %v10340_v55, %v6080_v62  ;;  %v6910_v28 = vmax.f32 %v6908_v26, 0.0  ;;  %v8161_v26 = vld [vmem:[%s14216_s6] ss:$0 sm:$0xff] }
 0x41a   : > { %10445 = vmatprep.subr.mxu0 %v8144_v57  ;;  %v6474_v7 = vpop.f32.mrf.mxu0  ;;  %10475 = vmatpush3.msra.mxu1 %v8153_v19  ;;  %v6712_v41 = vadd.f32 %v14029_v8, %v6689_v0  ;;  %v8162_v43 = vld [vmem:[%s14218_s8] ss:$0 sm:$0xff] }
 0x41b   : > { %v6909_v60 = vmax.f32 %v6907_v33, 0.0  ;;  %v6497_v5 = vadd.f32 %v6474_v7, %v6079_v22  ;;  %10446 = vmatpush3.msra.mxu0 %v8144_v57  ;;  %10476 = vmatprep.subr.mxu1 %v8152_v12  ;;  %v6691_v35 = vmax.f32 %v6498_v30, %v6675_v32  ;;  %v6711_v59 = vadd.f32 %v14029_v8, %v6688_v21 }
 0x41c   : > { %10447 = vmatprep.subr.mxu0 %v8143_v6  ;;  %10477 = vmatpush3.msra.mxu1 %v8152_v12 }
 0x41d   : > { %v6690_v29 = vmax.f32 %v6497_v5, %v6674_v58  ;;  %10448 = vmatpush3.msra.mxu0 %v8143_v6  ;;  %10461 = vmatprep.mubr.msk.f32.mxu0 %vm6744_vm3, %v6909_v60  ;;  %v6714_v48 = vadd.f32 %v14029_v8, %v6691_v35 }
 0x41e   : > { %10449 = vmatprep.subr.mxu0 %v8142_v53  ;;  %10478 = vmatprep.subr.mxu1 %v8151_v27 }
 0x41f   : > { %v6713_v44 = vadd.f32 %v14029_v8, %v6690_v29  ;;  %10450 = vmatpush3.msra.mxu0 %v8142_v53  ;;  %10479 = vmatpush3.msra.mxu1 %v8151_v27  ;;  %v7006_v56 = vmax.f32 %v6712_v41, %v6714_v48 }
 0x420   : > { %10451 = vmatprep.subr.mxu0 %v8141_v24  ;;  %10480 = vmatprep.subr.mxu1 %v8150_v38 }
 0x421   : > { %v7005_v17 = vmax.f32 %v6711_v59, %v6713_v44  ;;  %10452 = vmatpush3.msra.mxu0 %v8141_v24  ;;  %10481 = vmatpush3.msra.mxu1 %v8150_v38  ;;  %v7008_v47 = vmax.f32 %v7006_v56, 0.0 }
 0x422   : > { %10453 = vmatprep.subr.mxu0 %v8140_v23  ;;  %10482 = vmatprep.subr.mxu1 %v8149_v51 }
 0x423   : > { %v7007_v8 = vmax.f32 %v7005_v17, 0.0  ;;  %10454 = vmatpush3.msra.mxu0 %v8140_v23  ;;  %10483 = vmatpush3.msra.mxu1 %v8149_v51 }
 0x424   : > { %10455 = vmatprep.subr.mxu0 %v8139_v11 }
 0x425   : > { %10456 = vmatpush3.msra.mxu0 %v8139_v11  ;;  %10484 = vmatprep.mubr.msk.f32.mxu1 %vm6744_vm3, %v7007_v8 }
 0x426   : > { %10457 = vmatprep.subr.mxu0 %v8138_v16  ;;  %10485 = vmatmul.mubr.msk.f32.vlgmr.msra.gmra.mxu1 %vm6744_vm3, %v7008_v47 }
 0x427   : > { %10458 = vmatpush3.msra.mxu0 %v8138_v16 }
 0x428   : > { %10459 = vmatprep.subr.mxu0 %v8137_v50 }
 0x429   : > { %10460 = vmatpush3.msra.mxu0 %v8137_v50 }
 0x42a   : > { %10462 = vmatmul.mubr.msk.f32.vlgmr.msra.gmra.mxu0 %vm6744_vm3, %v6910_v28  ;;  %10487 = vmatprep.subr.msk.mxu0 %vm7135_vm4, %v7120_v46 }
 0x42b   : > { %10488 = vmatpush3.msk.msra.mxu0 %vm7135_vm4, %v7120_v46 }
 0x42c   : > { %10489 = vmatprep.subr.mxu0 %v7119_v42 }
 0x42d   : > { %10490 = vmatpush3.msra.mxu0 %v7119_v42 }
 0x42e   : > { %10491 = vmatprep.subr.mxu0 %v7118_v13 }
 0x42f   : > { %10492 = vmatpush3.msra.mxu0 %v7118_v13 }
 0x430   : > { %10493 = vmatprep.subr.mxu0 %v7117_v63 }
 0x431   : > { %10494 = vmatpush3.msra.mxu0 %v7117_v63 }
 0x432   : > { %10495 = vmatprep.subr.mxu0 %v7116_v61 }
 0x433   : > { %10496 = vmatpush3.msra.mxu0 %v7116_v61 }
 0x434   : > { %10497 = vmatprep.subr.mxu0 %v7115_v25 }
 0x435   : > { %10498 = vmatpush3.msra.mxu0 %v7115_v25 }
 0x436   : > { %10499 = vmatprep.subr.mxu0 %v7114_v39 }
 0x437   : > { %10500 = vmatpush3.msra.mxu0 %v7114_v39 }
 0x4ce   : > { %v10440_v54 = vpop.f32.mrf.mxu1 }
 0x4d0   : > { %v6898_v20 = vpop.f32.mrf.mxu1 }
 0x4d6   : > { %v10417_v3 = vpop.f32.mrf.mxu0 }
 0x4d7   : > { %v6904_v34 = vadd.f32 %v10440_v54, %v10417_v3 }
 0x4d8   : > { %v6817_v1 = vpop.f32.mrf.mxu0 }
 0x4d9   : > { %v6899_v52 = vadd.f32 %v6898_v20, %v6817_v1 }
 0x4e6   : > { %v10486_v31 = vpop.f32.mrf.mxu1 }
 0x4e8   : > { %v7092_v0 = vpop.f32.mrf.mxu1 }
 0x4ea   : > { %v10463_v49 = vpop.f32.mrf.mxu0 }
 0x4eb   : > { %v7004_v36 = vadd.f32 %v10463_v49, %v6904_v34 }
 0x4ec   : > { %v6994_v4 = vpop.f32.mrf.mxu0 }
 0x4ed   : > { %v7102_v19 = vadd.f32 %v10486_v31, %v7004_v36  ;;  %v7003_v37 = vadd.f32 %v6994_v4, %v6899_v52 }
 0x4ef   : > { %v7101_v45 = vadd.f32 %v7092_v0, %v7003_v37  ;;  %v7111_v18 = vadd.f32 %v8161_v26, %v7102_v19 }
 0x4f1   : > { %v7110_v57 = vadd.f32 %v8161_v26, %v7101_v45  ;;  %v7113_v14 = vmax.f32 %v7111_v18, 0.0 }
 0x4f3   : > { %v7112_v2 = vmax.f32 %v7110_v57, 0.0 }
 0x4f5   : > { %10501 = vmatprep.mubr.msk.f32.mxu0 %vm7128_vm5, %v7112_v2 }
 0x4f6   : > { %10502 = vmatmul.mubr.msk.f32.vlgmr.msra.gmra.mxu0 %vm7128_vm5, %v7113_v14 }
 0x5b6   : > { %v10503_v15 = vpop.f32.mrf.mxu0 }
 0x5b7   : > { %v7211_v10 = vadd.f32 %v10503_v15, %v8162_v43 }
 0x5b8   : > { %v7205_v9 = vpop.f32.mrf.mxu0 }
 0x5b9   : > { %v7206_v62 = vadd.f32 %v8162_v43, %v7205_v9 }
 0x5bb   : > { %7214 = vmax.xlane.f32.xlu0 %v7206_v62 }
 0x5bf   : > { %7216 = vmax.xlane.f32.xlu0 %v7211_v10 }
 0x644   : > { %v7215_v55 = vpop.xlane.xlu0 %7214 }
 0x645   : > { %v7218_v12 = vsub.f32 %v7206_v62, %v7215_v55 }
 0x647   : > { %v7220_v40 = vmul.f32 1.442695, %v7218_v12 }
 0x648   : > { %v7217_v22 = vpop.xlane.xlu0 %7216 }
 0x649   : > { %v7219_v33 = vsub.f32 %v7211_v10, %v7217_v22  ;;  %10512 = vpow2.f32 %v7220_v40 }
 0x64b   : > { %v7222_v21 = vmul.f32 1.442695, %v7219_v33 }
 0x64d   : > { %10514 = vpow2.f32 %v7222_v21 }
 0x656   : > { %v10513_v6 = vpop.eup %10512 }
 0x657   : > { %7224 = vadd.xlane.f32.xlu1 %v10513_v6 }
 0x65a   : > { %v10515_v32 = vpop.eup %10514 }
 0x65b   : > { %7226 = vadd.xlane.f32.xlu1 %v10515_v32 }
 0x6e0   : > { %v7225_v30 = vpop.xlane.xlu1 %7224 }
 0x6e1   : > { %10516 = vlog2.f32 %v7225_v30 }
 0x6e4   : > { %v7227_v7 = vpop.xlane.xlu1 %7226 }
 0x6e5   : > { %10518 = vlog2.f32 %v7227_v7 }
 0x6ee   : > { %v10517_v60 = vpop.eup %10516 }
 0x6ef   : > { %v7229_v58 = vmul.f32 0.6931472, %v10517_v60 }
 0x6f1   : > { %v7232_v5 = vsub.f32 %v7218_v12, %v7229_v58 }
 0x6f2   : > { %v10519_v53 = vpop.eup %10518 }
 0x6f3   : > { %7234 = vst [vmem:[%s334_s14] sm:$0xff] %v7232_v5  ;;  %v7231_v27 = vmul.f32 0.6931472, %v10519_v53 }
 0x6f5   : > { %v7233_v35 = vsub.f32 %v7219_v33, %v7231_v27 }
 0x6f7   : > { %7235 = vst [vmem:[%s334_s14 + $0x8] sm:$0xff] %v7233_v35 }
 0x6f8 PF: > { %s19_s30 = sadd.s32 1, %s10527_s30  }
 0x6f9   : > { %p16_p5 = scmp.ge.s32.totalorder %s19_s30, 4  }
 0x6fb   :  { %18 = sbr.rel (!%p16_p5) target bundleno = 1 (0x1), region = 107 }

</bundles_post_ra>
